<compile_context>
chip_gen: v6e
topology: v6e:2x2x1
jax: 0.10.0
libtpu: 0.0.40
codegen_flags: <defaults>
</compile_context>

<pallas_src>
import functools

import jax
import jax.numpy as jnp
from jax.experimental import pallas as pl
from jax.experimental.pallas import tpu as pltpu

IN_FEATURES = 12288
OUT_FEATURES = 10
OUT_PAD = 128          # lane-dense padded class dimension
NEG_BIAS = -1e30       # bias for padded class lanes (never wins max / adds to sum)


def _linear_logsoftmax_kernel(x_ref, w_ref, b_ref, o_ref):
    # logits = x @ W + b  (MXU matmul, f32 accumulation)
    logits = jnp.dot(x_ref[...], w_ref[...], preferred_element_type=jnp.float32)
    logits = logits + b_ref[...]                     # (TILE_B, 128) + (1, 128)

    # Numerically-stable log-softmax over the (padded) class axis.
    # Padded lanes sit at ~-1e30, so exp() underflows to 0 and they are inert.
    m = jnp.max(logits, axis=-1, keepdims=True)
    shifted = logits - m
    lse = jnp.log(jnp.sum(jnp.exp(shifted), axis=-1, keepdims=True))
    o_ref[...] = (shifted - lse).astype(o_ref.dtype)


def _round_up(x, m):
    return ((x + m - 1) // m) * m


@functools.partial(jax.jit, static_argnames=("tile_b",))
def derived_model5_forward(x, w, b, *, tile_b=256):
    """Linear(12288 -> 10) + LogSoftmax(dim=1).

    x: (B, 12288) f32
    w: (10, 12288) f32  (PyTorch nn.Linear layout)
    b: (10,)       f32
    returns (B, 10) f32 log-probabilities.
    """
    B, in_feat = x.shape
    out_feat = w.shape[0]

    # Layout plumbing (once, outside the kernel): pre-transposed weight padded
    # to a lane-dense 128-wide class dim; padded bias lanes get -1e30.
    w_t = jnp.zeros((in_feat, OUT_PAD), jnp.float32).at[:, :out_feat].set(w.T)
    b_p = jnp.full((1, OUT_PAD), NEG_BIAS, jnp.float32).at[0, :out_feat].set(b)

    # Batch tiling: tile size is a multiple of 8 and capped so the
    # double-buffered x tile + resident weight fit VMEM on all generations.
    eff_tile = min(tile_b, _round_up(B, 8))
    b_rows = _round_up(B, eff_tile)
    if b_rows != B:
        x = jnp.pad(x, ((0, b_rows - B), (0, 0)))   # pad rows are sliced off below

    grid = (b_rows // eff_tile,)

    out = pl.pallas_call(
        _linear_logsoftmax_kernel,
        out_shape=jax.ShapeDtypeStruct((b_rows, OUT_PAD), jnp.float32),
        grid_spec=pltpu.PrefetchScalarGridSpec(
            num_scalar_prefetch=0,
            grid=grid,
            in_specs=[
                pl.BlockSpec((eff_tile, in_feat), lambda i: (i, 0)),   # stream x
                pl.BlockSpec((in_feat, OUT_PAD), lambda i: (0, 0)),    # resident W
                pl.BlockSpec((1, OUT_PAD), lambda i: (0, 0)),          # resident b
            ],
            out_specs=pl.BlockSpec((eff_tile, OUT_PAD), lambda i: (i, 0)),
        ),
        compiler_params=pltpu.CompilerParams(
            # Independent batch tiles -> split across TensorCores on v7x.
            dimension_semantics=("parallel",),
            # ~36 MiB peak (2x 12 MiB x-tile + padded weight) at TILE_B=256;
            # leave headroom under v7x's 64 MiB physical VMEM.
            vmem_limit_bytes=48 * 1024 * 1024,
        ),
    )(x, w_t, b_p)

    return out[:B, :out_feat]


def _reference(x, w, b):
    logits = x @ w.T + b
    m = jnp.max(logits, axis=-1, keepdims=True)
    s = logits - m
    return s - jnp.log(jnp.sum(jnp.exp(s), axis=-1, keepdims=True))


if __name__ == "__main__":
    key = jax.random.PRNGKey(0)
    kx, kw, kb = jax.random.split(key, 3)

    B = 8  # small example batch; kernel handles arbitrary B via batch tiling

    # PyTorch nn.Linear-shaped parameters: W (10, 12288), b (10,)
    w = jax.random.normal(kw, (OUT_FEATURES, IN_FEATURES), dtype=jnp.float32) * 0.02
    b = jax.random.normal(kb, (OUT_FEATURES,), dtype=jnp.float32) * 0.1
    x = jax.random.normal(kx, (B, IN_FEATURES), dtype=jnp.float32)

    out = derived_model5_forward(x, w, b)
    out = jax.block_until_ready(out)

    ref = _reference(x, w, b)
    assert out.shape == (B, OUT_FEATURES)
    assert jnp.allclose(out, ref, atol=1e-3, rtol=1e-3), "mismatch vs reference"

    print("KERNEL_OK")
</pallas_src>

<mosaic_0001>
module attributes {stable_mosaic.version = 11 : i64} {
  func.func @_linear_logsoftmax_kernel(%arg0: i32, %arg1: memref<8x12288xf32, #tpu.memory_space<vmem>>, %arg2: memref<12288x128xf32, #tpu.memory_space<vmem>>, %arg3: memref<1x128xf32, #tpu.memory_space<vmem>>, %arg4: memref<8x128xf32, #tpu.memory_space<vmem>>) attributes {dimension_semantics = [#tpu.dimension_semantics<parallel>], iteration_bounds = array<i64: 1>, scalar_prefetch = 0 : i64, scratch_operands = 0 : i64, tpu.core_type = #tpu.core_type<tc>, window_params = [{transform_indices = @transform_0, window_bounds = array<i64: 8, 12288>}, {pipeline_mode = #tpu.pipeline_mode<synchronous>, transform_indices = @transform_1, window_bounds = array<i64: 12288, 128>}, {pipeline_mode = #tpu.pipeline_mode<synchronous>, transform_indices = @transform_2, window_bounds = array<i64: 1, 128>}, {transform_indices = @transform_3, window_bounds = array<i64: 8, 128>}]} {
    %c0 = arith.constant 0 : index
    %c0_0 = arith.constant 0 : index
    %0 = vector.load %arg1[%c0, %c0_0] : memref<8x12288xf32, #tpu.memory_space<vmem>>, vector<8x12288xf32>
    %c0_1 = arith.constant 0 : index
    %c0_2 = arith.constant 0 : index
    %1 = vector.load %arg2[%c0_1, %c0_2] : memref<12288x128xf32, #tpu.memory_space<vmem>>, vector<12288x128xf32>
    %cst = arith.constant dense<0.000000e+00> : vector<8x128xf32>
    %2 = tpu.matmul %0, %1, %cst {dimension_numbers = #tpu.dot_dimension_numbers<[1], [0], [0], [1], [0, 0, 1, 1], [], []>} : vector<8x12288xf32>, vector<12288x128xf32>, vector<8x128xf32> -> vector<8x128xf32>
    %c0_3 = arith.constant 0 : index
    %c0_4 = arith.constant 0 : index
    %3 = vector.load %arg3[%c0_3, %c0_4] : memref<1x128xf32, #tpu.memory_space<vmem>>, vector<1x128xf32>
    %4 = vector.broadcast %3 : vector<1x128xf32> to vector<8x128xf32>
    %5 = arith.addf %2, %4 : vector<8x128xf32>
    %cst_5 = arith.constant dense<0xFF800000> : vector<8xf32>
    %6 = vector.multi_reduction <maximumf>, %5, %cst_5 [1] : vector<8x128xf32> to vector<8xf32>
    %7 = vector.shape_cast %6 : vector<8xf32> to vector<8x1xf32>
    %8 = vector.broadcast %7 : vector<8x1xf32> to vector<8x128xf32>
    %9 = arith.subf %5, %8 : vector<8x128xf32>
    %10 = math.exp %9 : vector<8x128xf32>
    %cst_6 = arith.constant dense<0.000000e+00> : vector<8xf32>
    %11 = vector.multi_reduction <add>, %10, %cst_6 [1] : vector<8x128xf32> to vector<8xf32>
    %12 = vector.shape_cast %11 : vector<8xf32> to vector<8x1xf32>
    %13 = math.log %12 : vector<8x1xf32>
    %14 = vector.broadcast %13 : vector<8x1xf32> to vector<8x128xf32>
    %15 = arith.subf %9, %14 : vector<8x128xf32>
    %c0_7 = arith.constant 0 : index
    %c0_8 = arith.constant 0 : index
    %16 = vector.load %arg4[%c0_7, %c0_8] : memref<8x128xf32, #tpu.memory_space<vmem>>, vector<8x128xf32>
    tpu.vector_store %arg4[%c0_7, %c0_8], %15 {strides = array<i32>} : memref<8x128xf32, #tpu.memory_space<vmem>>, vector<8x128xf32>,
    return
  }
  func.func @transform_0(%arg0: i32) -> (i32, i32) {
    %c0_i32 = arith.constant 0 : i32
    %c0_i32_0 = arith.constant 0 : i32
    return %arg0, %c0_i32 : i32, i32
  }
  func.func @transform_1(%arg0: i32) -> (i32, i32) {
    %c0_i32 = arith.constant 0 : i32
    %c0_i32_0 = arith.constant 0 : i32
    %c0_i32_1 = arith.constant 0 : i32
    return %c0_i32, %c0_i32_0 : i32, i32
  }
  func.func @transform_2(%arg0: i32) -> (i32, i32) {
    %c0_i32 = arith.constant 0 : i32
    %c0_i32_0 = arith.constant 0 : i32
    %c0_i32_1 = arith.constant 0 : i32
    return %c0_i32, %c0_i32_0 : i32, i32
  }
  func.func @transform_3(%arg0: i32) -> (i32, i32) {
    %c0_i32 = arith.constant 0 : i32
    %c0_i32_0 = arith.constant 0 : i32
    return %arg0, %c0_i32 : i32, i32
  }
}

</mosaic_0001>

<bundles_post_ra>
// kernel: derived_model5_forward.1
= control target key start
LH: loop header
LB: loop body
LE: loop exit
PB: predicated region body
PF: predicated region fallthrough
CT: control target
= control target key end

     0   :  { %s11670_s0 = inlined_call_operand.vmem [shape: f32[8,12288], index: 0, kind: input, shape index: {}]   ;;  %s11671_s1 = inlined_call_operand.vmem [shape: f32[12288,128], index: 1, kind: input, shape index: {}]   ;;  %s11672_s2 = inlined_call_operand.vmem [shape: f32[1,128], index: 2, kind: input, shape index: {}]   ;;  %s11673_s3 = inlined_call_operand.hbm [shape: f32[8,128], index: 3, kind: output, shape index: {}]  }
   0x1   :  { %v142_v0 = vld [vmem:[%s11671_s1 + $0xf8] sm:$0xff]  ;;  %v141_v4 = vld [vmem:[%s11671_s1 + $0xf0] sm:$0xff]  ;;  %v140_v8 = vld [vmem:[%s11671_s1 + $0xe8] sm:$0xff] }
   0x2   :  { %v174_v1 = vld [vmem:[%s11671_s1 + $0x1f8] sm:$0xff]  ;;  %5040 = vmatprep.subr.mxu0 %v142_v0  ;;  %v173_v5 = vld [vmem:[%s11671_s1 + $0x1f0] sm:$0xff]  ;;  %v172_v9 = vld [vmem:[%s11671_s1 + $0x1e8] sm:$0xff] }
   0x3   :  { %v126_v2 = vld [vmem:[%s11671_s1 + $0x78] sm:$0xff]  ;;  %5075 = vmatprep.subr.mxu1 %v174_v1  ;;  %v125_v6 = vld [vmem:[%s11671_s1 + $0x70] sm:$0xff]  ;;  %v124_v10 = vld [vmem:[%s11671_s1 + $0x68] sm:$0xff] }
   0x4   :  { %v158_v3 = vld [vmem:[%s11671_s1 + $0x178] sm:$0xff]  ;;  %5041 = vmatpush3.msra.mxu0 %v126_v2  ;;  %v157_v7 = vld [vmem:[%s11671_s1 + $0x170] sm:$0xff]  ;;  %v156_v11 = vld [vmem:[%s11671_s1 + $0x168] sm:$0xff] }
   0x5   :  { %5076 = vmatpush3.msra.mxu1 %v158_v3  ;;  %5042 = vmatprep.subr.mxu0 %v141_v4  ;;  %v139_v12 = vld [vmem:[%s11671_s1 + $0xe0] sm:$0xff]  ;;  %v138_v16 = vld [vmem:[%s11671_s1 + $0xd8] sm:$0xff]  ;;  %v137_v20 = vld [vmem:[%s11671_s1 + $0xd0] sm:$0xff] }
   0x6   :  { %5077 = vmatprep.subr.mxu1 %v173_v5  ;;  %5043 = vmatpush3.msra.mxu0 %v125_v6  ;;  %v171_v13 = vld [vmem:[%s11671_s1 + $0x1e0] sm:$0xff]  ;;  %v170_v17 = vld [vmem:[%s11671_s1 + $0x1d8] sm:$0xff]  ;;  %v169_v21 = vld [vmem:[%s11671_s1 + $0x1d0] sm:$0xff] }
   0x7   :  { %5078 = vmatpush3.msra.mxu1 %v157_v7  ;;  %5044 = vmatprep.subr.mxu0 %v140_v8  ;;  %v123_v14 = vld [vmem:[%s11671_s1 + $0x60] sm:$0xff]  ;;  %v122_v18 = vld [vmem:[%s11671_s1 + $0x58] sm:$0xff]  ;;  %v121_v22 = vld [vmem:[%s11671_s1 + $0x50] sm:$0xff] }
   0x8   :  { %5079 = vmatprep.subr.mxu1 %v172_v9  ;;  %v155_v15 = vld [vmem:[%s11671_s1 + $0x160] sm:$0xff]  ;;  %5045 = vmatpush3.msra.mxu0 %v124_v10  ;;  %v154_v19 = vld [vmem:[%s11671_s1 + $0x158] sm:$0xff]  ;;  %v153_v23 = vld [vmem:[%s11671_s1 + $0x150] sm:$0xff] }
   0x9   :  { %5080 = vmatpush3.msra.mxu1 %v156_v11  ;;  %5046 = vmatprep.subr.mxu0 %v139_v12  ;;  %v136_v24 = vld [vmem:[%s11671_s1 + $0xc8] sm:$0xff]  ;;  %v135_v28 = vld [vmem:[%s11671_s1 + $0xc0] sm:$0xff]  ;;  %v134_v32 = vld [vmem:[%s11671_s1 + $0xb8] sm:$0xff] }
   0xa   :  { %5081 = vmatprep.subr.mxu1 %v171_v13  ;;  %5047 = vmatpush3.msra.mxu0 %v123_v14  ;;  %v168_v25 = vld [vmem:[%s11671_s1 + $0x1c8] sm:$0xff]  ;;  %v167_v29 = vld [vmem:[%s11671_s1 + $0x1c0] sm:$0xff]  ;;  %v166_v33 = vld [vmem:[%s11671_s1 + $0x1b8] sm:$0xff] }
   0xb   :  { %5082 = vmatpush3.msra.mxu1 %v155_v15  ;;  %5048 = vmatprep.subr.mxu0 %v138_v16  ;;  %v120_v26 = vld [vmem:[%s11671_s1 + $0x48] sm:$0xff]  ;;  %v119_v30 = vld [vmem:[%s11671_s1 + $0x40] sm:$0xff]  ;;  %v118_v34 = vld [vmem:[%s11671_s1 + $0x38] sm:$0xff] }
   0xc   :  { %5083 = vmatprep.subr.mxu1 %v170_v17  ;;  %5049 = vmatpush3.msra.mxu0 %v122_v18  ;;  %v152_v27 = vld [vmem:[%s11671_s1 + $0x148] sm:$0xff]  ;;  %v151_v31 = vld [vmem:[%s11671_s1 + $0x140] sm:$0xff]  ;;  %v150_v35 = vld [vmem:[%s11671_s1 + $0x138] sm:$0xff] }
   0xd   :  { %5084 = vmatpush3.msra.mxu1 %v154_v19  ;;  %5050 = vmatprep.subr.mxu0 %v137_v20  ;;  %v133_v36 = vld [vmem:[%s11671_s1 + $0xb0] sm:$0xff]  ;;  %v132_v40 = vld [vmem:[%s11671_s1 + $0xa8] sm:$0xff]  ;;  %v131_v44 = vld [vmem:[%s11671_s1 + $0xa0] sm:$0xff] }
   0xe   :  { %5085 = vmatprep.subr.mxu1 %v169_v21  ;;  %5051 = vmatpush3.msra.mxu0 %v121_v22  ;;  %v165_v37 = vld [vmem:[%s11671_s1 + $0x1b0] sm:$0xff]  ;;  %v164_v41 = vld [vmem:[%s11671_s1 + $0x1a8] sm:$0xff]  ;;  %v163_v45 = vld [vmem:[%s11671_s1 + $0x1a0] sm:$0xff] }
   0xf   :  { %5086 = vmatpush3.msra.mxu1 %v153_v23  ;;  %5052 = vmatprep.subr.mxu0 %v136_v24  ;;  %v117_v38 = vld [vmem:[%s11671_s1 + $0x30] sm:$0xff]  ;;  %v116_v42 = vld [vmem:[%s11671_s1 + $0x28] sm:$0xff]  ;;  %v115_v46 = vld [vmem:[%s11671_s1 + $0x20] sm:$0xff] }
  0x10   :  { %5087 = vmatprep.subr.mxu1 %v168_v25  ;;  %5053 = vmatpush3.msra.mxu0 %v120_v26  ;;  %v149_v39 = vld [vmem:[%s11671_s1 + $0x130] sm:$0xff]  ;;  %v148_v43 = vld [vmem:[%s11671_s1 + $0x128] sm:$0xff]  ;;  %v147_v47 = vld [vmem:[%s11671_s1 + $0x120] sm:$0xff] }
  0x11   :  { %5088 = vmatpush3.msra.mxu1 %v152_v27  ;;  %5054 = vmatprep.subr.mxu0 %v135_v28  ;;  %v130_v48 = vld [vmem:[%s11671_s1 + $0x98] sm:$0xff]  ;;  %v129_v52 = vld [vmem:[%s11671_s1 + $0x90] sm:$0xff]  ;;  %v128_v56 = vld [vmem:[%s11671_s1 + $0x88] sm:$0xff] }
  0x12   :  { %5089 = vmatprep.subr.mxu1 %v167_v29  ;;  %5055 = vmatpush3.msra.mxu0 %v119_v30  ;;  %v162_v49 = vld [vmem:[%s11671_s1 + $0x198] sm:$0xff]  ;;  %v161_v53 = vld [vmem:[%s11671_s1 + $0x190] sm:$0xff]  ;;  %v160_v57 = vld [vmem:[%s11671_s1 + $0x188] sm:$0xff] }
  0x13   :  { %5090 = vmatpush3.msra.mxu1 %v151_v31  ;;  %5056 = vmatprep.subr.mxu0 %v134_v32  ;;  %v114_v50 = vld [vmem:[%s11671_s1 + $0x18] sm:$0xff]  ;;  %v113_v54 = vld [vmem:[%s11671_s1 + $0x10] sm:$0xff]  ;;  %v112_v58 = vld [vmem:[%s11671_s1 + $0x8] sm:$0xff] }
  0x14   :  { %5091 = vmatprep.subr.mxu1 %v166_v33  ;;  %5057 = vmatpush3.msra.mxu0 %v118_v34  ;;  %v146_v51 = vld [vmem:[%s11671_s1 + $0x118] sm:$0xff]  ;;  %v145_v55 = vld [vmem:[%s11671_s1 + $0x110] sm:$0xff]  ;;  %v144_v59 = vld [vmem:[%s11671_s1 + $0x108] sm:$0xff] }
  0x15   :  { %5092 = vmatpush3.msra.mxu1 %v150_v35  ;;  %5058 = vmatprep.subr.mxu0 %v133_v36  ;;  %v127_v60 = vld [vmem:[%s11671_s1 + $0x80] sm:$0xff]  ;;  %v16_v63 = vld [vmem:[%s11670_s0 + $0x8] sm:$0xff]  ;;  %v18_v2 = vld [vmem:[%s11670_s0 + $0x18] sm:$0xff] }
  0x16   :  { %5093 = vmatprep.subr.mxu1 %v165_v37  ;;  %5059 = vmatpush3.msra.mxu0 %v117_v38  ;;  %v159_v61 = vld [vmem:[%s11671_s1 + $0x180] sm:$0xff]  ;;  %v206_v3 = vld [vmem:[%s11671_s1 + $0x2f8] sm:$0xff]  ;;  %v17_v5 = vld [vmem:[%s11670_s0 + $0x10] sm:$0xff] }
  0x17   :  { %5094 = vmatpush3.msra.mxu1 %v149_v39  ;;  %5060 = vmatprep.subr.mxu0 %v132_v40  ;;  %v111_v62 = vld [vmem:[%s11671_s1] sm:$0xff]  ;;  %v238_v4 = vld [vmem:[%s11671_s1 + $0x3f8] sm:$0xff]  ;;  %v205_v8 = vld [vmem:[%s11671_s1 + $0x2f0] sm:$0xff] }
  0x18   :  { %5095 = vmatprep.subr.mxu1 %v164_v41  ;;  %5061 = vmatpush3.msra.mxu0 %v116_v42  ;;  %v143_v0 = vld [vmem:[%s11671_s1 + $0x100] sm:$0xff]  ;;  %v190_v6 = vld [vmem:[%s11671_s1 + $0x278] sm:$0xff]  ;;  %v237_v9 = vld [vmem:[%s11671_s1 + $0x3f0] sm:$0xff] }
  0x19   :  { %5096 = vmatpush3.msra.mxu1 %v148_v43  ;;  %5062 = vmatprep.subr.mxu0 %v131_v44  ;;  %v15_v1 = vld [vmem:[%s11670_s0] sm:$0xff]  ;;  %v222_v7 = vld [vmem:[%s11671_s1 + $0x378] sm:$0xff]  ;;  %v189_v10 = vld [vmem:[%s11671_s1 + $0x270] sm:$0xff] }
  0x1a   :  { %5097 = vmatprep.subr.mxu1 %v163_v45  ;;  %5063 = vmatpush3.msra.mxu0 %v115_v46  ;;  %v221_v11 = vld [vmem:[%s11671_s1 + $0x370] sm:$0xff]  ;;  %v204_v12 = vld [vmem:[%s11671_s1 + $0x2e8] sm:$0xff]  ;;  %v203_v16 = vld [vmem:[%s11671_s1 + $0x2e0] sm:$0xff] }
  0x1b   :  { %5098 = vmatpush3.msra.mxu1 %v147_v47  ;;  %5064 = vmatprep.subr.mxu0 %v130_v48  ;;  %v236_v13 = vld [vmem:[%s11671_s1 + $0x3e8] sm:$0xff]  ;;  %v235_v17 = vld [vmem:[%s11671_s1 + $0x3e0] sm:$0xff]  ;;  %v202_v20 = vld [vmem:[%s11671_s1 + $0x2d8] sm:$0xff] }
  0x1c   :  { %5099 = vmatprep.subr.mxu1 %v162_v49  ;;  %5065 = vmatpush3.msra.mxu0 %v114_v50  ;;  %v188_v14 = vld [vmem:[%s11671_s1 + $0x268] sm:$0xff]  ;;  %v187_v18 = vld [vmem:[%s11671_s1 + $0x260] sm:$0xff]  ;;  %v234_v21 = vld [vmem:[%s11671_s1 + $0x3d8] sm:$0xff] }
  0x1d   :  { %5100 = vmatpush3.msra.mxu1 %v146_v51  ;;  %5066 = vmatprep.subr.mxu0 %v129_v52  ;;  %v220_v15 = vld [vmem:[%s11671_s1 + $0x368] sm:$0xff]  ;;  %v219_v19 = vld [vmem:[%s11671_s1 + $0x360] sm:$0xff]  ;;  %v186_v22 = vld [vmem:[%s11671_s1 + $0x258] sm:$0xff] }
  0x1e   :  { %5101 = vmatprep.subr.mxu1 %v161_v53  ;;  %5067 = vmatpush3.msra.mxu0 %v113_v54  ;;  %v218_v23 = vld [vmem:[%s11671_s1 + $0x358] sm:$0xff]  ;;  %v201_v24 = vld [vmem:[%s11671_s1 + $0x2d0] sm:$0xff]  ;;  %v200_v28 = vld [vmem:[%s11671_s1 + $0x2c8] sm:$0xff] }
  0x1f   :  { %5102 = vmatpush3.msra.mxu1 %v145_v55  ;;  %5068 = vmatprep.subr.mxu0 %v128_v56  ;;  %v233_v25 = vld [vmem:[%s11671_s1 + $0x3d0] sm:$0xff]  ;;  %v232_v29 = vld [vmem:[%s11671_s1 + $0x3c8] sm:$0xff]  ;;  %v199_v32 = vld [vmem:[%s11671_s1 + $0x2c0] sm:$0xff] }
  0x20   :  { %5103 = vmatprep.subr.mxu1 %v160_v57  ;;  %5069 = vmatpush3.msra.mxu0 %v112_v58  ;;  %v185_v26 = vld [vmem:[%s11671_s1 + $0x250] sm:$0xff]  ;;  %v184_v30 = vld [vmem:[%s11671_s1 + $0x248] sm:$0xff]  ;;  %v231_v33 = vld [vmem:[%s11671_s1 + $0x3c0] sm:$0xff] }
  0x21   :  { %5104 = vmatpush3.msra.mxu1 %v144_v59  ;;  %5070 = vmatprep.subr.mxu0 %v127_v60  ;;  %v217_v27 = vld [vmem:[%s11671_s1 + $0x350] sm:$0xff]  ;;  %v216_v31 = vld [vmem:[%s11671_s1 + $0x348] sm:$0xff]  ;;  %v183_v34 = vld [vmem:[%s11671_s1 + $0x240] sm:$0xff] }
  0x22   :  { %5105 = vmatprep.subr.mxu1 %v159_v61  ;;  %5071 = vmatpush3.msra.mxu0 %v111_v62  ;;  %v215_v35 = vld [vmem:[%s11671_s1 + $0x340] sm:$0xff]  ;;  %v198_v36 = vld [vmem:[%s11671_s1 + $0x2b8] sm:$0xff]  ;;  %v197_v40 = vld [vmem:[%s11671_s1 + $0x2b0] sm:$0xff] }
  0x23   :  { %1718 = vmatprep.mubr.f32.mxu0 %v16_v63  ;;  %5106 = vmatpush3.msra.mxu1 %v143_v0  ;;  %v230_v37 = vld [vmem:[%s11671_s1 + $0x3b8] sm:$0xff]  ;;  %v229_v41 = vld [vmem:[%s11671_s1 + $0x3b0] sm:$0xff]  ;;  %v196_v44 = vld [vmem:[%s11671_s1 + $0x2a8] sm:$0xff] }
  0x24   :  { %1719 = vmatmul.mubr.f32.vlgmr.msra.gmra.mxu0 %v15_v1  ;;  %1788 = vmatprep.mubr.f32.mxu1 %v18_v2  ;;  %v182_v38 = vld [vmem:[%s11671_s1 + $0x238] sm:$0xff]  ;;  %v181_v42 = vld [vmem:[%s11671_s1 + $0x230] sm:$0xff]  ;;  %v228_v45 = vld [vmem:[%s11671_s1 + $0x3a8] sm:$0xff] }
  0x25   :  { %5110 = vmatprep.subr.mxu0 %v206_v3  ;;  %5145 = vmatprep.subr.mxu1 %v238_v4  ;;  %v214_v39 = vld [vmem:[%s11671_s1 + $0x338] sm:$0xff]  ;;  %v213_v43 = vld [vmem:[%s11671_s1 + $0x330] sm:$0xff]  ;;  %v180_v46 = vld [vmem:[%s11671_s1 + $0x228] sm:$0xff] }
  0x26   :  { %1789 = vmatmul.mubr.f32.vlgmr.msra.gmra.mxu1 %v17_v5  ;;  %5111 = vmatpush3.msra.mxu0 %v190_v6  ;;  %v212_v47 = vld [vmem:[%s11671_s1 + $0x328] sm:$0xff]  ;;  %v195_v48 = vld [vmem:[%s11671_s1 + $0x2a0] sm:$0xff]  ;;  %v194_v52 = vld [vmem:[%s11671_s1 + $0x298] sm:$0xff] }
  0x27   :  { %5146 = vmatpush3.msra.mxu1 %v222_v7  ;;  %5112 = vmatprep.subr.mxu0 %v205_v8  ;;  %v227_v49 = vld [vmem:[%s11671_s1 + $0x3a0] sm:$0xff]  ;;  %v226_v53 = vld [vmem:[%s11671_s1 + $0x398] sm:$0xff]  ;;  %v193_v56 = vld [vmem:[%s11671_s1 + $0x290] sm:$0xff] }
  0x28   :  { %5147 = vmatprep.subr.mxu1 %v237_v9  ;;  %5113 = vmatpush3.msra.mxu0 %v189_v10  ;;  %v179_v50 = vld [vmem:[%s11671_s1 + $0x220] sm:$0xff]  ;;  %v178_v54 = vld [vmem:[%s11671_s1 + $0x218] sm:$0xff]  ;;  %v225_v57 = vld [vmem:[%s11671_s1 + $0x390] sm:$0xff] }
  0x29   :  { %5148 = vmatpush3.msra.mxu1 %v221_v11  ;;  %5114 = vmatprep.subr.mxu0 %v204_v12  ;;  %v211_v51 = vld [vmem:[%s11671_s1 + $0x320] sm:$0xff]  ;;  %v210_v55 = vld [vmem:[%s11671_s1 + $0x318] sm:$0xff]  ;;  %v177_v58 = vld [vmem:[%s11671_s1 + $0x210] sm:$0xff] }
  0x2a   :  { %5149 = vmatprep.subr.mxu1 %v236_v13  ;;  %5115 = vmatpush3.msra.mxu0 %v188_v14  ;;  %v209_v59 = vld [vmem:[%s11671_s1 + $0x310] sm:$0xff]  ;;  %v192_v60 = vld [vmem:[%s11671_s1 + $0x288] sm:$0xff]  ;;  %v191_v0 = vld [vmem:[%s11671_s1 + $0x280] sm:$0xff] }
  0x2b   :  { %5150 = vmatpush3.msra.mxu1 %v220_v15  ;;  %5116 = vmatprep.subr.mxu0 %v203_v16  ;;  %v224_v61 = vld [vmem:[%s11671_s1 + $0x388] sm:$0xff]  ;;  %v223_v1 = vld [vmem:[%s11671_s1 + $0x380] sm:$0xff]  ;;  %v22_v6 = vld [vmem:[%s11670_s0 + $0x38] sm:$0xff] }
  0x2c   :  { %5151 = vmatprep.subr.mxu1 %v235_v17  ;;  %5117 = vmatpush3.msra.mxu0 %v187_v18  ;;  %v176_v62 = vld [vmem:[%s11671_s1 + $0x208] sm:$0xff]  ;;  %v175_v2 = vld [vmem:[%s11671_s1 + $0x200] sm:$0xff]  ;;  %v270_v7 = vld [vmem:[%s11671_s1 + $0x4f8] sm:$0xff] }
  0x2d   :  { %5152 = vmatpush3.msra.mxu1 %v219_v19  ;;  %5118 = vmatprep.subr.mxu0 %v202_v20  ;;  %v208_v63 = vld [vmem:[%s11671_s1 + $0x308] sm:$0xff]  ;;  %v207_v4 = vld [vmem:[%s11671_s1 + $0x300] sm:$0xff]  ;;  %v302_v8 = vld [vmem:[%s11671_s1 + $0x5f8] sm:$0xff] }
  0x2e   :  { %5153 = vmatprep.subr.mxu1 %v234_v21  ;;  %5119 = vmatpush3.msra.mxu0 %v186_v22  ;;  %v20_v3 = vld [vmem:[%s11670_s0 + $0x28] sm:$0xff]  ;;  %v19_v5 = vld [vmem:[%s11670_s0 + $0x20] sm:$0xff]  ;;  %v21_v9 = vld [vmem:[%s11670_s0 + $0x30] sm:$0xff] }
  0x2f   :  { %5154 = vmatpush3.msra.mxu1 %v218_v23  ;;  %5120 = vmatprep.subr.mxu0 %v201_v24  ;;  %v254_v10 = vld [vmem:[%s11671_s1 + $0x478] sm:$0xff]  ;;  %v269_v12 = vld [vmem:[%s11671_s1 + $0x4f0] sm:$0xff]  ;;  %v268_v16 = vld [vmem:[%s11671_s1 + $0x4e8] sm:$0xff] }
  0x30   :  { %5155 = vmatprep.subr.mxu1 %v233_v25  ;;  %5121 = vmatpush3.msra.mxu0 %v185_v26  ;;  %v286_v11 = vld [vmem:[%s11671_s1 + $0x578] sm:$0xff]  ;;  %v301_v13 = vld [vmem:[%s11671_s1 + $0x5f0] sm:$0xff]  ;;  %v300_v17 = vld [vmem:[%s11671_s1 + $0x5e8] sm:$0xff] }
  0x31   :  { %5156 = vmatpush3.msra.mxu1 %v217_v27  ;;  %5122 = vmatprep.subr.mxu0 %v200_v28  ;;  %v253_v14 = vld [vmem:[%s11671_s1 + $0x470] sm:$0xff]  ;;  %v252_v18 = vld [vmem:[%s11671_s1 + $0x468] sm:$0xff]  ;;  %v267_v20 = vld [vmem:[%s11671_s1 + $0x4e0] sm:$0xff] }
  0x32   :  { %5157 = vmatprep.subr.mxu1 %v232_v29  ;;  %5123 = vmatpush3.msra.mxu0 %v184_v30  ;;  %v285_v15 = vld [vmem:[%s11671_s1 + $0x570] sm:$0xff]  ;;  %v284_v19 = vld [vmem:[%s11671_s1 + $0x568] sm:$0xff]  ;;  %v299_v21 = vld [vmem:[%s11671_s1 + $0x5e0] sm:$0xff] }
  0x33   :  { %5158 = vmatpush3.msra.mxu1 %v216_v31  ;;  %5124 = vmatprep.subr.mxu0 %v199_v32  ;;  %v251_v22 = vld [vmem:[%s11671_s1 + $0x460] sm:$0xff]  ;;  %v266_v24 = vld [vmem:[%s11671_s1 + $0x4d8] sm:$0xff]  ;;  %v265_v28 = vld [vmem:[%s11671_s1 + $0x4d0] sm:$0xff] }
  0x34   :  { %5159 = vmatprep.subr.mxu1 %v231_v33  ;;  %5125 = vmatpush3.msra.mxu0 %v183_v34  ;;  %v283_v23 = vld [vmem:[%s11671_s1 + $0x560] sm:$0xff]  ;;  %v298_v25 = vld [vmem:[%s11671_s1 + $0x5d8] sm:$0xff]  ;;  %v297_v29 = vld [vmem:[%s11671_s1 + $0x5d0] sm:$0xff] }
  0x35   :  { %5160 = vmatpush3.msra.mxu1 %v215_v35  ;;  %5126 = vmatprep.subr.mxu0 %v198_v36  ;;  %v250_v26 = vld [vmem:[%s11671_s1 + $0x458] sm:$0xff]  ;;  %v249_v30 = vld [vmem:[%s11671_s1 + $0x450] sm:$0xff]  ;;  %v264_v32 = vld [vmem:[%s11671_s1 + $0x4c8] sm:$0xff] }
  0x36   :  { %5161 = vmatprep.subr.mxu1 %v230_v37  ;;  %5127 = vmatpush3.msra.mxu0 %v182_v38  ;;  %v282_v27 = vld [vmem:[%s11671_s1 + $0x558] sm:$0xff]  ;;  %v281_v31 = vld [vmem:[%s11671_s1 + $0x550] sm:$0xff]  ;;  %v296_v33 = vld [vmem:[%s11671_s1 + $0x5c8] sm:$0xff] }
  0x37   :  { %5162 = vmatpush3.msra.mxu1 %v214_v39  ;;  %5128 = vmatprep.subr.mxu0 %v197_v40  ;;  %v248_v34 = vld [vmem:[%s11671_s1 + $0x448] sm:$0xff]  ;;  %v263_v36 = vld [vmem:[%s11671_s1 + $0x4c0] sm:$0xff]  ;;  %v262_v40 = vld [vmem:[%s11671_s1 + $0x4b8] sm:$0xff] }
  0x38   :  { %5163 = vmatprep.subr.mxu1 %v229_v41  ;;  %5129 = vmatpush3.msra.mxu0 %v181_v42  ;;  %v280_v35 = vld [vmem:[%s11671_s1 + $0x548] sm:$0xff]  ;;  %v295_v37 = vld [vmem:[%s11671_s1 + $0x5c0] sm:$0xff]  ;;  %v294_v41 = vld [vmem:[%s11671_s1 + $0x5b8] sm:$0xff] }
  0x39   :  { %5164 = vmatpush3.msra.mxu1 %v213_v43  ;;  %5130 = vmatprep.subr.mxu0 %v196_v44  ;;  %v247_v38 = vld [vmem:[%s11671_s1 + $0x440] sm:$0xff]  ;;  %v246_v42 = vld [vmem:[%s11671_s1 + $0x438] sm:$0xff]  ;;  %v261_v44 = vld [vmem:[%s11671_s1 + $0x4b0] sm:$0xff] }
  0x3a   :  { %5165 = vmatprep.subr.mxu1 %v228_v45  ;;  %5131 = vmatpush3.msra.mxu0 %v180_v46  ;;  %v279_v39 = vld [vmem:[%s11671_s1 + $0x540] sm:$0xff]  ;;  %v278_v43 = vld [vmem:[%s11671_s1 + $0x538] sm:$0xff]  ;;  %v293_v45 = vld [vmem:[%s11671_s1 + $0x5b0] sm:$0xff] }
  0x3b   :  { %5166 = vmatpush3.msra.mxu1 %v212_v47  ;;  %5132 = vmatprep.subr.mxu0 %v195_v48  ;;  %v245_v46 = vld [vmem:[%s11671_s1 + $0x430] sm:$0xff]  ;;  %v260_v48 = vld [vmem:[%s11671_s1 + $0x4a8] sm:$0xff] }
  0x3c   :  { %5167 = vmatprep.subr.mxu1 %v227_v49  ;;  %5133 = vmatpush3.msra.mxu0 %v179_v50  ;;  %v277_v47 = vld [vmem:[%s11671_s1 + $0x530] sm:$0xff]  ;;  %v292_v49 = vld [vmem:[%s11671_s1 + $0x5a8] sm:$0xff] }
  0x3d   :  { %5168 = vmatpush3.msra.mxu1 %v211_v51  ;;  %5134 = vmatprep.subr.mxu0 %v194_v52  ;;  %v244_v50 = vld [vmem:[%s11671_s1 + $0x428] sm:$0xff]  ;;  %v259_v52 = vld [vmem:[%s11671_s1 + $0x4a0] sm:$0xff] }
  0x3e   :  { %5169 = vmatprep.subr.mxu1 %v226_v53  ;;  %5135 = vmatpush3.msra.mxu0 %v178_v54  ;;  %v276_v51 = vld [vmem:[%s11671_s1 + $0x528] sm:$0xff]  ;;  %v291_v53 = vld [vmem:[%s11671_s1 + $0x5a0] sm:$0xff] }
  0x3f   :  { %5170 = vmatpush3.msra.mxu1 %v210_v55  ;;  %5136 = vmatprep.subr.mxu0 %v193_v56  ;;  %v243_v54 = vld [vmem:[%s11671_s1 + $0x420] sm:$0xff]  ;;  %v258_v56 = vld [vmem:[%s11671_s1 + $0x498] sm:$0xff] }
  0x40   :  { %5171 = vmatprep.subr.mxu1 %v225_v57  ;;  %5137 = vmatpush3.msra.mxu0 %v177_v58  ;;  %v275_v55 = vld [vmem:[%s11671_s1 + $0x520] sm:$0xff]  ;;  %v290_v57 = vld [vmem:[%s11671_s1 + $0x598] sm:$0xff] }
  0x41   :  { %5172 = vmatpush3.msra.mxu1 %v209_v59  ;;  %5138 = vmatprep.subr.mxu0 %v192_v60  ;;  %v242_v58 = vld [vmem:[%s11671_s1 + $0x418] sm:$0xff]  ;;  %v257_v60 = vld [vmem:[%s11671_s1 + $0x490] sm:$0xff] }
  0x42   :  { %5173 = vmatprep.subr.mxu1 %v224_v61  ;;  %5139 = vmatpush3.msra.mxu0 %v176_v62  ;;  %v274_v59 = vld [vmem:[%s11671_s1 + $0x518] sm:$0xff]  ;;  %v289_v61 = vld [vmem:[%s11671_s1 + $0x590] sm:$0xff] }
  0x43   :  { %5174 = vmatpush3.msra.mxu1 %v208_v63  ;;  %5140 = vmatprep.subr.mxu0 %v191_v0  ;;  %v241_v62 = vld [vmem:[%s11671_s1 + $0x410] sm:$0xff]  ;;  %v256_v0 = vld [vmem:[%s11671_s1 + $0x488] sm:$0xff] }
  0x44   :  { %5175 = vmatprep.subr.mxu1 %v223_v1  ;;  %5141 = vmatpush3.msra.mxu0 %v175_v2  ;;  %v273_v63 = vld [vmem:[%s11671_s1 + $0x510] sm:$0xff]  ;;  %v288_v1 = vld [vmem:[%s11671_s1 + $0x588] sm:$0xff] }
  0x45   :  { %1858 = vmatprep.mubr.f32.mxu0 %v20_v3  ;;  %5176 = vmatpush3.msra.mxu1 %v207_v4  ;;  %v240_v2 = vld [vmem:[%s11671_s1 + $0x408] sm:$0xff]  ;;  %v255_v4 = vld [vmem:[%s11671_s1 + $0x480] sm:$0xff] }
  0x46   :  { %1859 = vmatmul.mubr.f32.vlgmr.msra.gmra.mxu0 %v19_v5  ;;  %1928 = vmatprep.mubr.f32.mxu1 %v22_v6  ;;  %v272_v3 = vld [vmem:[%s11671_s1 + $0x508] sm:$0xff]  ;;  %v287_v5 = vld [vmem:[%s11671_s1 + $0x580] sm:$0xff] }
  0x47   :  { %5180 = vmatprep.subr.mxu0 %v270_v7  ;;  %5215 = vmatprep.subr.mxu1 %v302_v8  ;;  %v239_v6 = vld [vmem:[%s11671_s1 + $0x400] sm:$0xff]  ;;  %v24_v7 = vld [vmem:[%s11670_s0 + $0x48] sm:$0xff] }
  0x48   :  { %1929 = vmatmul.mubr.f32.vlgmr.msra.gmra.mxu1 %v21_v9  ;;  %5181 = vmatpush3.msra.mxu0 %v254_v10  ;;  %v271_v8 = vld [vmem:[%s11671_s1 + $0x500] sm:$0xff]  ;;  %v26_v10 = vld [vmem:[%s11670_s0 + $0x58] sm:$0xff] }
  0x49   :  { %5216 = vmatpush3.msra.mxu1 %v286_v11  ;;  %5182 = vmatprep.subr.mxu0 %v269_v12  ;;  %v23_v9 = vld [vmem:[%s11670_s0 + $0x40] sm:$0xff]  ;;  %v334_v11 = vld [vmem:[%s11671_s1 + $0x6f8] sm:$0xff] }
  0x4a   :  { %5217 = vmatprep.subr.mxu1 %v301_v13  ;;  %5183 = vmatpush3.msra.mxu0 %v253_v14  ;;  %v366_v12 = vld [vmem:[%s11671_s1 + $0x7f8] sm:$0xff]  ;;  %v25_v13 = vld [vmem:[%s11670_s0 + $0x50] sm:$0xff] }
  0x4b   :  { %5218 = vmatpush3.msra.mxu1 %v285_v15  ;;  %5184 = vmatprep.subr.mxu0 %v268_v16  ;;  %v318_v14 = vld [vmem:[%s11671_s1 + $0x678] sm:$0xff]  ;;  %v333_v16 = vld [vmem:[%s11671_s1 + $0x6f0] sm:$0xff] }
  0x4c   :  { %5219 = vmatprep.subr.mxu1 %v300_v17  ;;  %5185 = vmatpush3.msra.mxu0 %v252_v18  ;;  %v350_v15 = vld [vmem:[%s11671_s1 + $0x778] sm:$0xff]  ;;  %v365_v17 = vld [vmem:[%s11671_s1 + $0x7f0] sm:$0xff] }
  0x4d   :  { %5220 = vmatpush3.msra.mxu1 %v284_v19  ;;  %5186 = vmatprep.subr.mxu0 %v267_v20  ;;  %v317_v18 = vld [vmem:[%s11671_s1 + $0x670] sm:$0xff]  ;;  %v332_v20 = vld [vmem:[%s11671_s1 + $0x6e8] sm:$0xff] }
  0x4e   :  { %5221 = vmatprep.subr.mxu1 %v299_v21  ;;  %5187 = vmatpush3.msra.mxu0 %v251_v22  ;;  %v349_v19 = vld [vmem:[%s11671_s1 + $0x770] sm:$0xff]  ;;  %v364_v21 = vld [vmem:[%s11671_s1 + $0x7e8] sm:$0xff] }
  0x4f   :  { %5222 = vmatpush3.msra.mxu1 %v283_v23  ;;  %5188 = vmatprep.subr.mxu0 %v266_v24  ;;  %v316_v22 = vld [vmem:[%s11671_s1 + $0x668] sm:$0xff]  ;;  %v331_v24 = vld [vmem:[%s11671_s1 + $0x6e0] sm:$0xff] }
  0x50   :  { %5223 = vmatprep.subr.mxu1 %v298_v25  ;;  %5189 = vmatpush3.msra.mxu0 %v250_v26  ;;  %v348_v23 = vld [vmem:[%s11671_s1 + $0x768] sm:$0xff]  ;;  %v363_v25 = vld [vmem:[%s11671_s1 + $0x7e0] sm:$0xff] }
  0x51   :  { %5224 = vmatpush3.msra.mxu1 %v282_v27  ;;  %5190 = vmatprep.subr.mxu0 %v265_v28  ;;  %v315_v26 = vld [vmem:[%s11671_s1 + $0x660] sm:$0xff]  ;;  %v330_v28 = vld [vmem:[%s11671_s1 + $0x6d8] sm:$0xff] }
  0x52   :  { %5225 = vmatprep.subr.mxu1 %v297_v29  ;;  %5191 = vmatpush3.msra.mxu0 %v249_v30  ;;  %v347_v27 = vld [vmem:[%s11671_s1 + $0x760] sm:$0xff]  ;;  %v362_v29 = vld [vmem:[%s11671_s1 + $0x7d8] sm:$0xff] }
  0x53   :  { %5226 = vmatpush3.msra.mxu1 %v281_v31  ;;  %5192 = vmatprep.subr.mxu0 %v264_v32  ;;  %v314_v30 = vld [vmem:[%s11671_s1 + $0x658] sm:$0xff]  ;;  %v329_v32 = vld [vmem:[%s11671_s1 + $0x6d0] sm:$0xff] }
  0x54   :  { %5227 = vmatprep.subr.mxu1 %v296_v33  ;;  %5193 = vmatpush3.msra.mxu0 %v248_v34  ;;  %v346_v31 = vld [vmem:[%s11671_s1 + $0x758] sm:$0xff]  ;;  %v361_v33 = vld [vmem:[%s11671_s1 + $0x7d0] sm:$0xff] }
  0x55   :  { %5228 = vmatpush3.msra.mxu1 %v280_v35  ;;  %5194 = vmatprep.subr.mxu0 %v263_v36  ;;  %v313_v34 = vld [vmem:[%s11671_s1 + $0x650] sm:$0xff]  ;;  %v328_v36 = vld [vmem:[%s11671_s1 + $0x6c8] sm:$0xff] }
  0x56   :  { %5229 = vmatprep.subr.mxu1 %v295_v37  ;;  %5195 = vmatpush3.msra.mxu0 %v247_v38  ;;  %v345_v35 = vld [vmem:[%s11671_s1 + $0x750] sm:$0xff]  ;;  %v360_v37 = vld [vmem:[%s11671_s1 + $0x7c8] sm:$0xff] }
  0x57   :  { %5230 = vmatpush3.msra.mxu1 %v279_v39  ;;  %5196 = vmatprep.subr.mxu0 %v262_v40  ;;  %v312_v38 = vld [vmem:[%s11671_s1 + $0x648] sm:$0xff]  ;;  %v327_v40 = vld [vmem:[%s11671_s1 + $0x6c0] sm:$0xff] }
  0x58   :  { %5231 = vmatprep.subr.mxu1 %v294_v41  ;;  %5197 = vmatpush3.msra.mxu0 %v246_v42  ;;  %v344_v39 = vld [vmem:[%s11671_s1 + $0x748] sm:$0xff]  ;;  %v359_v41 = vld [vmem:[%s11671_s1 + $0x7c0] sm:$0xff] }
  0x59   :  { %5232 = vmatpush3.msra.mxu1 %v278_v43  ;;  %5198 = vmatprep.subr.mxu0 %v261_v44  ;;  %v311_v42 = vld [vmem:[%s11671_s1 + $0x640] sm:$0xff]  ;;  %v326_v44 = vld [vmem:[%s11671_s1 + $0x6b8] sm:$0xff] }
  0x5a   :  { %5233 = vmatprep.subr.mxu1 %v293_v45  ;;  %5199 = vmatpush3.msra.mxu0 %v245_v46  ;;  %v343_v43 = vld [vmem:[%s11671_s1 + $0x740] sm:$0xff]  ;;  %v358_v45 = vld [vmem:[%s11671_s1 + $0x7b8] sm:$0xff] }
  0x5b   :  { %5234 = vmatpush3.msra.mxu1 %v277_v47  ;;  %5200 = vmatprep.subr.mxu0 %v260_v48  ;;  %v310_v46 = vld [vmem:[%s11671_s1 + $0x638] sm:$0xff]  ;;  %v325_v48 = vld [vmem:[%s11671_s1 + $0x6b0] sm:$0xff] }
  0x5c   :  { %5235 = vmatprep.subr.mxu1 %v292_v49  ;;  %5201 = vmatpush3.msra.mxu0 %v244_v50  ;;  %v342_v47 = vld [vmem:[%s11671_s1 + $0x738] sm:$0xff]  ;;  %v357_v49 = vld [vmem:[%s11671_s1 + $0x7b0] sm:$0xff] }
  0x5d   :  { %5236 = vmatpush3.msra.mxu1 %v276_v51  ;;  %5202 = vmatprep.subr.mxu0 %v259_v52  ;;  %v309_v50 = vld [vmem:[%s11671_s1 + $0x630] sm:$0xff]  ;;  %v324_v52 = vld [vmem:[%s11671_s1 + $0x6a8] sm:$0xff] }
  0x5e   :  { %5237 = vmatprep.subr.mxu1 %v291_v53  ;;  %5203 = vmatpush3.msra.mxu0 %v243_v54  ;;  %v341_v51 = vld [vmem:[%s11671_s1 + $0x730] sm:$0xff]  ;;  %v356_v53 = vld [vmem:[%s11671_s1 + $0x7a8] sm:$0xff] }
  0x5f   :  { %5238 = vmatpush3.msra.mxu1 %v275_v55  ;;  %5204 = vmatprep.subr.mxu0 %v258_v56  ;;  %v308_v54 = vld [vmem:[%s11671_s1 + $0x628] sm:$0xff]  ;;  %v323_v56 = vld [vmem:[%s11671_s1 + $0x6a0] sm:$0xff] }
  0x60   :  { %5239 = vmatprep.subr.mxu1 %v290_v57  ;;  %5205 = vmatpush3.msra.mxu0 %v242_v58  ;;  %v340_v55 = vld [vmem:[%s11671_s1 + $0x728] sm:$0xff]  ;;  %v355_v57 = vld [vmem:[%s11671_s1 + $0x7a0] sm:$0xff] }
  0x61   :  { %5240 = vmatpush3.msra.mxu1 %v274_v59  ;;  %5206 = vmatprep.subr.mxu0 %v257_v60  ;;  %v307_v58 = vld [vmem:[%s11671_s1 + $0x620] sm:$0xff]  ;;  %v322_v60 = vld [vmem:[%s11671_s1 + $0x698] sm:$0xff] }
  0x62   :  { %5241 = vmatprep.subr.mxu1 %v289_v61  ;;  %5207 = vmatpush3.msra.mxu0 %v241_v62  ;;  %v339_v59 = vld [vmem:[%s11671_s1 + $0x720] sm:$0xff]  ;;  %v354_v61 = vld [vmem:[%s11671_s1 + $0x798] sm:$0xff] }
  0x63   :  { %5242 = vmatpush3.msra.mxu1 %v273_v63  ;;  %5208 = vmatprep.subr.mxu0 %v256_v0  ;;  %v306_v62 = vld [vmem:[%s11671_s1 + $0x618] sm:$0xff]  ;;  %v321_v0 = vld [vmem:[%s11671_s1 + $0x690] sm:$0xff] }
  0x64   :  { %5243 = vmatprep.subr.mxu1 %v288_v1  ;;  %5209 = vmatpush3.msra.mxu0 %v240_v2  ;;  %v338_v63 = vld [vmem:[%s11671_s1 + $0x718] sm:$0xff]  ;;  %v353_v1 = vld [vmem:[%s11671_s1 + $0x790] sm:$0xff] }
  0x65   :  { %5244 = vmatpush3.msra.mxu1 %v272_v3  ;;  %5210 = vmatprep.subr.mxu0 %v255_v4  ;;  %v305_v2 = vld [vmem:[%s11671_s1 + $0x610] sm:$0xff]  ;;  %v320_v4 = vld [vmem:[%s11671_s1 + $0x688] sm:$0xff] }
  0x66   :  { %5245 = vmatprep.subr.mxu1 %v287_v5  ;;  %5211 = vmatpush3.msra.mxu0 %v239_v6  ;;  %v337_v3 = vld [vmem:[%s11671_s1 + $0x710] sm:$0xff]  ;;  %v352_v5 = vld [vmem:[%s11671_s1 + $0x788] sm:$0xff] }
  0x67   :  { %1998 = vmatprep.mubr.f32.mxu0 %v24_v7  ;;  %5246 = vmatpush3.msra.mxu1 %v271_v8  ;;  %v304_v6 = vld [vmem:[%s11671_s1 + $0x608] sm:$0xff]  ;;  %v319_v8 = vld [vmem:[%s11671_s1 + $0x680] sm:$0xff] }
  0x68   :  { %1999 = vmatmul.mubr.f32.vlgmr.msra.gmra.mxu0 %v23_v9  ;;  %2068 = vmatprep.mubr.f32.mxu1 %v26_v10  ;;  %v336_v7 = vld [vmem:[%s11671_s1 + $0x708] sm:$0xff]  ;;  %v351_v9 = vld [vmem:[%s11671_s1 + $0x780] sm:$0xff] }
  0x69   :  { %5250 = vmatprep.subr.mxu0 %v334_v11  ;;  %5285 = vmatprep.subr.mxu1 %v366_v12  ;;  %v303_v10 = vld [vmem:[%s11671_s1 + $0x600] sm:$0xff]  ;;  %v28_v11 = vld [vmem:[%s11670_s0 + $0x68] sm:$0xff] }
  0x6a   :  { %2069 = vmatmul.mubr.f32.vlgmr.msra.gmra.mxu1 %v25_v13  ;;  %5251 = vmatpush3.msra.mxu0 %v318_v14  ;;  %v335_v12 = vld [vmem:[%s11671_s1 + $0x700] sm:$0xff]  ;;  %v30_v14 = vld [vmem:[%s11670_s0 + $0x78] sm:$0xff] }
  0x6b   :  { %5286 = vmatpush3.msra.mxu1 %v350_v15  ;;  %5252 = vmatprep.subr.mxu0 %v333_v16  ;;  %v27_v13 = vld [vmem:[%s11670_s0 + $0x60] sm:$0xff]  ;;  %v398_v15 = vld [vmem:[%s11671_s1 + $0x8f8] sm:$0xff] }
  0x6c   :  { %5287 = vmatprep.subr.mxu1 %v365_v17  ;;  %5253 = vmatpush3.msra.mxu0 %v317_v18  ;;  %v430_v16 = vld [vmem:[%s11671_s1 + $0x9f8] sm:$0xff]  ;;  %v29_v17 = vld [vmem:[%s11670_s0 + $0x70] sm:$0xff] }
  0x6d   :  { %5288 = vmatpush3.msra.mxu1 %v349_v19  ;;  %5254 = vmatprep.subr.mxu0 %v332_v20  ;;  %v382_v18 = vld [vmem:[%s11671_s1 + $0x878] sm:$0xff]  ;;  %v397_v20 = vld [vmem:[%s11671_s1 + $0x8f0] sm:$0xff] }
  0x6e   :  { %5289 = vmatprep.subr.mxu1 %v364_v21  ;;  %5255 = vmatpush3.msra.mxu0 %v316_v22  ;;  %v414_v19 = vld [vmem:[%s11671_s1 + $0x978] sm:$0xff]  ;;  %v429_v21 = vld [vmem:[%s11671_s1 + $0x9f0] sm:$0xff] }
  0x6f   :  { %5290 = vmatpush3.msra.mxu1 %v348_v23  ;;  %5256 = vmatprep.subr.mxu0 %v331_v24  ;;  %v381_v22 = vld [vmem:[%s11671_s1 + $0x870] sm:$0xff]  ;;  %v396_v24 = vld [vmem:[%s11671_s1 + $0x8e8] sm:$0xff] }
  0x70   :  { %5291 = vmatprep.subr.mxu1 %v363_v25  ;;  %5257 = vmatpush3.msra.mxu0 %v315_v26  ;;  %v413_v23 = vld [vmem:[%s11671_s1 + $0x970] sm:$0xff]  ;;  %v428_v25 = vld [vmem:[%s11671_s1 + $0x9e8] sm:$0xff] }
  0x71   :  { %5292 = vmatpush3.msra.mxu1 %v347_v27  ;;  %5258 = vmatprep.subr.mxu0 %v330_v28  ;;  %v380_v26 = vld [vmem:[%s11671_s1 + $0x868] sm:$0xff]  ;;  %v395_v28 = vld [vmem:[%s11671_s1 + $0x8e0] sm:$0xff] }
  0x72   :  { %5293 = vmatprep.subr.mxu1 %v362_v29  ;;  %5259 = vmatpush3.msra.mxu0 %v314_v30  ;;  %v412_v27 = vld [vmem:[%s11671_s1 + $0x968] sm:$0xff]  ;;  %v427_v29 = vld [vmem:[%s11671_s1 + $0x9e0] sm:$0xff] }
  0x73   :  { %5294 = vmatpush3.msra.mxu1 %v346_v31  ;;  %5260 = vmatprep.subr.mxu0 %v329_v32  ;;  %v379_v30 = vld [vmem:[%s11671_s1 + $0x860] sm:$0xff]  ;;  %v394_v32 = vld [vmem:[%s11671_s1 + $0x8d8] sm:$0xff] }
  0x74   :  { %5295 = vmatprep.subr.mxu1 %v361_v33  ;;  %5261 = vmatpush3.msra.mxu0 %v313_v34  ;;  %v411_v31 = vld [vmem:[%s11671_s1 + $0x960] sm:$0xff]  ;;  %v426_v33 = vld [vmem:[%s11671_s1 + $0x9d8] sm:$0xff] }
  0x75   :  { %5296 = vmatpush3.msra.mxu1 %v345_v35  ;;  %5262 = vmatprep.subr.mxu0 %v328_v36  ;;  %v378_v34 = vld [vmem:[%s11671_s1 + $0x858] sm:$0xff]  ;;  %v393_v36 = vld [vmem:[%s11671_s1 + $0x8d0] sm:$0xff] }
  0x76   :  { %5297 = vmatprep.subr.mxu1 %v360_v37  ;;  %5263 = vmatpush3.msra.mxu0 %v312_v38  ;;  %v410_v35 = vld [vmem:[%s11671_s1 + $0x958] sm:$0xff]  ;;  %v425_v37 = vld [vmem:[%s11671_s1 + $0x9d0] sm:$0xff] }
  0x77   :  { %5298 = vmatpush3.msra.mxu1 %v344_v39  ;;  %5264 = vmatprep.subr.mxu0 %v327_v40  ;;  %v377_v38 = vld [vmem:[%s11671_s1 + $0x850] sm:$0xff]  ;;  %v392_v40 = vld [vmem:[%s11671_s1 + $0x8c8] sm:$0xff] }
  0x78   :  { %5299 = vmatprep.subr.mxu1 %v359_v41  ;;  %5265 = vmatpush3.msra.mxu0 %v311_v42  ;;  %v409_v39 = vld [vmem:[%s11671_s1 + $0x950] sm:$0xff]  ;;  %v424_v41 = vld [vmem:[%s11671_s1 + $0x9c8] sm:$0xff] }
  0x79   :  { %5300 = vmatpush3.msra.mxu1 %v343_v43  ;;  %5266 = vmatprep.subr.mxu0 %v326_v44  ;;  %v376_v42 = vld [vmem:[%s11671_s1 + $0x848] sm:$0xff]  ;;  %v391_v44 = vld [vmem:[%s11671_s1 + $0x8c0] sm:$0xff] }
  0x7a   :  { %5301 = vmatprep.subr.mxu1 %v358_v45  ;;  %5267 = vmatpush3.msra.mxu0 %v310_v46  ;;  %v408_v43 = vld [vmem:[%s11671_s1 + $0x948] sm:$0xff]  ;;  %v423_v45 = vld [vmem:[%s11671_s1 + $0x9c0] sm:$0xff] }
  0x7b   :  { %5302 = vmatpush3.msra.mxu1 %v342_v47  ;;  %5268 = vmatprep.subr.mxu0 %v325_v48  ;;  %v375_v46 = vld [vmem:[%s11671_s1 + $0x840] sm:$0xff]  ;;  %v390_v48 = vld [vmem:[%s11671_s1 + $0x8b8] sm:$0xff] }
  0x7c   :  { %5303 = vmatprep.subr.mxu1 %v357_v49  ;;  %5269 = vmatpush3.msra.mxu0 %v309_v50  ;;  %v407_v47 = vld [vmem:[%s11671_s1 + $0x940] sm:$0xff]  ;;  %v422_v49 = vld [vmem:[%s11671_s1 + $0x9b8] sm:$0xff] }
  0x7d   :  { %5304 = vmatpush3.msra.mxu1 %v341_v51  ;;  %5270 = vmatprep.subr.mxu0 %v324_v52  ;;  %v374_v50 = vld [vmem:[%s11671_s1 + $0x838] sm:$0xff]  ;;  %v389_v52 = vld [vmem:[%s11671_s1 + $0x8b0] sm:$0xff] }
  0x7e   :  { %5305 = vmatprep.subr.mxu1 %v356_v53  ;;  %5271 = vmatpush3.msra.mxu0 %v308_v54  ;;  %v406_v51 = vld [vmem:[%s11671_s1 + $0x938] sm:$0xff]  ;;  %v421_v53 = vld [vmem:[%s11671_s1 + $0x9b0] sm:$0xff] }
  0x7f   :  { %5306 = vmatpush3.msra.mxu1 %v340_v55  ;;  %5272 = vmatprep.subr.mxu0 %v323_v56  ;;  %v373_v54 = vld [vmem:[%s11671_s1 + $0x830] sm:$0xff]  ;;  %v388_v56 = vld [vmem:[%s11671_s1 + $0x8a8] sm:$0xff] }
  0x80   :  { %5307 = vmatprep.subr.mxu1 %v355_v57  ;;  %5273 = vmatpush3.msra.mxu0 %v307_v58  ;;  %v405_v55 = vld [vmem:[%s11671_s1 + $0x930] sm:$0xff]  ;;  %v420_v57 = vld [vmem:[%s11671_s1 + $0x9a8] sm:$0xff] }
  0x81   :  { %5308 = vmatpush3.msra.mxu1 %v339_v59  ;;  %5274 = vmatprep.subr.mxu0 %v322_v60  ;;  %v372_v58 = vld [vmem:[%s11671_s1 + $0x828] sm:$0xff]  ;;  %v387_v60 = vld [vmem:[%s11671_s1 + $0x8a0] sm:$0xff] }
  0x82   :  { %5309 = vmatprep.subr.mxu1 %v354_v61  ;;  %5275 = vmatpush3.msra.mxu0 %v306_v62  ;;  %v404_v59 = vld [vmem:[%s11671_s1 + $0x928] sm:$0xff]  ;;  %v419_v61 = vld [vmem:[%s11671_s1 + $0x9a0] sm:$0xff] }
  0x83   :  { %5310 = vmatpush3.msra.mxu1 %v338_v63  ;;  %5276 = vmatprep.subr.mxu0 %v321_v0  ;;  %v371_v62 = vld [vmem:[%s11671_s1 + $0x820] sm:$0xff]  ;;  %v386_v0 = vld [vmem:[%s11671_s1 + $0x898] sm:$0xff] }
  0x84   :  { %5311 = vmatprep.subr.mxu1 %v353_v1  ;;  %5277 = vmatpush3.msra.mxu0 %v305_v2  ;;  %v403_v63 = vld [vmem:[%s11671_s1 + $0x920] sm:$0xff]  ;;  %v418_v1 = vld [vmem:[%s11671_s1 + $0x998] sm:$0xff] }
  0x85   :  { %5312 = vmatpush3.msra.mxu1 %v337_v3  ;;  %5278 = vmatprep.subr.mxu0 %v320_v4  ;;  %v370_v2 = vld [vmem:[%s11671_s1 + $0x818] sm:$0xff]  ;;  %v385_v4 = vld [vmem:[%s11671_s1 + $0x890] sm:$0xff] }
  0x86   :  { %5313 = vmatprep.subr.mxu1 %v352_v5  ;;  %5279 = vmatpush3.msra.mxu0 %v304_v6  ;;  %v402_v3 = vld [vmem:[%s11671_s1 + $0x918] sm:$0xff]  ;;  %v417_v5 = vld [vmem:[%s11671_s1 + $0x990] sm:$0xff] }
  0x87   :  { %5314 = vmatpush3.msra.mxu1 %v336_v7  ;;  %5280 = vmatprep.subr.mxu0 %v319_v8  ;;  %v369_v6 = vld [vmem:[%s11671_s1 + $0x810] sm:$0xff]  ;;  %v384_v8 = vld [vmem:[%s11671_s1 + $0x888] sm:$0xff] }
  0x88   :  { %5315 = vmatprep.subr.mxu1 %v351_v9  ;;  %5281 = vmatpush3.msra.mxu0 %v303_v10  ;;  %v401_v7 = vld [vmem:[%s11671_s1 + $0x910] sm:$0xff]  ;;  %v416_v9 = vld [vmem:[%s11671_s1 + $0x988] sm:$0xff] }
  0x89   :  { %2138 = vmatprep.mubr.f32.mxu0 %v28_v11  ;;  %5316 = vmatpush3.msra.mxu1 %v335_v12  ;;  %v368_v10 = vld [vmem:[%s11671_s1 + $0x808] sm:$0xff]  ;;  %v383_v12 = vld [vmem:[%s11671_s1 + $0x880] sm:$0xff] }
  0x8a   :  { %2139 = vmatmul.mubr.f32.vlgmr.msra.gmra.mxu0 %v27_v13  ;;  %2208 = vmatprep.mubr.f32.mxu1 %v30_v14  ;;  %v400_v11 = vld [vmem:[%s11671_s1 + $0x908] sm:$0xff]  ;;  %v415_v13 = vld [vmem:[%s11671_s1 + $0x980] sm:$0xff] }
  0x8b   :  { %5320 = vmatprep.subr.mxu0 %v398_v15  ;;  %5355 = vmatprep.subr.mxu1 %v430_v16  ;;  %v367_v14 = vld [vmem:[%s11671_s1 + $0x800] sm:$0xff]  ;;  %v32_v15 = vld [vmem:[%s11670_s0 + $0x88] sm:$0xff] }
  0x8c   :  { %2209 = vmatmul.mubr.f32.vlgmr.msra.gmra.mxu1 %v29_v17  ;;  %5321 = vmatpush3.msra.mxu0 %v382_v18  ;;  %v399_v16 = vld [vmem:[%s11671_s1 + $0x900] sm:$0xff]  ;;  %v34_v18 = vld [vmem:[%s11670_s0 + $0x98] sm:$0xff] }
  0x8d   :  { %5356 = vmatpush3.msra.mxu1 %v414_v19  ;;  %5322 = vmatprep.subr.mxu0 %v397_v20  ;;  %v31_v17 = vld [vmem:[%s11670_s0 + $0x80] sm:$0xff]  ;;  %v462_v19 = vld [vmem:[%s11671_s1 + $0xaf8] sm:$0xff] }
  0x8e   :  { %5357 = vmatprep.subr.mxu1 %v429_v21  ;;  %5323 = vmatpush3.msra.mxu0 %v381_v22  ;;  %v494_v20 = vld [vmem:[%s11671_s1 + $0xbf8] sm:$0xff]  ;;  %v33_v21 = vld [vmem:[%s11670_s0 + $0x90] sm:$0xff] }
  0x8f   :  { %5358 = vmatpush3.msra.mxu1 %v413_v23  ;;  %5324 = vmatprep.subr.mxu0 %v396_v24  ;;  %v446_v22 = vld [vmem:[%s11671_s1 + $0xa78] sm:$0xff]  ;;  %v461_v24 = vld [vmem:[%s11671_s1 + $0xaf0] sm:$0xff] }
  0x90   :  { %5359 = vmatprep.subr.mxu1 %v428_v25  ;;  %5325 = vmatpush3.msra.mxu0 %v380_v26  ;;  %v478_v23 = vld [vmem:[%s11671_s1 + $0xb78] sm:$0xff]  ;;  %v493_v25 = vld [vmem:[%s11671_s1 + $0xbf0] sm:$0xff] }
  0x91   :  { %5360 = vmatpush3.msra.mxu1 %v412_v27  ;;  %5326 = vmatprep.subr.mxu0 %v395_v28  ;;  %v445_v26 = vld [vmem:[%s11671_s1 + $0xa70] sm:$0xff]  ;;  %v460_v28 = vld [vmem:[%s11671_s1 + $0xae8] sm:$0xff] }
  0x92   :  { %5361 = vmatprep.subr.mxu1 %v427_v29  ;;  %5327 = vmatpush3.msra.mxu0 %v379_v30  ;;  %v477_v27 = vld [vmem:[%s11671_s1 + $0xb70] sm:$0xff]  ;;  %v492_v29 = vld [vmem:[%s11671_s1 + $0xbe8] sm:$0xff] }
  0x93   :  { %5362 = vmatpush3.msra.mxu1 %v411_v31  ;;  %5328 = vmatprep.subr.mxu0 %v394_v32  ;;  %v444_v30 = vld [vmem:[%s11671_s1 + $0xa68] sm:$0xff]  ;;  %v459_v32 = vld [vmem:[%s11671_s1 + $0xae0] sm:$0xff] }
  0x94   :  { %5363 = vmatprep.subr.mxu1 %v426_v33  ;;  %5329 = vmatpush3.msra.mxu0 %v378_v34  ;;  %v476_v31 = vld [vmem:[%s11671_s1 + $0xb68] sm:$0xff]  ;;  %v491_v33 = vld [vmem:[%s11671_s1 + $0xbe0] sm:$0xff] }
  0x95   :  { %5364 = vmatpush3.msra.mxu1 %v410_v35  ;;  %5330 = vmatprep.subr.mxu0 %v393_v36  ;;  %v443_v34 = vld [vmem:[%s11671_s1 + $0xa60] sm:$0xff]  ;;  %v458_v36 = vld [vmem:[%s11671_s1 + $0xad8] sm:$0xff] }
  0x96   :  { %5365 = vmatprep.subr.mxu1 %v425_v37  ;;  %5331 = vmatpush3.msra.mxu0 %v377_v38  ;;  %v475_v35 = vld [vmem:[%s11671_s1 + $0xb60] sm:$0xff]  ;;  %v490_v37 = vld [vmem:[%s11671_s1 + $0xbd8] sm:$0xff] }
  0x97   :  { %5366 = vmatpush3.msra.mxu1 %v409_v39  ;;  %5332 = vmatprep.subr.mxu0 %v392_v40  ;;  %v442_v38 = vld [vmem:[%s11671_s1 + $0xa58] sm:$0xff]  ;;  %v457_v40 = vld [vmem:[%s11671_s1 + $0xad0] sm:$0xff] }
  0x98   :  { %5367 = vmatprep.subr.mxu1 %v424_v41  ;;  %5333 = vmatpush3.msra.mxu0 %v376_v42  ;;  %v474_v39 = vld [vmem:[%s11671_s1 + $0xb58] sm:$0xff]  ;;  %v489_v41 = vld [vmem:[%s11671_s1 + $0xbd0] sm:$0xff] }
  0x99   :  { %5368 = vmatpush3.msra.mxu1 %v408_v43  ;;  %5334 = vmatprep.subr.mxu0 %v391_v44  ;;  %v441_v42 = vld [vmem:[%s11671_s1 + $0xa50] sm:$0xff]  ;;  %v456_v44 = vld [vmem:[%s11671_s1 + $0xac8] sm:$0xff] }
  0x9a   :  { %5369 = vmatprep.subr.mxu1 %v423_v45  ;;  %5335 = vmatpush3.msra.mxu0 %v375_v46  ;;  %v473_v43 = vld [vmem:[%s11671_s1 + $0xb50] sm:$0xff]  ;;  %v488_v45 = vld [vmem:[%s11671_s1 + $0xbc8] sm:$0xff] }
  0x9b   :  { %5370 = vmatpush3.msra.mxu1 %v407_v47  ;;  %5336 = vmatprep.subr.mxu0 %v390_v48  ;;  %v440_v46 = vld [vmem:[%s11671_s1 + $0xa48] sm:$0xff]  ;;  %v455_v48 = vld [vmem:[%s11671_s1 + $0xac0] sm:$0xff] }
  0x9c   :  { %5371 = vmatprep.subr.mxu1 %v422_v49  ;;  %5337 = vmatpush3.msra.mxu0 %v374_v50  ;;  %v472_v47 = vld [vmem:[%s11671_s1 + $0xb48] sm:$0xff]  ;;  %v487_v49 = vld [vmem:[%s11671_s1 + $0xbc0] sm:$0xff] }
  0x9d   :  { %5372 = vmatpush3.msra.mxu1 %v406_v51  ;;  %5338 = vmatprep.subr.mxu0 %v389_v52  ;;  %v439_v50 = vld [vmem:[%s11671_s1 + $0xa40] sm:$0xff]  ;;  %v454_v52 = vld [vmem:[%s11671_s1 + $0xab8] sm:$0xff] }
  0x9e   :  { %5373 = vmatprep.subr.mxu1 %v421_v53  ;;  %5339 = vmatpush3.msra.mxu0 %v373_v54  ;;  %v471_v51 = vld [vmem:[%s11671_s1 + $0xb40] sm:$0xff]  ;;  %v486_v53 = vld [vmem:[%s11671_s1 + $0xbb8] sm:$0xff] }
  0x9f   :  { %5374 = vmatpush3.msra.mxu1 %v405_v55  ;;  %5340 = vmatprep.subr.mxu0 %v388_v56  ;;  %v438_v54 = vld [vmem:[%s11671_s1 + $0xa38] sm:$0xff]  ;;  %v453_v56 = vld [vmem:[%s11671_s1 + $0xab0] sm:$0xff] }
  0xa0   :  { %5375 = vmatprep.subr.mxu1 %v420_v57  ;;  %5341 = vmatpush3.msra.mxu0 %v372_v58  ;;  %v470_v55 = vld [vmem:[%s11671_s1 + $0xb38] sm:$0xff]  ;;  %v485_v57 = vld [vmem:[%s11671_s1 + $0xbb0] sm:$0xff] }
  0xa1   :  { %5376 = vmatpush3.msra.mxu1 %v404_v59  ;;  %5342 = vmatprep.subr.mxu0 %v387_v60  ;;  %v437_v58 = vld [vmem:[%s11671_s1 + $0xa30] sm:$0xff]  ;;  %v452_v60 = vld [vmem:[%s11671_s1 + $0xaa8] sm:$0xff] }
  0xa2   :  { %5377 = vmatprep.subr.mxu1 %v419_v61  ;;  %5343 = vmatpush3.msra.mxu0 %v371_v62  ;;  %v469_v59 = vld [vmem:[%s11671_s1 + $0xb30] sm:$0xff]  ;;  %v484_v61 = vld [vmem:[%s11671_s1 + $0xba8] sm:$0xff] }
  0xa3   :  { %5378 = vmatpush3.msra.mxu1 %v403_v63  ;;  %5344 = vmatprep.subr.mxu0 %v386_v0  ;;  %v436_v62 = vld [vmem:[%s11671_s1 + $0xa28] sm:$0xff]  ;;  %v451_v0 = vld [vmem:[%s11671_s1 + $0xaa0] sm:$0xff] }
  0xa4   :  { %5379 = vmatprep.subr.mxu1 %v418_v1  ;;  %5345 = vmatpush3.msra.mxu0 %v370_v2  ;;  %v468_v63 = vld [vmem:[%s11671_s1 + $0xb28] sm:$0xff]  ;;  %v483_v1 = vld [vmem:[%s11671_s1 + $0xba0] sm:$0xff] }
  0xa5   :  { %5380 = vmatpush3.msra.mxu1 %v402_v3  ;;  %5346 = vmatprep.subr.mxu0 %v385_v4  ;;  %v435_v2 = vld [vmem:[%s11671_s1 + $0xa20] sm:$0xff]  ;;  %v450_v4 = vld [vmem:[%s11671_s1 + $0xa98] sm:$0xff] }
  0xa6   :  { %5381 = vmatprep.subr.mxu1 %v417_v5  ;;  %5347 = vmatpush3.msra.mxu0 %v369_v6  ;;  %v467_v3 = vld [vmem:[%s11671_s1 + $0xb20] sm:$0xff]  ;;  %v482_v5 = vld [vmem:[%s11671_s1 + $0xb98] sm:$0xff] }
  0xa7   :  { %5382 = vmatpush3.msra.mxu1 %v401_v7  ;;  %5348 = vmatprep.subr.mxu0 %v384_v8  ;;  %v434_v6 = vld [vmem:[%s11671_s1 + $0xa18] sm:$0xff]  ;;  %v449_v8 = vld [vmem:[%s11671_s1 + $0xa90] sm:$0xff] }
  0xa8   :  { %5383 = vmatprep.subr.mxu1 %v416_v9  ;;  %5349 = vmatpush3.msra.mxu0 %v368_v10  ;;  %v466_v7 = vld [vmem:[%s11671_s1 + $0xb18] sm:$0xff]  ;;  %v481_v9 = vld [vmem:[%s11671_s1 + $0xb90] sm:$0xff] }
  0xa9   :  { %5384 = vmatpush3.msra.mxu1 %v400_v11  ;;  %5350 = vmatprep.subr.mxu0 %v383_v12  ;;  %v433_v10 = vld [vmem:[%s11671_s1 + $0xa10] sm:$0xff]  ;;  %v448_v12 = vld [vmem:[%s11671_s1 + $0xa88] sm:$0xff] }
  0xaa   :  { %5385 = vmatprep.subr.mxu1 %v415_v13  ;;  %5351 = vmatpush3.msra.mxu0 %v367_v14  ;;  %v465_v11 = vld [vmem:[%s11671_s1 + $0xb10] sm:$0xff]  ;;  %v480_v13 = vld [vmem:[%s11671_s1 + $0xb88] sm:$0xff] }
  0xab   :  { %2278 = vmatprep.mubr.f32.mxu0 %v32_v15  ;;  %5386 = vmatpush3.msra.mxu1 %v399_v16  ;;  %v432_v14 = vld [vmem:[%s11671_s1 + $0xa08] sm:$0xff]  ;;  %v447_v16 = vld [vmem:[%s11671_s1 + $0xa80] sm:$0xff] }
  0xac   :  { %2279 = vmatmul.mubr.f32.vlgmr.msra.gmra.mxu0 %v31_v17  ;;  %2348 = vmatprep.mubr.f32.mxu1 %v34_v18  ;;  %v464_v15 = vld [vmem:[%s11671_s1 + $0xb08] sm:$0xff]  ;;  %v479_v17 = vld [vmem:[%s11671_s1 + $0xb80] sm:$0xff] }
  0xad   :  { %5390 = vmatprep.subr.mxu0 %v462_v19  ;;  %5425 = vmatprep.subr.mxu1 %v494_v20  ;;  %v431_v18 = vld [vmem:[%s11671_s1 + $0xa00] sm:$0xff]  ;;  %v36_v19 = vld [vmem:[%s11670_s0 + $0xa8] sm:$0xff] }
  0xae   :  { %2349 = vmatmul.mubr.f32.vlgmr.msra.gmra.mxu1 %v33_v21  ;;  %5391 = vmatpush3.msra.mxu0 %v446_v22  ;;  %v463_v20 = vld [vmem:[%s11671_s1 + $0xb00] sm:$0xff]  ;;  %v38_v22 = vld [vmem:[%s11670_s0 + $0xb8] sm:$0xff] }
  0xaf   :  { %5426 = vmatpush3.msra.mxu1 %v478_v23  ;;  %5392 = vmatprep.subr.mxu0 %v461_v24  ;;  %v35_v21 = vld [vmem:[%s11670_s0 + $0xa0] sm:$0xff]  ;;  %v526_v23 = vld [vmem:[%s11671_s1 + $0xcf8] sm:$0xff] }
  0xb0   :  { %5427 = vmatprep.subr.mxu1 %v493_v25  ;;  %5393 = vmatpush3.msra.mxu0 %v445_v26  ;;  %v558_v24 = vld [vmem:[%s11671_s1 + $0xdf8] sm:$0xff]  ;;  %v37_v25 = vld [vmem:[%s11670_s0 + $0xb0] sm:$0xff] }
  0xb1   :  { %5428 = vmatpush3.msra.mxu1 %v477_v27  ;;  %5394 = vmatprep.subr.mxu0 %v460_v28  ;;  %v510_v26 = vld [vmem:[%s11671_s1 + $0xc78] sm:$0xff]  ;;  %v525_v28 = vld [vmem:[%s11671_s1 + $0xcf0] sm:$0xff] }
  0xb2   :  { %5429 = vmatprep.subr.mxu1 %v492_v29  ;;  %5395 = vmatpush3.msra.mxu0 %v444_v30  ;;  %v542_v27 = vld [vmem:[%s11671_s1 + $0xd78] sm:$0xff]  ;;  %v557_v29 = vld [vmem:[%s11671_s1 + $0xdf0] sm:$0xff] }
  0xb3   :  { %5430 = vmatpush3.msra.mxu1 %v476_v31  ;;  %5396 = vmatprep.subr.mxu0 %v459_v32  ;;  %v509_v30 = vld [vmem:[%s11671_s1 + $0xc70] sm:$0xff]  ;;  %v524_v32 = vld [vmem:[%s11671_s1 + $0xce8] sm:$0xff] }
  0xb4   :  { %5431 = vmatprep.subr.mxu1 %v491_v33  ;;  %5397 = vmatpush3.msra.mxu0 %v443_v34  ;;  %v541_v31 = vld [vmem:[%s11671_s1 + $0xd70] sm:$0xff]  ;;  %v556_v33 = vld [vmem:[%s11671_s1 + $0xde8] sm:$0xff] }
  0xb5   :  { %5432 = vmatpush3.msra.mxu1 %v475_v35  ;;  %5398 = vmatprep.subr.mxu0 %v458_v36  ;;  %v508_v34 = vld [vmem:[%s11671_s1 + $0xc68] sm:$0xff]  ;;  %v523_v36 = vld [vmem:[%s11671_s1 + $0xce0] sm:$0xff] }
  0xb6   :  { %5433 = vmatprep.subr.mxu1 %v490_v37  ;;  %5399 = vmatpush3.msra.mxu0 %v442_v38  ;;  %v540_v35 = vld [vmem:[%s11671_s1 + $0xd68] sm:$0xff]  ;;  %v555_v37 = vld [vmem:[%s11671_s1 + $0xde0] sm:$0xff] }
  0xb7   :  { %5434 = vmatpush3.msra.mxu1 %v474_v39  ;;  %5400 = vmatprep.subr.mxu0 %v457_v40  ;;  %v507_v38 = vld [vmem:[%s11671_s1 + $0xc60] sm:$0xff]  ;;  %v522_v40 = vld [vmem:[%s11671_s1 + $0xcd8] sm:$0xff] }
  0xb8   :  { %5435 = vmatprep.subr.mxu1 %v489_v41  ;;  %5401 = vmatpush3.msra.mxu0 %v441_v42  ;;  %v539_v39 = vld [vmem:[%s11671_s1 + $0xd60] sm:$0xff]  ;;  %v554_v41 = vld [vmem:[%s11671_s1 + $0xdd8] sm:$0xff] }
  0xb9   :  { %5436 = vmatpush3.msra.mxu1 %v473_v43  ;;  %5402 = vmatprep.subr.mxu0 %v456_v44  ;;  %v506_v42 = vld [vmem:[%s11671_s1 + $0xc58] sm:$0xff]  ;;  %v521_v44 = vld [vmem:[%s11671_s1 + $0xcd0] sm:$0xff] }
  0xba   :  { %5437 = vmatprep.subr.mxu1 %v488_v45  ;;  %5403 = vmatpush3.msra.mxu0 %v440_v46  ;;  %v538_v43 = vld [vmem:[%s11671_s1 + $0xd58] sm:$0xff]  ;;  %v553_v45 = vld [vmem:[%s11671_s1 + $0xdd0] sm:$0xff] }
  0xbb   :  { %5438 = vmatpush3.msra.mxu1 %v472_v47  ;;  %5404 = vmatprep.subr.mxu0 %v455_v48  ;;  %v505_v46 = vld [vmem:[%s11671_s1 + $0xc50] sm:$0xff]  ;;  %v520_v48 = vld [vmem:[%s11671_s1 + $0xcc8] sm:$0xff] }
  0xbc   :  { %5439 = vmatprep.subr.mxu1 %v487_v49  ;;  %5405 = vmatpush3.msra.mxu0 %v439_v50  ;;  %v537_v47 = vld [vmem:[%s11671_s1 + $0xd50] sm:$0xff]  ;;  %v552_v49 = vld [vmem:[%s11671_s1 + $0xdc8] sm:$0xff] }
  0xbd   :  { %5440 = vmatpush3.msra.mxu1 %v471_v51  ;;  %5406 = vmatprep.subr.mxu0 %v454_v52  ;;  %v504_v50 = vld [vmem:[%s11671_s1 + $0xc48] sm:$0xff]  ;;  %v519_v52 = vld [vmem:[%s11671_s1 + $0xcc0] sm:$0xff] }
  0xbe   :  { %5441 = vmatprep.subr.mxu1 %v486_v53  ;;  %5407 = vmatpush3.msra.mxu0 %v438_v54  ;;  %v536_v51 = vld [vmem:[%s11671_s1 + $0xd48] sm:$0xff]  ;;  %v551_v53 = vld [vmem:[%s11671_s1 + $0xdc0] sm:$0xff] }
  0xbf   :  { %5442 = vmatpush3.msra.mxu1 %v470_v55  ;;  %5408 = vmatprep.subr.mxu0 %v453_v56  ;;  %v503_v54 = vld [vmem:[%s11671_s1 + $0xc40] sm:$0xff]  ;;  %v518_v56 = vld [vmem:[%s11671_s1 + $0xcb8] sm:$0xff] }
  0xc0   :  { %5443 = vmatprep.subr.mxu1 %v485_v57  ;;  %5409 = vmatpush3.msra.mxu0 %v437_v58  ;;  %v535_v55 = vld [vmem:[%s11671_s1 + $0xd40] sm:$0xff]  ;;  %v550_v57 = vld [vmem:[%s11671_s1 + $0xdb8] sm:$0xff] }
  0xc1   :  { %5444 = vmatpush3.msra.mxu1 %v469_v59  ;;  %5410 = vmatprep.subr.mxu0 %v452_v60  ;;  %v502_v58 = vld [vmem:[%s11671_s1 + $0xc38] sm:$0xff]  ;;  %v517_v60 = vld [vmem:[%s11671_s1 + $0xcb0] sm:$0xff] }
  0xc2   :  { %5445 = vmatprep.subr.mxu1 %v484_v61  ;;  %5411 = vmatpush3.msra.mxu0 %v436_v62  ;;  %v534_v59 = vld [vmem:[%s11671_s1 + $0xd38] sm:$0xff]  ;;  %v549_v61 = vld [vmem:[%s11671_s1 + $0xdb0] sm:$0xff] }
  0xc3   :  { %5446 = vmatpush3.msra.mxu1 %v468_v63  ;;  %5412 = vmatprep.subr.mxu0 %v451_v0  ;;  %v501_v62 = vld [vmem:[%s11671_s1 + $0xc30] sm:$0xff]  ;;  %v516_v0 = vld [vmem:[%s11671_s1 + $0xca8] sm:$0xff] }
  0xc4   :  { %5447 = vmatprep.subr.mxu1 %v483_v1  ;;  %5413 = vmatpush3.msra.mxu0 %v435_v2  ;;  %v533_v63 = vld [vmem:[%s11671_s1 + $0xd30] sm:$0xff]  ;;  %v548_v1 = vld [vmem:[%s11671_s1 + $0xda8] sm:$0xff] }
  0xc5   :  { %5448 = vmatpush3.msra.mxu1 %v467_v3  ;;  %5414 = vmatprep.subr.mxu0 %v450_v4  ;;  %v500_v2 = vld [vmem:[%s11671_s1 + $0xc28] sm:$0xff]  ;;  %v515_v4 = vld [vmem:[%s11671_s1 + $0xca0] sm:$0xff] }
  0xc6   :  { %5449 = vmatprep.subr.mxu1 %v482_v5  ;;  %5415 = vmatpush3.msra.mxu0 %v434_v6  ;;  %v532_v3 = vld [vmem:[%s11671_s1 + $0xd28] sm:$0xff]  ;;  %v547_v5 = vld [vmem:[%s11671_s1 + $0xda0] sm:$0xff] }
  0xc7   :  { %5450 = vmatpush3.msra.mxu1 %v466_v7  ;;  %5416 = vmatprep.subr.mxu0 %v449_v8  ;;  %v499_v6 = vld [vmem:[%s11671_s1 + $0xc20] sm:$0xff]  ;;  %v514_v8 = vld [vmem:[%s11671_s1 + $0xc98] sm:$0xff] }
  0xc8   :  { %5451 = vmatprep.subr.mxu1 %v481_v9  ;;  %5417 = vmatpush3.msra.mxu0 %v433_v10  ;;  %v531_v7 = vld [vmem:[%s11671_s1 + $0xd20] sm:$0xff]  ;;  %v546_v9 = vld [vmem:[%s11671_s1 + $0xd98] sm:$0xff] }
  0xc9   :  { %5452 = vmatpush3.msra.mxu1 %v465_v11  ;;  %5418 = vmatprep.subr.mxu0 %v448_v12  ;;  %v498_v10 = vld [vmem:[%s11671_s1 + $0xc18] sm:$0xff]  ;;  %v513_v12 = vld [vmem:[%s11671_s1 + $0xc90] sm:$0xff] }
  0xca   :  { %5453 = vmatprep.subr.mxu1 %v480_v13  ;;  %5419 = vmatpush3.msra.mxu0 %v432_v14  ;;  %v530_v11 = vld [vmem:[%s11671_s1 + $0xd18] sm:$0xff]  ;;  %v545_v13 = vld [vmem:[%s11671_s1 + $0xd90] sm:$0xff] }
  0xcb   :  { %5454 = vmatpush3.msra.mxu1 %v464_v15  ;;  %5420 = vmatprep.subr.mxu0 %v447_v16  ;;  %v497_v14 = vld [vmem:[%s11671_s1 + $0xc10] sm:$0xff]  ;;  %v512_v16 = vld [vmem:[%s11671_s1 + $0xc88] sm:$0xff] }
  0xcc   :  { %5455 = vmatprep.subr.mxu1 %v479_v17  ;;  %5421 = vmatpush3.msra.mxu0 %v431_v18  ;;  %v529_v15 = vld [vmem:[%s11671_s1 + $0xd10] sm:$0xff]  ;;  %v544_v17 = vld [vmem:[%s11671_s1 + $0xd88] sm:$0xff] }
  0xcd   :  { %2418 = vmatprep.mubr.f32.mxu0 %v36_v19  ;;  %5456 = vmatpush3.msra.mxu1 %v463_v20  ;;  %v496_v18 = vld [vmem:[%s11671_s1 + $0xc08] sm:$0xff]  ;;  %v511_v20 = vld [vmem:[%s11671_s1 + $0xc80] sm:$0xff] }
  0xce   :  { %2419 = vmatmul.mubr.f32.vlgmr.msra.gmra.mxu0 %v35_v21  ;;  %2488 = vmatprep.mubr.f32.mxu1 %v38_v22  ;;  %v528_v19 = vld [vmem:[%s11671_s1 + $0xd08] sm:$0xff]  ;;  %v543_v21 = vld [vmem:[%s11671_s1 + $0xd80] sm:$0xff] }
  0xcf   :  { %5460 = vmatprep.subr.mxu0 %v526_v23  ;;  %5495 = vmatprep.subr.mxu1 %v558_v24  ;;  %v495_v22 = vld [vmem:[%s11671_s1 + $0xc00] sm:$0xff]  ;;  %v40_v23 = vld [vmem:[%s11670_s0 + $0xc8] sm:$0xff] }
  0xd0   :  { %2489 = vmatmul.mubr.f32.vlgmr.msra.gmra.mxu1 %v37_v25  ;;  %5461 = vmatpush3.msra.mxu0 %v510_v26  ;;  %v527_v24 = vld [vmem:[%s11671_s1 + $0xd00] sm:$0xff]  ;;  %v42_v26 = vld [vmem:[%s11670_s0 + $0xd8] sm:$0xff] }
  0xd1   :  { %5496 = vmatpush3.msra.mxu1 %v542_v27  ;;  %5462 = vmatprep.subr.mxu0 %v525_v28  ;;  %v39_v25 = vld [vmem:[%s11670_s0 + $0xc0] sm:$0xff]  ;;  %v590_v27 = vld [vmem:[%s11671_s1 + $0xef8] sm:$0xff] }
  0xd2   :  { %5497 = vmatprep.subr.mxu1 %v557_v29  ;;  %5463 = vmatpush3.msra.mxu0 %v509_v30  ;;  %v622_v28 = vld [vmem:[%s11671_s1 + $0xff8] sm:$0xff]  ;;  %v41_v29 = vld [vmem:[%s11670_s0 + $0xd0] sm:$0xff] }
  0xd3   :  { %5498 = vmatpush3.msra.mxu1 %v541_v31  ;;  %5464 = vmatprep.subr.mxu0 %v524_v32  ;;  %v574_v30 = vld [vmem:[%s11671_s1 + $0xe78] sm:$0xff]  ;;  %v589_v32 = vld [vmem:[%s11671_s1 + $0xef0] sm:$0xff] }
  0xd4   :  { %5499 = vmatprep.subr.mxu1 %v556_v33  ;;  %5465 = vmatpush3.msra.mxu0 %v508_v34  ;;  %v606_v31 = vld [vmem:[%s11671_s1 + $0xf78] sm:$0xff]  ;;  %v621_v33 = vld [vmem:[%s11671_s1 + $0xff0] sm:$0xff] }
  0xd5   :  { %5500 = vmatpush3.msra.mxu1 %v540_v35  ;;  %5466 = vmatprep.subr.mxu0 %v523_v36  ;;  %v573_v34 = vld [vmem:[%s11671_s1 + $0xe70] sm:$0xff]  ;;  %v588_v36 = vld [vmem:[%s11671_s1 + $0xee8] sm:$0xff] }
  0xd6   :  { %5501 = vmatprep.subr.mxu1 %v555_v37  ;;  %5467 = vmatpush3.msra.mxu0 %v507_v38  ;;  %v605_v35 = vld [vmem:[%s11671_s1 + $0xf70] sm:$0xff]  ;;  %v620_v37 = vld [vmem:[%s11671_s1 + $0xfe8] sm:$0xff] }
  0xd7   :  { %5502 = vmatpush3.msra.mxu1 %v539_v39  ;;  %5468 = vmatprep.subr.mxu0 %v522_v40  ;;  %v572_v38 = vld [vmem:[%s11671_s1 + $0xe68] sm:$0xff]  ;;  %v587_v40 = vld [vmem:[%s11671_s1 + $0xee0] sm:$0xff] }
  0xd8   :  { %5503 = vmatprep.subr.mxu1 %v554_v41  ;;  %5469 = vmatpush3.msra.mxu0 %v506_v42  ;;  %v604_v39 = vld [vmem:[%s11671_s1 + $0xf68] sm:$0xff]  ;;  %v619_v41 = vld [vmem:[%s11671_s1 + $0xfe0] sm:$0xff] }
  0xd9   :  { %5504 = vmatpush3.msra.mxu1 %v538_v43  ;;  %5470 = vmatprep.subr.mxu0 %v521_v44  ;;  %v571_v42 = vld [vmem:[%s11671_s1 + $0xe60] sm:$0xff]  ;;  %v586_v44 = vld [vmem:[%s11671_s1 + $0xed8] sm:$0xff] }
  0xda   :  { %5505 = vmatprep.subr.mxu1 %v553_v45  ;;  %5471 = vmatpush3.msra.mxu0 %v505_v46  ;;  %v603_v43 = vld [vmem:[%s11671_s1 + $0xf60] sm:$0xff]  ;;  %v618_v45 = vld [vmem:[%s11671_s1 + $0xfd8] sm:$0xff] }
  0xdb   :  { %5506 = vmatpush3.msra.mxu1 %v537_v47  ;;  %5472 = vmatprep.subr.mxu0 %v520_v48  ;;  %v570_v46 = vld [vmem:[%s11671_s1 + $0xe58] sm:$0xff]  ;;  %v585_v48 = vld [vmem:[%s11671_s1 + $0xed0] sm:$0xff] }
  0xdc   :  { %5507 = vmatprep.subr.mxu1 %v552_v49  ;;  %5473 = vmatpush3.msra.mxu0 %v504_v50  ;;  %v602_v47 = vld [vmem:[%s11671_s1 + $0xf58] sm:$0xff]  ;;  %v617_v49 = vld [vmem:[%s11671_s1 + $0xfd0] sm:$0xff] }
  0xdd   :  { %5508 = vmatpush3.msra.mxu1 %v536_v51  ;;  %5474 = vmatprep.subr.mxu0 %v519_v52  ;;  %v569_v50 = vld [vmem:[%s11671_s1 + $0xe50] sm:$0xff]  ;;  %v584_v52 = vld [vmem:[%s11671_s1 + $0xec8] sm:$0xff] }
  0xde   :  { %5509 = vmatprep.subr.mxu1 %v551_v53  ;;  %5475 = vmatpush3.msra.mxu0 %v503_v54  ;;  %v601_v51 = vld [vmem:[%s11671_s1 + $0xf50] sm:$0xff]  ;;  %v616_v53 = vld [vmem:[%s11671_s1 + $0xfc8] sm:$0xff] }
  0xdf   :  { %5510 = vmatpush3.msra.mxu1 %v535_v55  ;;  %5476 = vmatprep.subr.mxu0 %v518_v56  ;;  %v568_v54 = vld [vmem:[%s11671_s1 + $0xe48] sm:$0xff]  ;;  %v583_v56 = vld [vmem:[%s11671_s1 + $0xec0] sm:$0xff] }
  0xe0   :  { %5511 = vmatprep.subr.mxu1 %v550_v57  ;;  %5477 = vmatpush3.msra.mxu0 %v502_v58  ;;  %v600_v55 = vld [vmem:[%s11671_s1 + $0xf48] sm:$0xff]  ;;  %v615_v57 = vld [vmem:[%s11671_s1 + $0xfc0] sm:$0xff] }
  0xe1   :  { %5512 = vmatpush3.msra.mxu1 %v534_v59  ;;  %5478 = vmatprep.subr.mxu0 %v517_v60  ;;  %v567_v58 = vld [vmem:[%s11671_s1 + $0xe40] sm:$0xff]  ;;  %v582_v60 = vld [vmem:[%s11671_s1 + $0xeb8] sm:$0xff] }
  0xe2   :  { %5513 = vmatprep.subr.mxu1 %v549_v61  ;;  %5479 = vmatpush3.msra.mxu0 %v501_v62  ;;  %v599_v59 = vld [vmem:[%s11671_s1 + $0xf40] sm:$0xff]  ;;  %v614_v61 = vld [vmem:[%s11671_s1 + $0xfb8] sm:$0xff] }
  0xe3   :  { %5514 = vmatpush3.msra.mxu1 %v533_v63  ;;  %5480 = vmatprep.subr.mxu0 %v516_v0  ;;  %v566_v62 = vld [vmem:[%s11671_s1 + $0xe38] sm:$0xff]  ;;  %v581_v0 = vld [vmem:[%s11671_s1 + $0xeb0] sm:$0xff] }
  0xe4   :  { %5515 = vmatprep.subr.mxu1 %v548_v1  ;;  %5481 = vmatpush3.msra.mxu0 %v500_v2  ;;  %v598_v63 = vld [vmem:[%s11671_s1 + $0xf38] sm:$0xff]  ;;  %v613_v1 = vld [vmem:[%s11671_s1 + $0xfb0] sm:$0xff] }
  0xe5   :  { %5516 = vmatpush3.msra.mxu1 %v532_v3  ;;  %5482 = vmatprep.subr.mxu0 %v515_v4  ;;  %v565_v2 = vld [vmem:[%s11671_s1 + $0xe30] sm:$0xff]  ;;  %v580_v4 = vld [vmem:[%s11671_s1 + $0xea8] sm:$0xff] }
  0xe6   :  { %5517 = vmatprep.subr.mxu1 %v547_v5  ;;  %5483 = vmatpush3.msra.mxu0 %v499_v6  ;;  %v597_v3 = vld [vmem:[%s11671_s1 + $0xf30] sm:$0xff]  ;;  %v612_v5 = vld [vmem:[%s11671_s1 + $0xfa8] sm:$0xff] }
  0xe7   :  { %5518 = vmatpush3.msra.mxu1 %v531_v7  ;;  %5484 = vmatprep.subr.mxu0 %v514_v8  ;;  %v564_v6 = vld [vmem:[%s11671_s1 + $0xe28] sm:$0xff] }
  0xe8   :  { %5519 = vmatprep.subr.mxu1 %v546_v9  ;;  %5485 = vmatpush3.msra.mxu0 %v498_v10  ;;  %v596_v7 = vld [vmem:[%s11671_s1 + $0xf28] sm:$0xff] }
  0xe9   :  { %5520 = vmatpush3.msra.mxu1 %v530_v11  ;;  %5486 = vmatprep.subr.mxu0 %v513_v12 }
  0xea   :  { %5521 = vmatprep.subr.mxu1 %v545_v13  ;;  %5487 = vmatpush3.msra.mxu0 %v497_v14 }
  0xeb   :  { %5522 = vmatpush3.msra.mxu1 %v529_v15  ;;  %5488 = vmatprep.subr.mxu0 %v512_v16 }
  0xec   :  { %5523 = vmatprep.subr.mxu1 %v544_v17  ;;  %5489 = vmatpush3.msra.mxu0 %v496_v18 }
  0xed   :  { %5524 = vmatpush3.msra.mxu1 %v528_v19  ;;  %5490 = vmatprep.subr.mxu0 %v511_v20 }
  0xee   :  { %5525 = vmatprep.subr.mxu1 %v543_v21  ;;  %5491 = vmatpush3.msra.mxu0 %v495_v22 }
  0xef   :  { %2558 = vmatprep.mubr.f32.mxu0 %v40_v23  ;;  %5526 = vmatpush3.msra.mxu1 %v527_v24 }
  0xf0   :  { %2559 = vmatmul.mubr.f32.vlgmr.msra.gmra.mxu0 %v39_v25  ;;  %2628 = vmatprep.mubr.f32.mxu1 %v42_v26 }
  0xf1   :  { %5530 = vmatprep.subr.mxu0 %v590_v27  ;;  %5565 = vmatprep.subr.mxu1 %v622_v28 }
  0xf2   :  { %2629 = vmatmul.mubr.f32.vlgmr.msra.gmra.mxu1 %v41_v29  ;;  %5531 = vmatpush3.msra.mxu0 %v574_v30 }
  0xf3   :  { %5566 = vmatpush3.msra.mxu1 %v606_v31  ;;  %5532 = vmatprep.subr.mxu0 %v589_v32 }
  0xf4   :  { %5567 = vmatprep.subr.mxu1 %v621_v33  ;;  %5533 = vmatpush3.msra.mxu0 %v573_v34 }
  0xf5   :  { %5568 = vmatpush3.msra.mxu1 %v605_v35  ;;  %5534 = vmatprep.subr.mxu0 %v588_v36 }
  0xf6   :  { %5569 = vmatprep.subr.mxu1 %v620_v37  ;;  %5535 = vmatpush3.msra.mxu0 %v572_v38 }
  0xf7   :  { %5570 = vmatpush3.msra.mxu1 %v604_v39  ;;  %5536 = vmatprep.subr.mxu0 %v587_v40 }
  0xf8   :  { %5571 = vmatprep.subr.mxu1 %v619_v41  ;;  %5537 = vmatpush3.msra.mxu0 %v571_v42 }
  0xf9   :  { %5572 = vmatpush3.msra.mxu1 %v603_v43  ;;  %5538 = vmatprep.subr.mxu0 %v586_v44 }
  0xfa   :  { %5573 = vmatprep.subr.mxu1 %v618_v45  ;;  %5539 = vmatpush3.msra.mxu0 %v570_v46 }
  0xfb   :  { %5574 = vmatpush3.msra.mxu1 %v602_v47  ;;  %5540 = vmatprep.subr.mxu0 %v585_v48 }
  0xfc   :  { %5575 = vmatprep.subr.mxu1 %v617_v49  ;;  %5541 = vmatpush3.msra.mxu0 %v569_v50 }
  0xfd   :  { %5576 = vmatpush3.msra.mxu1 %v601_v51  ;;  %5542 = vmatprep.subr.mxu0 %v584_v52 }
  0xfe   :  { %5577 = vmatprep.subr.mxu1 %v616_v53  ;;  %5543 = vmatpush3.msra.mxu0 %v568_v54 }
  0xff   :  { %5578 = vmatpush3.msra.mxu1 %v600_v55  ;;  %5544 = vmatprep.subr.mxu0 %v583_v56 }
 0x100   :  { %5579 = vmatprep.subr.mxu1 %v615_v57  ;;  %5545 = vmatpush3.msra.mxu0 %v567_v58 }
 0x101   :  { %5580 = vmatpush3.msra.mxu1 %v599_v59  ;;  %5546 = vmatprep.subr.mxu0 %v582_v60 }
 0x102   :  { %5581 = vmatprep.subr.mxu1 %v614_v61  ;;  %5547 = vmatpush3.msra.mxu0 %v566_v62 }
 0x103   :  { %5582 = vmatpush3.msra.mxu1 %v598_v63  ;;  %5548 = vmatprep.subr.mxu0 %v581_v0 }
 0x104   :  { %5583 = vmatprep.subr.mxu1 %v613_v1 }
 0x105   :  { %8 = vsyncpa [#allocation3], 0  ;;  %5549 = vmatpush3.msra.mxu0 %v565_v2  ;;  %5584 = vmatpush3.msra.mxu1 %v597_v3  ;;  %v579_v8 = vld [vmem:[%s11671_s1 + $0xea0] sm:$0xff]  ;;  %v578_v12 = vld [vmem:[%s11671_s1 + $0xe98] sm:$0xff] }
 0x106   :  { %v611_v9 = vld [vmem:[%s11671_s1 + $0xfa0] sm:$0xff]  ;;  %5550 = vmatprep.subr.mxu0 %v580_v4  ;;  %5585 = vmatprep.subr.mxu1 %v612_v5  ;;  %v610_v13 = vld [vmem:[%s11671_s1 + $0xf98] sm:$0xff]  ;;  %v577_v16 = vld [vmem:[%s11671_s1 + $0xe90] sm:$0xff] }
 0x107   :  { %v563_v10 = vld [vmem:[%s11671_s1 + $0xe20] sm:$0xff]  ;;  %5551 = vmatpush3.msra.mxu0 %v564_v6  ;;  %5586 = vmatpush3.msra.mxu1 %v596_v7  ;;  %v562_v14 = vld [vmem:[%s11671_s1 + $0xe18] sm:$0xff]  ;;  %v609_v17 = vld [vmem:[%s11671_s1 + $0xf90] sm:$0xff] }
 0x108   :  { %v595_v11 = vld [vmem:[%s11671_s1 + $0xf20] sm:$0xff]  ;;  %5552 = vmatprep.subr.mxu0 %v579_v8  ;;  %5587 = vmatprep.subr.mxu1 %v611_v9  ;;  %v594_v15 = vld [vmem:[%s11671_s1 + $0xf18] sm:$0xff]  ;;  %v561_v18 = vld [vmem:[%s11671_s1 + $0xe10] sm:$0xff] }
 0x109   :  { %5553 = vmatpush3.msra.mxu0 %v563_v10  ;;  %5588 = vmatpush3.msra.mxu1 %v595_v11  ;;  %v593_v19 = vld [vmem:[%s11671_s1 + $0xf10] sm:$0xff]  ;;  %v576_v20 = vld [vmem:[%s11671_s1 + $0xe88] sm:$0xff]  ;;  %v575_v24 = vld [vmem:[%s11671_s1 + $0xe80] sm:$0xff] }
 0x10a   :  { %5554 = vmatprep.subr.mxu0 %v578_v12  ;;  %5589 = vmatprep.subr.mxu1 %v610_v13  ;;  %v608_v21 = vld [vmem:[%s11671_s1 + $0xf88] sm:$0xff]  ;;  %v607_v25 = vld [vmem:[%s11671_s1 + $0xf80] sm:$0xff]  ;;  %v46_v30 = vld [vmem:[%s11670_s0 + $0xf8] sm:$0xff] }
 0x10b   :  { %5555 = vmatpush3.msra.mxu0 %v562_v14  ;;  %5590 = vmatpush3.msra.mxu1 %v594_v15  ;;  %v560_v22 = vld [vmem:[%s11671_s1 + $0xe08] sm:$0xff]  ;;  %v559_v26 = vld [vmem:[%s11671_s1 + $0xe00] sm:$0xff]  ;;  %v654_v31 = vld [vmem:[%s11671_s1 + $0x10f8] sm:$0xff] }
 0x10c   :  { %5556 = vmatprep.subr.mxu0 %v577_v16  ;;  %5591 = vmatprep.subr.mxu1 %v609_v17  ;;  %v592_v23 = vld [vmem:[%s11671_s1 + $0xf08] sm:$0xff]  ;;  %v591_v28 = vld [vmem:[%s11671_s1 + $0xf00] sm:$0xff]  ;;  %v686_v32 = vld [vmem:[%s11671_s1 + $0x11f8] sm:$0xff] }
 0x10d   :  { %5557 = vmatpush3.msra.mxu0 %v561_v18  ;;  %5592 = vmatpush3.msra.mxu1 %v593_v19  ;;  %v44_v27 = vld [vmem:[%s11670_s0 + $0xe8] sm:$0xff]  ;;  %v43_v29 = vld [vmem:[%s11670_s0 + $0xe0] sm:$0xff]  ;;  %v45_v33 = vld [vmem:[%s11670_s0 + $0xf0] sm:$0xff] }
 0x10e   :  { %5558 = vmatprep.subr.mxu0 %v576_v20  ;;  %5593 = vmatprep.subr.mxu1 %v608_v21  ;;  %v638_v34 = vld [vmem:[%s11671_s1 + $0x1078] sm:$0xff]  ;;  %v653_v36 = vld [vmem:[%s11671_s1 + $0x10f0] sm:$0xff]  ;;  %v652_v40 = vld [vmem:[%s11671_s1 + $0x10e8] sm:$0xff] }
 0x10f   :  { %5559 = vmatpush3.msra.mxu0 %v560_v22  ;;  %5594 = vmatpush3.msra.mxu1 %v592_v23  ;;  %v670_v35 = vld [vmem:[%s11671_s1 + $0x1178] sm:$0xff]  ;;  %v685_v37 = vld [vmem:[%s11671_s1 + $0x11f0] sm:$0xff]  ;;  %v684_v41 = vld [vmem:[%s11671_s1 + $0x11e8] sm:$0xff] }
 0x110   :  { %5560 = vmatprep.subr.mxu0 %v575_v24  ;;  %5595 = vmatprep.subr.mxu1 %v607_v25  ;;  %v637_v38 = vld [vmem:[%s11671_s1 + $0x1070] sm:$0xff]  ;;  %v636_v42 = vld [vmem:[%s11671_s1 + $0x1068] sm:$0xff]  ;;  %v651_v44 = vld [vmem:[%s11671_s1 + $0x10e0] sm:$0xff] }
 0x111   :  { %5561 = vmatpush3.msra.mxu0 %v559_v26  ;;  %2698 = vmatprep.mubr.f32.mxu0 %v44_v27  ;;  %v669_v39 = vld [vmem:[%s11671_s1 + $0x1170] sm:$0xff]  ;;  %v668_v43 = vld [vmem:[%s11671_s1 + $0x1168] sm:$0xff]  ;;  %v683_v45 = vld [vmem:[%s11671_s1 + $0x11e0] sm:$0xff] }
 0x112   :  { %5596 = vmatpush3.msra.mxu1 %v591_v28  ;;  %2699 = vmatmul.mubr.f32.vlgmr.msra.gmra.mxu0 %v43_v29  ;;  %v635_v46 = vld [vmem:[%s11671_s1 + $0x1060] sm:$0xff]  ;;  %v650_v48 = vld [vmem:[%s11671_s1 + $0x10d8] sm:$0xff]  ;;  %v649_v52 = vld [vmem:[%s11671_s1 + $0x10d0] sm:$0xff] }
 0x113   :  { %2768 = vmatprep.mubr.f32.mxu1 %v46_v30  ;;  %5600 = vmatprep.subr.mxu0 %v654_v31  ;;  %v667_v47 = vld [vmem:[%s11671_s1 + $0x1160] sm:$0xff]  ;;  %v682_v49 = vld [vmem:[%s11671_s1 + $0x11d8] sm:$0xff]  ;;  %v681_v53 = vld [vmem:[%s11671_s1 + $0x11d0] sm:$0xff] }
 0x114   :  { %5635 = vmatprep.subr.mxu1 %v686_v32  ;;  %2769 = vmatmul.mubr.f32.vlgmr.msra.gmra.mxu1 %v45_v33  ;;  %v634_v50 = vld [vmem:[%s11671_s1 + $0x1058] sm:$0xff]  ;;  %v633_v54 = vld [vmem:[%s11671_s1 + $0x1050] sm:$0xff]  ;;  %v648_v56 = vld [vmem:[%s11671_s1 + $0x10c8] sm:$0xff] }
 0x115   :  { %5601 = vmatpush3.msra.mxu0 %v638_v34  ;;  %5636 = vmatpush3.msra.mxu1 %v670_v35  ;;  %v666_v51 = vld [vmem:[%s11671_s1 + $0x1158] sm:$0xff]  ;;  %v665_v55 = vld [vmem:[%s11671_s1 + $0x1150] sm:$0xff]  ;;  %v680_v57 = vld [vmem:[%s11671_s1 + $0x11c8] sm:$0xff] }
 0x116   :  { %5602 = vmatprep.subr.mxu0 %v653_v36  ;;  %5637 = vmatprep.subr.mxu1 %v685_v37  ;;  %v632_v58 = vld [vmem:[%s11671_s1 + $0x1048] sm:$0xff]  ;;  %v647_v60 = vld [vmem:[%s11671_s1 + $0x10c0] sm:$0xff]  ;;  %v646_v0 = vld [vmem:[%s11671_s1 + $0x10b8] sm:$0xff] }
 0x117   :  { %5603 = vmatpush3.msra.mxu0 %v637_v38  ;;  %5638 = vmatpush3.msra.mxu1 %v669_v39  ;;  %v664_v59 = vld [vmem:[%s11671_s1 + $0x1148] sm:$0xff]  ;;  %v679_v61 = vld [vmem:[%s11671_s1 + $0x11c0] sm:$0xff]  ;;  %v678_v1 = vld [vmem:[%s11671_s1 + $0x11b8] sm:$0xff] }
 0x118   :  { %5604 = vmatprep.subr.mxu0 %v652_v40  ;;  %5639 = vmatprep.subr.mxu1 %v684_v41  ;;  %v631_v62 = vld [vmem:[%s11671_s1 + $0x1040] sm:$0xff]  ;;  %v630_v2 = vld [vmem:[%s11671_s1 + $0x1038] sm:$0xff]  ;;  %v645_v4 = vld [vmem:[%s11671_s1 + $0x10b0] sm:$0xff] }
 0x119   :  { %5605 = vmatpush3.msra.mxu0 %v636_v42  ;;  %5640 = vmatpush3.msra.mxu1 %v668_v43  ;;  %v663_v63 = vld [vmem:[%s11671_s1 + $0x1140] sm:$0xff]  ;;  %v662_v3 = vld [vmem:[%s11671_s1 + $0x1138] sm:$0xff]  ;;  %v677_v5 = vld [vmem:[%s11671_s1 + $0x11b0] sm:$0xff] }
 0x11a   :  { %5606 = vmatprep.subr.mxu0 %v651_v44  ;;  %5641 = vmatprep.subr.mxu1 %v683_v45  ;;  %v629_v6 = vld [vmem:[%s11671_s1 + $0x1030] sm:$0xff]  ;;  %v644_v8 = vld [vmem:[%s11671_s1 + $0x10a8] sm:$0xff]  ;;  %v643_v12 = vld [vmem:[%s11671_s1 + $0x10a0] sm:$0xff] }
 0x11b   :  { %5607 = vmatpush3.msra.mxu0 %v635_v46  ;;  %5642 = vmatpush3.msra.mxu1 %v667_v47  ;;  %v661_v7 = vld [vmem:[%s11671_s1 + $0x1130] sm:$0xff]  ;;  %v676_v9 = vld [vmem:[%s11671_s1 + $0x11a8] sm:$0xff]  ;;  %v675_v13 = vld [vmem:[%s11671_s1 + $0x11a0] sm:$0xff] }
 0x11c   :  { %5608 = vmatprep.subr.mxu0 %v650_v48  ;;  %5643 = vmatprep.subr.mxu1 %v682_v49  ;;  %v628_v10 = vld [vmem:[%s11671_s1 + $0x1028] sm:$0xff]  ;;  %v627_v14 = vld [vmem:[%s11671_s1 + $0x1020] sm:$0xff]  ;;  %v642_v16 = vld [vmem:[%s11671_s1 + $0x1098] sm:$0xff] }
 0x11d   :  { %5609 = vmatpush3.msra.mxu0 %v634_v50  ;;  %5644 = vmatpush3.msra.mxu1 %v666_v51  ;;  %v660_v11 = vld [vmem:[%s11671_s1 + $0x1128] sm:$0xff]  ;;  %v659_v15 = vld [vmem:[%s11671_s1 + $0x1120] sm:$0xff]  ;;  %v674_v17 = vld [vmem:[%s11671_s1 + $0x1198] sm:$0xff] }
 0x11e   :  { %5610 = vmatprep.subr.mxu0 %v649_v52  ;;  %5645 = vmatprep.subr.mxu1 %v681_v53  ;;  %v626_v18 = vld [vmem:[%s11671_s1 + $0x1018] sm:$0xff]  ;;  %v641_v20 = vld [vmem:[%s11671_s1 + $0x1090] sm:$0xff]  ;;  %v640_v24 = vld [vmem:[%s11671_s1 + $0x1088] sm:$0xff] }
 0x11f   :  { %5611 = vmatpush3.msra.mxu0 %v633_v54  ;;  %5646 = vmatpush3.msra.mxu1 %v665_v55  ;;  %v658_v19 = vld [vmem:[%s11671_s1 + $0x1118] sm:$0xff]  ;;  %v673_v21 = vld [vmem:[%s11671_s1 + $0x1190] sm:$0xff]  ;;  %v672_v25 = vld [vmem:[%s11671_s1 + $0x1188] sm:$0xff] }
 0x120   :  { %5612 = vmatprep.subr.mxu0 %v648_v56  ;;  %5647 = vmatprep.subr.mxu1 %v680_v57  ;;  %v625_v22 = vld [vmem:[%s11671_s1 + $0x1010] sm:$0xff]  ;;  %v624_v26 = vld [vmem:[%s11671_s1 + $0x1008] sm:$0xff]  ;;  %v639_v28 = vld [vmem:[%s11671_s1 + $0x1080] sm:$0xff] }
 0x121   :  { %5613 = vmatpush3.msra.mxu0 %v632_v58  ;;  %5648 = vmatpush3.msra.mxu1 %v664_v59  ;;  %v657_v23 = vld [vmem:[%s11671_s1 + $0x1110] sm:$0xff]  ;;  %v656_v27 = vld [vmem:[%s11671_s1 + $0x1108] sm:$0xff]  ;;  %v671_v29 = vld [vmem:[%s11671_s1 + $0x1180] sm:$0xff] }
 0x122   :  { %5614 = vmatprep.subr.mxu0 %v647_v60  ;;  %5649 = vmatprep.subr.mxu1 %v679_v61  ;;  %v623_v30 = vld [vmem:[%s11671_s1 + $0x1000] sm:$0xff]  ;;  %v48_v31 = vld [vmem:[%s11670_s0 + $0x108] sm:$0xff]  ;;  %v50_v34 = vld [vmem:[%s11670_s0 + $0x118] sm:$0xff] }
 0x123   :  { %5615 = vmatpush3.msra.mxu0 %v631_v62  ;;  %5650 = vmatpush3.msra.mxu1 %v663_v63  ;;  %v655_v32 = vld [vmem:[%s11671_s1 + $0x1100] sm:$0xff]  ;;  %v718_v35 = vld [vmem:[%s11671_s1 + $0x12f8] sm:$0xff]  ;;  %v49_v37 = vld [vmem:[%s11670_s0 + $0x110] sm:$0xff] }
 0x124   :  { %5616 = vmatprep.subr.mxu0 %v646_v0  ;;  %5651 = vmatprep.subr.mxu1 %v678_v1  ;;  %v47_v33 = vld [vmem:[%s11670_s0 + $0x100] sm:$0xff]  ;;  %v750_v36 = vld [vmem:[%s11671_s1 + $0x13f8] sm:$0xff]  ;;  %v717_v40 = vld [vmem:[%s11671_s1 + $0x12f0] sm:$0xff] }
 0x125   :  { %5617 = vmatpush3.msra.mxu0 %v630_v2  ;;  %5652 = vmatpush3.msra.mxu1 %v662_v3  ;;  %v702_v38 = vld [vmem:[%s11671_s1 + $0x1278] sm:$0xff]  ;;  %v749_v41 = vld [vmem:[%s11671_s1 + $0x13f0] sm:$0xff]  ;;  %v716_v44 = vld [vmem:[%s11671_s1 + $0x12e8] sm:$0xff] }
 0x126   :  { %5618 = vmatprep.subr.mxu0 %v645_v4  ;;  %5653 = vmatprep.subr.mxu1 %v677_v5  ;;  %v734_v39 = vld [vmem:[%s11671_s1 + $0x1378] sm:$0xff]  ;;  %v701_v42 = vld [vmem:[%s11671_s1 + $0x1270] sm:$0xff]  ;;  %v748_v45 = vld [vmem:[%s11671_s1 + $0x13e8] sm:$0xff] }
 0x127   :  { %5619 = vmatpush3.msra.mxu0 %v629_v6  ;;  %5654 = vmatpush3.msra.mxu1 %v661_v7  ;;  %v733_v43 = vld [vmem:[%s11671_s1 + $0x1370] sm:$0xff]  ;;  %v700_v46 = vld [vmem:[%s11671_s1 + $0x1268] sm:$0xff]  ;;  %v715_v48 = vld [vmem:[%s11671_s1 + $0x12e0] sm:$0xff] }
 0x128   :  { %5620 = vmatprep.subr.mxu0 %v644_v8  ;;  %5655 = vmatprep.subr.mxu1 %v676_v9  ;;  %v732_v47 = vld [vmem:[%s11671_s1 + $0x1368] sm:$0xff]  ;;  %v747_v49 = vld [vmem:[%s11671_s1 + $0x13e0] sm:$0xff]  ;;  %v714_v52 = vld [vmem:[%s11671_s1 + $0x12d8] sm:$0xff] }
 0x129   :  { %5621 = vmatpush3.msra.mxu0 %v628_v10  ;;  %5656 = vmatpush3.msra.mxu1 %v660_v11  ;;  %v699_v50 = vld [vmem:[%s11671_s1 + $0x1260] sm:$0xff]  ;;  %v746_v53 = vld [vmem:[%s11671_s1 + $0x13d8] sm:$0xff]  ;;  %v713_v56 = vld [vmem:[%s11671_s1 + $0x12d0] sm:$0xff] }
 0x12a   :  { %5622 = vmatprep.subr.mxu0 %v643_v12  ;;  %5657 = vmatprep.subr.mxu1 %v675_v13  ;;  %v731_v51 = vld [vmem:[%s11671_s1 + $0x1360] sm:$0xff]  ;;  %v698_v54 = vld [vmem:[%s11671_s1 + $0x1258] sm:$0xff]  ;;  %v745_v57 = vld [vmem:[%s11671_s1 + $0x13d0] sm:$0xff] }
 0x12b   :  { %5623 = vmatpush3.msra.mxu0 %v627_v14  ;;  %5658 = vmatpush3.msra.mxu1 %v659_v15  ;;  %v730_v55 = vld [vmem:[%s11671_s1 + $0x1358] sm:$0xff]  ;;  %v697_v58 = vld [vmem:[%s11671_s1 + $0x1250] sm:$0xff]  ;;  %v712_v60 = vld [vmem:[%s11671_s1 + $0x12c8] sm:$0xff] }
 0x12c   :  { %5624 = vmatprep.subr.mxu0 %v642_v16  ;;  %5659 = vmatprep.subr.mxu1 %v674_v17  ;;  %v729_v59 = vld [vmem:[%s11671_s1 + $0x1350] sm:$0xff]  ;;  %v744_v61 = vld [vmem:[%s11671_s1 + $0x13c8] sm:$0xff]  ;;  %v711_v0 = vld [vmem:[%s11671_s1 + $0x12c0] sm:$0xff] }
 0x12d   :  { %5625 = vmatpush3.msra.mxu0 %v626_v18  ;;  %5660 = vmatpush3.msra.mxu1 %v658_v19  ;;  %v696_v62 = vld [vmem:[%s11671_s1 + $0x1248] sm:$0xff]  ;;  %v743_v1 = vld [vmem:[%s11671_s1 + $0x13c0] sm:$0xff]  ;;  %v710_v4 = vld [vmem:[%s11671_s1 + $0x12b8] sm:$0xff] }
 0x12e   :  { %5626 = vmatprep.subr.mxu0 %v641_v20  ;;  %5661 = vmatprep.subr.mxu1 %v673_v21  ;;  %v728_v63 = vld [vmem:[%s11671_s1 + $0x1348] sm:$0xff]  ;;  %v695_v2 = vld [vmem:[%s11671_s1 + $0x1240] sm:$0xff]  ;;  %v742_v5 = vld [vmem:[%s11671_s1 + $0x13b8] sm:$0xff] }
 0x12f   :  { %5627 = vmatpush3.msra.mxu0 %v625_v22  ;;  %5662 = vmatpush3.msra.mxu1 %v657_v23  ;;  %v727_v3 = vld [vmem:[%s11671_s1 + $0x1340] sm:$0xff]  ;;  %v694_v6 = vld [vmem:[%s11671_s1 + $0x1238] sm:$0xff]  ;;  %v709_v8 = vld [vmem:[%s11671_s1 + $0x12b0] sm:$0xff] }
 0x130   :  { %5628 = vmatprep.subr.mxu0 %v640_v24  ;;  %5663 = vmatprep.subr.mxu1 %v672_v25  ;;  %v726_v7 = vld [vmem:[%s11671_s1 + $0x1338] sm:$0xff]  ;;  %v741_v9 = vld [vmem:[%s11671_s1 + $0x13b0] sm:$0xff]  ;;  %v708_v12 = vld [vmem:[%s11671_s1 + $0x12a8] sm:$0xff] }
 0x131   :  { %5629 = vmatpush3.msra.mxu0 %v624_v26  ;;  %5664 = vmatpush3.msra.mxu1 %v656_v27  ;;  %v693_v10 = vld [vmem:[%s11671_s1 + $0x1230] sm:$0xff]  ;;  %v740_v13 = vld [vmem:[%s11671_s1 + $0x13a8] sm:$0xff]  ;;  %v707_v16 = vld [vmem:[%s11671_s1 + $0x12a0] sm:$0xff] }
 0x132   :  { %5630 = vmatprep.subr.mxu0 %v639_v28  ;;  %5665 = vmatprep.subr.mxu1 %v671_v29  ;;  %v725_v11 = vld [vmem:[%s11671_s1 + $0x1330] sm:$0xff]  ;;  %v692_v14 = vld [vmem:[%s11671_s1 + $0x1228] sm:$0xff]  ;;  %v739_v17 = vld [vmem:[%s11671_s1 + $0x13a0] sm:$0xff] }
 0x133   :  { %5631 = vmatpush3.msra.mxu0 %v623_v30  ;;  %2838 = vmatprep.mubr.f32.mxu0 %v48_v31  ;;  %v724_v15 = vld [vmem:[%s11671_s1 + $0x1328] sm:$0xff]  ;;  %v691_v18 = vld [vmem:[%s11671_s1 + $0x1220] sm:$0xff]  ;;  %v706_v20 = vld [vmem:[%s11671_s1 + $0x1298] sm:$0xff] }
 0x134   :  { %5666 = vmatpush3.msra.mxu1 %v655_v32  ;;  %2839 = vmatmul.mubr.f32.vlgmr.msra.gmra.mxu0 %v47_v33  ;;  %v723_v19 = vld [vmem:[%s11671_s1 + $0x1320] sm:$0xff]  ;;  %v738_v21 = vld [vmem:[%s11671_s1 + $0x1398] sm:$0xff]  ;;  %v705_v24 = vld [vmem:[%s11671_s1 + $0x1290] sm:$0xff] }
 0x135   :  { %2908 = vmatprep.mubr.f32.mxu1 %v50_v34  ;;  %5670 = vmatprep.subr.mxu0 %v718_v35  ;;  %v690_v22 = vld [vmem:[%s11671_s1 + $0x1218] sm:$0xff]  ;;  %v737_v25 = vld [vmem:[%s11671_s1 + $0x1390] sm:$0xff]  ;;  %v704_v28 = vld [vmem:[%s11671_s1 + $0x1288] sm:$0xff] }
 0x136   :  { %5705 = vmatprep.subr.mxu1 %v750_v36  ;;  %2909 = vmatmul.mubr.f32.vlgmr.msra.gmra.mxu1 %v49_v37  ;;  %v722_v23 = vld [vmem:[%s11671_s1 + $0x1318] sm:$0xff]  ;;  %v689_v26 = vld [vmem:[%s11671_s1 + $0x1210] sm:$0xff]  ;;  %v736_v29 = vld [vmem:[%s11671_s1 + $0x1388] sm:$0xff] }
 0x137   :  { %5671 = vmatpush3.msra.mxu0 %v702_v38  ;;  %5706 = vmatpush3.msra.mxu1 %v734_v39  ;;  %v721_v27 = vld [vmem:[%s11671_s1 + $0x1310] sm:$0xff]  ;;  %v688_v30 = vld [vmem:[%s11671_s1 + $0x1208] sm:$0xff]  ;;  %v703_v32 = vld [vmem:[%s11671_s1 + $0x1280] sm:$0xff] }
 0x138   :  { %5672 = vmatprep.subr.mxu0 %v717_v40  ;;  %5707 = vmatprep.subr.mxu1 %v749_v41  ;;  %v720_v31 = vld [vmem:[%s11671_s1 + $0x1308] sm:$0xff]  ;;  %v735_v33 = vld [vmem:[%s11671_s1 + $0x1380] sm:$0xff]  ;;  %v54_v38 = vld [vmem:[%s11670_s0 + $0x138] sm:$0xff] }
 0x139   :  { %5673 = vmatpush3.msra.mxu0 %v701_v42  ;;  %5708 = vmatpush3.msra.mxu1 %v733_v43  ;;  %v687_v34 = vld [vmem:[%s11671_s1 + $0x1200] sm:$0xff]  ;;  %v52_v35 = vld [vmem:[%s11670_s0 + $0x128] sm:$0xff]  ;;  %v782_v39 = vld [vmem:[%s11671_s1 + $0x14f8] sm:$0xff] }
 0x13a   :  { %5674 = vmatprep.subr.mxu0 %v716_v44  ;;  %5709 = vmatprep.subr.mxu1 %v748_v45  ;;  %v719_v36 = vld [vmem:[%s11671_s1 + $0x1300] sm:$0xff]  ;;  %v814_v40 = vld [vmem:[%s11671_s1 + $0x15f8] sm:$0xff]  ;;  %v53_v41 = vld [vmem:[%s11670_s0 + $0x130] sm:$0xff] }
 0x13b   :  { %5675 = vmatpush3.msra.mxu0 %v700_v46  ;;  %5710 = vmatpush3.msra.mxu1 %v732_v47  ;;  %v51_v37 = vld [vmem:[%s11670_s0 + $0x120] sm:$0xff]  ;;  %v766_v42 = vld [vmem:[%s11671_s1 + $0x1478] sm:$0xff]  ;;  %v781_v44 = vld [vmem:[%s11671_s1 + $0x14f0] sm:$0xff] }
 0x13c   :  { %5676 = vmatprep.subr.mxu0 %v715_v48  ;;  %5711 = vmatprep.subr.mxu1 %v747_v49  ;;  %v798_v43 = vld [vmem:[%s11671_s1 + $0x1578] sm:$0xff]  ;;  %v813_v45 = vld [vmem:[%s11671_s1 + $0x15f0] sm:$0xff]  ;;  %v780_v48 = vld [vmem:[%s11671_s1 + $0x14e8] sm:$0xff] }
 0x13d   :  { %5677 = vmatpush3.msra.mxu0 %v699_v50  ;;  %5712 = vmatpush3.msra.mxu1 %v731_v51  ;;  %v765_v46 = vld [vmem:[%s11671_s1 + $0x1470] sm:$0xff]  ;;  %v812_v49 = vld [vmem:[%s11671_s1 + $0x15e8] sm:$0xff] }
 0x13e   :  { %5678 = vmatprep.subr.mxu0 %v714_v52  ;;  %5713 = vmatprep.subr.mxu1 %v746_v53  ;;  %v797_v47 = vld [vmem:[%s11671_s1 + $0x1570] sm:$0xff]  ;;  %v764_v50 = vld [vmem:[%s11671_s1 + $0x1468] sm:$0xff]  ;;  %v779_v52 = vld [vmem:[%s11671_s1 + $0x14e0] sm:$0xff] }
 0x13f   :  { %5679 = vmatpush3.msra.mxu0 %v698_v54  ;;  %5714 = vmatpush3.msra.mxu1 %v730_v55  ;;  %v796_v51 = vld [vmem:[%s11671_s1 + $0x1568] sm:$0xff]  ;;  %v811_v53 = vld [vmem:[%s11671_s1 + $0x15e0] sm:$0xff] }
 0x140   :  { %5680 = vmatprep.subr.mxu0 %v713_v56  ;;  %5715 = vmatprep.subr.mxu1 %v745_v57  ;;  %v763_v54 = vld [vmem:[%s11671_s1 + $0x1460] sm:$0xff]  ;;  %v778_v56 = vld [vmem:[%s11671_s1 + $0x14d8] sm:$0xff] }
 0x141   :  { %5681 = vmatpush3.msra.mxu0 %v697_v58  ;;  %5716 = vmatpush3.msra.mxu1 %v729_v59  ;;  %v795_v55 = vld [vmem:[%s11671_s1 + $0x1560] sm:$0xff]  ;;  %v810_v57 = vld [vmem:[%s11671_s1 + $0x15d8] sm:$0xff] }
 0x142   :  { %5682 = vmatprep.subr.mxu0 %v712_v60  ;;  %5717 = vmatprep.subr.mxu1 %v744_v61  ;;  %v762_v58 = vld [vmem:[%s11671_s1 + $0x1458] sm:$0xff]  ;;  %v777_v60 = vld [vmem:[%s11671_s1 + $0x14d0] sm:$0xff] }
 0x143   :  { %5683 = vmatpush3.msra.mxu0 %v696_v62  ;;  %5718 = vmatpush3.msra.mxu1 %v728_v63  ;;  %v794_v59 = vld [vmem:[%s11671_s1 + $0x1558] sm:$0xff]  ;;  %v809_v61 = vld [vmem:[%s11671_s1 + $0x15d0] sm:$0xff] }
 0x144   :  { %5684 = vmatprep.subr.mxu0 %v711_v0  ;;  %5719 = vmatprep.subr.mxu1 %v743_v1  ;;  %v761_v62 = vld [vmem:[%s11671_s1 + $0x1450] sm:$0xff]  ;;  %v776_v0 = vld [vmem:[%s11671_s1 + $0x14c8] sm:$0xff] }
 0x145   :  { %5685 = vmatpush3.msra.mxu0 %v695_v2  ;;  %5720 = vmatpush3.msra.mxu1 %v727_v3  ;;  %v793_v63 = vld [vmem:[%s11671_s1 + $0x1550] sm:$0xff]  ;;  %v808_v1 = vld [vmem:[%s11671_s1 + $0x15c8] sm:$0xff] }
 0x146   :  { %5686 = vmatprep.subr.mxu0 %v710_v4  ;;  %5721 = vmatprep.subr.mxu1 %v742_v5  ;;  %v760_v2 = vld [vmem:[%s11671_s1 + $0x1448] sm:$0xff]  ;;  %v775_v4 = vld [vmem:[%s11671_s1 + $0x14c0] sm:$0xff] }
 0x147   :  { %5687 = vmatpush3.msra.mxu0 %v694_v6  ;;  %5722 = vmatpush3.msra.mxu1 %v726_v7  ;;  %v792_v3 = vld [vmem:[%s11671_s1 + $0x1548] sm:$0xff]  ;;  %v807_v5 = vld [vmem:[%s11671_s1 + $0x15c0] sm:$0xff] }
 0x148   :  { %5688 = vmatprep.subr.mxu0 %v709_v8  ;;  %5723 = vmatprep.subr.mxu1 %v741_v9  ;;  %v759_v6 = vld [vmem:[%s11671_s1 + $0x1440] sm:$0xff]  ;;  %v774_v8 = vld [vmem:[%s11671_s1 + $0x14b8] sm:$0xff] }
 0x149   :  { %5689 = vmatpush3.msra.mxu0 %v693_v10  ;;  %5724 = vmatpush3.msra.mxu1 %v725_v11  ;;  %v791_v7 = vld [vmem:[%s11671_s1 + $0x1540] sm:$0xff]  ;;  %v806_v9 = vld [vmem:[%s11671_s1 + $0x15b8] sm:$0xff] }
 0x14a   :  { %5690 = vmatprep.subr.mxu0 %v708_v12  ;;  %5725 = vmatprep.subr.mxu1 %v740_v13  ;;  %v758_v10 = vld [vmem:[%s11671_s1 + $0x1438] sm:$0xff]  ;;  %v773_v12 = vld [vmem:[%s11671_s1 + $0x14b0] sm:$0xff] }
 0x14b   :  { %5691 = vmatpush3.msra.mxu0 %v692_v14  ;;  %5726 = vmatpush3.msra.mxu1 %v724_v15  ;;  %v790_v11 = vld [vmem:[%s11671_s1 + $0x1538] sm:$0xff]  ;;  %v805_v13 = vld [vmem:[%s11671_s1 + $0x15b0] sm:$0xff] }
 0x14c   :  { %5692 = vmatprep.subr.mxu0 %v707_v16  ;;  %5727 = vmatprep.subr.mxu1 %v739_v17  ;;  %v757_v14 = vld [vmem:[%s11671_s1 + $0x1430] sm:$0xff]  ;;  %v772_v16 = vld [vmem:[%s11671_s1 + $0x14a8] sm:$0xff] }
 0x14d   :  { %5693 = vmatpush3.msra.mxu0 %v691_v18  ;;  %5728 = vmatpush3.msra.mxu1 %v723_v19  ;;  %v789_v15 = vld [vmem:[%s11671_s1 + $0x1530] sm:$0xff]  ;;  %v804_v17 = vld [vmem:[%s11671_s1 + $0x15a8] sm:$0xff] }
 0x14e   :  { %5694 = vmatprep.subr.mxu0 %v706_v20  ;;  %5729 = vmatprep.subr.mxu1 %v738_v21  ;;  %v756_v18 = vld [vmem:[%s11671_s1 + $0x1428] sm:$0xff]  ;;  %v771_v20 = vld [vmem:[%s11671_s1 + $0x14a0] sm:$0xff] }
 0x14f   :  { %5695 = vmatpush3.msra.mxu0 %v690_v22  ;;  %5730 = vmatpush3.msra.mxu1 %v722_v23  ;;  %v788_v19 = vld [vmem:[%s11671_s1 + $0x1528] sm:$0xff]  ;;  %v803_v21 = vld [vmem:[%s11671_s1 + $0x15a0] sm:$0xff] }
 0x150   :  { %5696 = vmatprep.subr.mxu0 %v705_v24  ;;  %5731 = vmatprep.subr.mxu1 %v737_v25  ;;  %v755_v22 = vld [vmem:[%s11671_s1 + $0x1420] sm:$0xff]  ;;  %v770_v24 = vld [vmem:[%s11671_s1 + $0x1498] sm:$0xff] }
 0x151   :  { %5697 = vmatpush3.msra.mxu0 %v689_v26  ;;  %5732 = vmatpush3.msra.mxu1 %v721_v27  ;;  %v787_v23 = vld [vmem:[%s11671_s1 + $0x1520] sm:$0xff]  ;;  %v802_v25 = vld [vmem:[%s11671_s1 + $0x1598] sm:$0xff] }
 0x152   :  { %5698 = vmatprep.subr.mxu0 %v704_v28  ;;  %5733 = vmatprep.subr.mxu1 %v736_v29  ;;  %v754_v26 = vld [vmem:[%s11671_s1 + $0x1418] sm:$0xff]  ;;  %v769_v28 = vld [vmem:[%s11671_s1 + $0x1490] sm:$0xff] }
 0x153   :  { %5699 = vmatpush3.msra.mxu0 %v688_v30  ;;  %5734 = vmatpush3.msra.mxu1 %v720_v31  ;;  %v786_v27 = vld [vmem:[%s11671_s1 + $0x1518] sm:$0xff]  ;;  %v801_v29 = vld [vmem:[%s11671_s1 + $0x1590] sm:$0xff] }
 0x154   :  { %5700 = vmatprep.subr.mxu0 %v703_v32  ;;  %5735 = vmatprep.subr.mxu1 %v735_v33  ;;  %v753_v30 = vld [vmem:[%s11671_s1 + $0x1410] sm:$0xff]  ;;  %v768_v32 = vld [vmem:[%s11671_s1 + $0x1488] sm:$0xff] }
 0x155   :  { %5701 = vmatpush3.msra.mxu0 %v687_v34  ;;  %2978 = vmatprep.mubr.f32.mxu0 %v52_v35  ;;  %v785_v31 = vld [vmem:[%s11671_s1 + $0x1510] sm:$0xff]  ;;  %v800_v33 = vld [vmem:[%s11671_s1 + $0x1588] sm:$0xff] }
 0x156   :  { %5736 = vmatpush3.msra.mxu1 %v719_v36  ;;  %2979 = vmatmul.mubr.f32.vlgmr.msra.gmra.mxu0 %v51_v37  ;;  %v752_v34 = vld [vmem:[%s11671_s1 + $0x1408] sm:$0xff]  ;;  %v767_v36 = vld [vmem:[%s11671_s1 + $0x1480] sm:$0xff] }
 0x157   :  { %3048 = vmatprep.mubr.f32.mxu1 %v54_v38  ;;  %5740 = vmatprep.subr.mxu0 %v782_v39  ;;  %v784_v35 = vld [vmem:[%s11671_s1 + $0x1508] sm:$0xff]  ;;  %v799_v37 = vld [vmem:[%s11671_s1 + $0x1580] sm:$0xff] }
 0x158   :  { %5775 = vmatprep.subr.mxu1 %v814_v40  ;;  %3049 = vmatmul.mubr.f32.vlgmr.msra.gmra.mxu1 %v53_v41  ;;  %v751_v38 = vld [vmem:[%s11671_s1 + $0x1400] sm:$0xff]  ;;  %v56_v39 = vld [vmem:[%s11670_s0 + $0x148] sm:$0xff] }
 0x159   :  { %5741 = vmatpush3.msra.mxu0 %v766_v42  ;;  %5776 = vmatpush3.msra.mxu1 %v798_v43  ;;  %v783_v40 = vld [vmem:[%s11671_s1 + $0x1500] sm:$0xff]  ;;  %v58_v42 = vld [vmem:[%s11670_s0 + $0x158] sm:$0xff] }
 0x15a   :  { %5742 = vmatprep.subr.mxu0 %v781_v44  ;;  %5777 = vmatprep.subr.mxu1 %v813_v45  ;;  %v55_v41 = vld [vmem:[%s11670_s0 + $0x140] sm:$0xff]  ;;  %v846_v43 = vld [vmem:[%s11671_s1 + $0x16f8] sm:$0xff]  ;;  %v57_v45 = vld [vmem:[%s11670_s0 + $0x150] sm:$0xff] }
 0x15b   :  { %5743 = vmatpush3.msra.mxu0 %v765_v46  ;;  %5778 = vmatpush3.msra.mxu1 %v797_v47  ;;  %v878_v44 = vld [vmem:[%s11671_s1 + $0x17f8] sm:$0xff] }
 0x15c   :  { %5744 = vmatprep.subr.mxu0 %v780_v48  ;;  %5779 = vmatprep.subr.mxu1 %v812_v49  ;;  %v830_v46 = vld [vmem:[%s11671_s1 + $0x1678] sm:$0xff]  ;;  %v845_v48 = vld [vmem:[%s11671_s1 + $0x16f0] sm:$0xff] }
 0x15d   :  { %5745 = vmatpush3.msra.mxu0 %v764_v50  ;;  %5780 = vmatpush3.msra.mxu1 %v796_v51  ;;  %v862_v47 = vld [vmem:[%s11671_s1 + $0x1778] sm:$0xff]  ;;  %v877_v49 = vld [vmem:[%s11671_s1 + $0x17f0] sm:$0xff] }
 0x15e   :  { %5746 = vmatprep.subr.mxu0 %v779_v52  ;;  %5781 = vmatprep.subr.mxu1 %v811_v53  ;;  %v829_v50 = vld [vmem:[%s11671_s1 + $0x1670] sm:$0xff]  ;;  %v844_v52 = vld [vmem:[%s11671_s1 + $0x16e8] sm:$0xff] }
 0x15f   :  { %5747 = vmatpush3.msra.mxu0 %v763_v54  ;;  %5782 = vmatpush3.msra.mxu1 %v795_v55  ;;  %v861_v51 = vld [vmem:[%s11671_s1 + $0x1770] sm:$0xff]  ;;  %v876_v53 = vld [vmem:[%s11671_s1 + $0x17e8] sm:$0xff] }
 0x160   :  { %5748 = vmatprep.subr.mxu0 %v778_v56  ;;  %5783 = vmatprep.subr.mxu1 %v810_v57  ;;  %v828_v54 = vld [vmem:[%s11671_s1 + $0x1668] sm:$0xff]  ;;  %v843_v56 = vld [vmem:[%s11671_s1 + $0x16e0] sm:$0xff] }
 0x161   :  { %5749 = vmatpush3.msra.mxu0 %v762_v58  ;;  %5784 = vmatpush3.msra.mxu1 %v794_v59  ;;  %v860_v55 = vld [vmem:[%s11671_s1 + $0x1768] sm:$0xff]  ;;  %v875_v57 = vld [vmem:[%s11671_s1 + $0x17e0] sm:$0xff] }
 0x162   :  { %5750 = vmatprep.subr.mxu0 %v777_v60  ;;  %5785 = vmatprep.subr.mxu1 %v809_v61  ;;  %v827_v58 = vld [vmem:[%s11671_s1 + $0x1660] sm:$0xff]  ;;  %v842_v60 = vld [vmem:[%s11671_s1 + $0x16d8] sm:$0xff] }
 0x163   :  { %5751 = vmatpush3.msra.mxu0 %v761_v62  ;;  %5786 = vmatpush3.msra.mxu1 %v793_v63  ;;  %v859_v59 = vld [vmem:[%s11671_s1 + $0x1760] sm:$0xff]  ;;  %v874_v61 = vld [vmem:[%s11671_s1 + $0x17d8] sm:$0xff] }
 0x164   :  { %5752 = vmatprep.subr.mxu0 %v776_v0  ;;  %5787 = vmatprep.subr.mxu1 %v808_v1  ;;  %v826_v62 = vld [vmem:[%s11671_s1 + $0x1658] sm:$0xff]  ;;  %v841_v0 = vld [vmem:[%s11671_s1 + $0x16d0] sm:$0xff] }
 0x165   :  { %5753 = vmatpush3.msra.mxu0 %v760_v2  ;;  %5788 = vmatpush3.msra.mxu1 %v792_v3  ;;  %v858_v63 = vld [vmem:[%s11671_s1 + $0x1758] sm:$0xff]  ;;  %v873_v1 = vld [vmem:[%s11671_s1 + $0x17d0] sm:$0xff] }
 0x166   :  { %5754 = vmatprep.subr.mxu0 %v775_v4  ;;  %5789 = vmatprep.subr.mxu1 %v807_v5  ;;  %v825_v2 = vld [vmem:[%s11671_s1 + $0x1650] sm:$0xff]  ;;  %v840_v4 = vld [vmem:[%s11671_s1 + $0x16c8] sm:$0xff] }
 0x167   :  { %5755 = vmatpush3.msra.mxu0 %v759_v6  ;;  %5790 = vmatpush3.msra.mxu1 %v791_v7  ;;  %v857_v3 = vld [vmem:[%s11671_s1 + $0x1750] sm:$0xff]  ;;  %v872_v5 = vld [vmem:[%s11671_s1 + $0x17c8] sm:$0xff] }
 0x168   :  { %5756 = vmatprep.subr.mxu0 %v774_v8  ;;  %5791 = vmatprep.subr.mxu1 %v806_v9  ;;  %v824_v6 = vld [vmem:[%s11671_s1 + $0x1648] sm:$0xff]  ;;  %v839_v8 = vld [vmem:[%s11671_s1 + $0x16c0] sm:$0xff] }
 0x169   :  { %5757 = vmatpush3.msra.mxu0 %v758_v10  ;;  %5792 = vmatpush3.msra.mxu1 %v790_v11  ;;  %v856_v7 = vld [vmem:[%s11671_s1 + $0x1748] sm:$0xff]  ;;  %v871_v9 = vld [vmem:[%s11671_s1 + $0x17c0] sm:$0xff] }
 0x16a   :  { %5758 = vmatprep.subr.mxu0 %v773_v12  ;;  %5793 = vmatprep.subr.mxu1 %v805_v13  ;;  %v823_v10 = vld [vmem:[%s11671_s1 + $0x1640] sm:$0xff]  ;;  %v838_v12 = vld [vmem:[%s11671_s1 + $0x16b8] sm:$0xff] }
 0x16b   :  { %5759 = vmatpush3.msra.mxu0 %v757_v14  ;;  %5794 = vmatpush3.msra.mxu1 %v789_v15  ;;  %v855_v11 = vld [vmem:[%s11671_s1 + $0x1740] sm:$0xff]  ;;  %v870_v13 = vld [vmem:[%s11671_s1 + $0x17b8] sm:$0xff] }
 0x16c   :  { %5760 = vmatprep.subr.mxu0 %v772_v16  ;;  %5795 = vmatprep.subr.mxu1 %v804_v17  ;;  %v822_v14 = vld [vmem:[%s11671_s1 + $0x1638] sm:$0xff]  ;;  %v837_v16 = vld [vmem:[%s11671_s1 + $0x16b0] sm:$0xff] }
 0x16d   :  { %5761 = vmatpush3.msra.mxu0 %v756_v18  ;;  %5796 = vmatpush3.msra.mxu1 %v788_v19  ;;  %v854_v15 = vld [vmem:[%s11671_s1 + $0x1738] sm:$0xff]  ;;  %v869_v17 = vld [vmem:[%s11671_s1 + $0x17b0] sm:$0xff] }
 0x16e   :  { %5762 = vmatprep.subr.mxu0 %v771_v20  ;;  %5797 = vmatprep.subr.mxu1 %v803_v21  ;;  %v821_v18 = vld [vmem:[%s11671_s1 + $0x1630] sm:$0xff]  ;;  %v836_v20 = vld [vmem:[%s11671_s1 + $0x16a8] sm:$0xff] }
 0x16f   :  { %5763 = vmatpush3.msra.mxu0 %v755_v22  ;;  %5798 = vmatpush3.msra.mxu1 %v787_v23  ;;  %v853_v19 = vld [vmem:[%s11671_s1 + $0x1730] sm:$0xff]  ;;  %v868_v21 = vld [vmem:[%s11671_s1 + $0x17a8] sm:$0xff] }
 0x170   :  { %5764 = vmatprep.subr.mxu0 %v770_v24  ;;  %5799 = vmatprep.subr.mxu1 %v802_v25  ;;  %v820_v22 = vld [vmem:[%s11671_s1 + $0x1628] sm:$0xff]  ;;  %v835_v24 = vld [vmem:[%s11671_s1 + $0x16a0] sm:$0xff] }
 0x171   :  { %5765 = vmatpush3.msra.mxu0 %v754_v26  ;;  %5800 = vmatpush3.msra.mxu1 %v786_v27  ;;  %v852_v23 = vld [vmem:[%s11671_s1 + $0x1728] sm:$0xff]  ;;  %v867_v25 = vld [vmem:[%s11671_s1 + $0x17a0] sm:$0xff] }
 0x172   :  { %5766 = vmatprep.subr.mxu0 %v769_v28  ;;  %5801 = vmatprep.subr.mxu1 %v801_v29  ;;  %v819_v26 = vld [vmem:[%s11671_s1 + $0x1620] sm:$0xff]  ;;  %v834_v28 = vld [vmem:[%s11671_s1 + $0x1698] sm:$0xff] }
 0x173   :  { %5767 = vmatpush3.msra.mxu0 %v753_v30  ;;  %5802 = vmatpush3.msra.mxu1 %v785_v31  ;;  %v851_v27 = vld [vmem:[%s11671_s1 + $0x1720] sm:$0xff]  ;;  %v866_v29 = vld [vmem:[%s11671_s1 + $0x1798] sm:$0xff] }
 0x174   :  { %5768 = vmatprep.subr.mxu0 %v768_v32  ;;  %5803 = vmatprep.subr.mxu1 %v800_v33  ;;  %v818_v30 = vld [vmem:[%s11671_s1 + $0x1618] sm:$0xff]  ;;  %v833_v32 = vld [vmem:[%s11671_s1 + $0x1690] sm:$0xff] }
 0x175   :  { %5769 = vmatpush3.msra.mxu0 %v752_v34  ;;  %5804 = vmatpush3.msra.mxu1 %v784_v35  ;;  %v850_v31 = vld [vmem:[%s11671_s1 + $0x1718] sm:$0xff]  ;;  %v865_v33 = vld [vmem:[%s11671_s1 + $0x1790] sm:$0xff] }
 0x176   :  { %5770 = vmatprep.subr.mxu0 %v767_v36  ;;  %5805 = vmatprep.subr.mxu1 %v799_v37  ;;  %v817_v34 = vld [vmem:[%s11671_s1 + $0x1610] sm:$0xff]  ;;  %v832_v36 = vld [vmem:[%s11671_s1 + $0x1688] sm:$0xff] }
 0x177   :  { %5771 = vmatpush3.msra.mxu0 %v751_v38  ;;  %3118 = vmatprep.mubr.f32.mxu0 %v56_v39  ;;  %v849_v35 = vld [vmem:[%s11671_s1 + $0x1710] sm:$0xff]  ;;  %v864_v37 = vld [vmem:[%s11671_s1 + $0x1788] sm:$0xff] }
 0x178   :  { %5806 = vmatpush3.msra.mxu1 %v783_v40  ;;  %3119 = vmatmul.mubr.f32.vlgmr.msra.gmra.mxu0 %v55_v41  ;;  %v816_v38 = vld [vmem:[%s11671_s1 + $0x1608] sm:$0xff]  ;;  %v831_v40 = vld [vmem:[%s11671_s1 + $0x1680] sm:$0xff] }
 0x179   :  { %3188 = vmatprep.mubr.f32.mxu1 %v58_v42  ;;  %5810 = vmatprep.subr.mxu0 %v846_v43  ;;  %v848_v39 = vld [vmem:[%s11671_s1 + $0x1708] sm:$0xff]  ;;  %v863_v41 = vld [vmem:[%s11671_s1 + $0x1780] sm:$0xff] }
 0x17a   :  { %5845 = vmatprep.subr.mxu1 %v878_v44  ;;  %3189 = vmatmul.mubr.f32.vlgmr.msra.gmra.mxu1 %v57_v45  ;;  %v815_v42 = vld [vmem:[%s11671_s1 + $0x1600] sm:$0xff]  ;;  %v60_v43 = vld [vmem:[%s11670_s0 + $0x168] sm:$0xff] }
 0x17b   :  { %5811 = vmatpush3.msra.mxu0 %v830_v46  ;;  %5846 = vmatpush3.msra.mxu1 %v862_v47  ;;  %v847_v44 = vld [vmem:[%s11671_s1 + $0x1700] sm:$0xff]  ;;  %v62_v46 = vld [vmem:[%s11670_s0 + $0x178] sm:$0xff] }
 0x17c   :  { %5812 = vmatprep.subr.mxu0 %v845_v48  ;;  %5847 = vmatprep.subr.mxu1 %v877_v49  ;;  %v59_v45 = vld [vmem:[%s11670_s0 + $0x160] sm:$0xff]  ;;  %v910_v47 = vld [vmem:[%s11671_s1 + $0x18f8] sm:$0xff]  ;;  %v61_v49 = vld [vmem:[%s11670_s0 + $0x170] sm:$0xff] }
 0x17d   :  { %5813 = vmatpush3.msra.mxu0 %v829_v50  ;;  %5848 = vmatpush3.msra.mxu1 %v861_v51  ;;  %v942_v48 = vld [vmem:[%s11671_s1 + $0x19f8] sm:$0xff] }
 0x17e   :  { %5814 = vmatprep.subr.mxu0 %v844_v52  ;;  %5849 = vmatprep.subr.mxu1 %v876_v53  ;;  %v894_v50 = vld [vmem:[%s11671_s1 + $0x1878] sm:$0xff]  ;;  %v909_v52 = vld [vmem:[%s11671_s1 + $0x18f0] sm:$0xff] }
 0x17f   :  { %5815 = vmatpush3.msra.mxu0 %v828_v54  ;;  %5850 = vmatpush3.msra.mxu1 %v860_v55  ;;  %v926_v51 = vld [vmem:[%s11671_s1 + $0x1978] sm:$0xff]  ;;  %v941_v53 = vld [vmem:[%s11671_s1 + $0x19f0] sm:$0xff] }
 0x180   :  { %5816 = vmatprep.subr.mxu0 %v843_v56  ;;  %5851 = vmatprep.subr.mxu1 %v875_v57  ;;  %v893_v54 = vld [vmem:[%s11671_s1 + $0x1870] sm:$0xff]  ;;  %v908_v56 = vld [vmem:[%s11671_s1 + $0x18e8] sm:$0xff] }
 0x181   :  { %5817 = vmatpush3.msra.mxu0 %v827_v58  ;;  %5852 = vmatpush3.msra.mxu1 %v859_v59  ;;  %v925_v55 = vld [vmem:[%s11671_s1 + $0x1970] sm:$0xff]  ;;  %v940_v57 = vld [vmem:[%s11671_s1 + $0x19e8] sm:$0xff] }
 0x182   :  { %5818 = vmatprep.subr.mxu0 %v842_v60  ;;  %5853 = vmatprep.subr.mxu1 %v874_v61  ;;  %v892_v58 = vld [vmem:[%s11671_s1 + $0x1868] sm:$0xff]  ;;  %v907_v60 = vld [vmem:[%s11671_s1 + $0x18e0] sm:$0xff] }
 0x183   :  { %5819 = vmatpush3.msra.mxu0 %v826_v62  ;;  %5854 = vmatpush3.msra.mxu1 %v858_v63  ;;  %v924_v59 = vld [vmem:[%s11671_s1 + $0x1968] sm:$0xff]  ;;  %v939_v61 = vld [vmem:[%s11671_s1 + $0x19e0] sm:$0xff] }
 0x184   :  { %5820 = vmatprep.subr.mxu0 %v841_v0  ;;  %5855 = vmatprep.subr.mxu1 %v873_v1  ;;  %v891_v62 = vld [vmem:[%s11671_s1 + $0x1860] sm:$0xff]  ;;  %v906_v0 = vld [vmem:[%s11671_s1 + $0x18d8] sm:$0xff] }
 0x185   :  { %5821 = vmatpush3.msra.mxu0 %v825_v2  ;;  %5856 = vmatpush3.msra.mxu1 %v857_v3  ;;  %v923_v63 = vld [vmem:[%s11671_s1 + $0x1960] sm:$0xff]  ;;  %v938_v1 = vld [vmem:[%s11671_s1 + $0x19d8] sm:$0xff] }
 0x186   :  { %5822 = vmatprep.subr.mxu0 %v840_v4  ;;  %5857 = vmatprep.subr.mxu1 %v872_v5  ;;  %v890_v2 = vld [vmem:[%s11671_s1 + $0x1858] sm:$0xff]  ;;  %v905_v4 = vld [vmem:[%s11671_s1 + $0x18d0] sm:$0xff] }
 0x187   :  { %5823 = vmatpush3.msra.mxu0 %v824_v6  ;;  %5858 = vmatpush3.msra.mxu1 %v856_v7  ;;  %v922_v3 = vld [vmem:[%s11671_s1 + $0x1958] sm:$0xff]  ;;  %v937_v5 = vld [vmem:[%s11671_s1 + $0x19d0] sm:$0xff] }
 0x188   :  { %5824 = vmatprep.subr.mxu0 %v839_v8  ;;  %5859 = vmatprep.subr.mxu1 %v871_v9  ;;  %v889_v6 = vld [vmem:[%s11671_s1 + $0x1850] sm:$0xff]  ;;  %v904_v8 = vld [vmem:[%s11671_s1 + $0x18c8] sm:$0xff] }
 0x189   :  { %5825 = vmatpush3.msra.mxu0 %v823_v10  ;;  %5860 = vmatpush3.msra.mxu1 %v855_v11  ;;  %v921_v7 = vld [vmem:[%s11671_s1 + $0x1950] sm:$0xff]  ;;  %v936_v9 = vld [vmem:[%s11671_s1 + $0x19c8] sm:$0xff] }
 0x18a   :  { %5826 = vmatprep.subr.mxu0 %v838_v12  ;;  %5861 = vmatprep.subr.mxu1 %v870_v13  ;;  %v888_v10 = vld [vmem:[%s11671_s1 + $0x1848] sm:$0xff]  ;;  %v903_v12 = vld [vmem:[%s11671_s1 + $0x18c0] sm:$0xff] }
 0x18b   :  { %5827 = vmatpush3.msra.mxu0 %v822_v14  ;;  %5862 = vmatpush3.msra.mxu1 %v854_v15  ;;  %v920_v11 = vld [vmem:[%s11671_s1 + $0x1948] sm:$0xff]  ;;  %v935_v13 = vld [vmem:[%s11671_s1 + $0x19c0] sm:$0xff] }
 0x18c   :  { %5828 = vmatprep.subr.mxu0 %v837_v16  ;;  %5863 = vmatprep.subr.mxu1 %v869_v17  ;;  %v887_v14 = vld [vmem:[%s11671_s1 + $0x1840] sm:$0xff]  ;;  %v902_v16 = vld [vmem:[%s11671_s1 + $0x18b8] sm:$0xff] }
 0x18d   :  { %5829 = vmatpush3.msra.mxu0 %v821_v18  ;;  %5864 = vmatpush3.msra.mxu1 %v853_v19  ;;  %v919_v15 = vld [vmem:[%s11671_s1 + $0x1940] sm:$0xff]  ;;  %v934_v17 = vld [vmem:[%s11671_s1 + $0x19b8] sm:$0xff] }
 0x18e   :  { %5830 = vmatprep.subr.mxu0 %v836_v20  ;;  %5865 = vmatprep.subr.mxu1 %v868_v21  ;;  %v886_v18 = vld [vmem:[%s11671_s1 + $0x1838] sm:$0xff]  ;;  %v901_v20 = vld [vmem:[%s11671_s1 + $0x18b0] sm:$0xff] }
 0x18f   :  { %5831 = vmatpush3.msra.mxu0 %v820_v22  ;;  %5866 = vmatpush3.msra.mxu1 %v852_v23  ;;  %v918_v19 = vld [vmem:[%s11671_s1 + $0x1938] sm:$0xff]  ;;  %v933_v21 = vld [vmem:[%s11671_s1 + $0x19b0] sm:$0xff] }
 0x190   :  { %5832 = vmatprep.subr.mxu0 %v835_v24  ;;  %5867 = vmatprep.subr.mxu1 %v867_v25  ;;  %v885_v22 = vld [vmem:[%s11671_s1 + $0x1830] sm:$0xff]  ;;  %v900_v24 = vld [vmem:[%s11671_s1 + $0x18a8] sm:$0xff] }
 0x191   :  { %5833 = vmatpush3.msra.mxu0 %v819_v26  ;;  %5868 = vmatpush3.msra.mxu1 %v851_v27  ;;  %v917_v23 = vld [vmem:[%s11671_s1 + $0x1930] sm:$0xff]  ;;  %v932_v25 = vld [vmem:[%s11671_s1 + $0x19a8] sm:$0xff] }
 0x192   :  { %5834 = vmatprep.subr.mxu0 %v834_v28  ;;  %5869 = vmatprep.subr.mxu1 %v866_v29  ;;  %v884_v26 = vld [vmem:[%s11671_s1 + $0x1828] sm:$0xff]  ;;  %v899_v28 = vld [vmem:[%s11671_s1 + $0x18a0] sm:$0xff] }
 0x193   :  { %5835 = vmatpush3.msra.mxu0 %v818_v30  ;;  %5870 = vmatpush3.msra.mxu1 %v850_v31  ;;  %v916_v27 = vld [vmem:[%s11671_s1 + $0x1928] sm:$0xff]  ;;  %v931_v29 = vld [vmem:[%s11671_s1 + $0x19a0] sm:$0xff] }
 0x194   :  { %5836 = vmatprep.subr.mxu0 %v833_v32  ;;  %5871 = vmatprep.subr.mxu1 %v865_v33  ;;  %v883_v30 = vld [vmem:[%s11671_s1 + $0x1820] sm:$0xff]  ;;  %v898_v32 = vld [vmem:[%s11671_s1 + $0x1898] sm:$0xff] }
 0x195   :  { %5837 = vmatpush3.msra.mxu0 %v817_v34  ;;  %5872 = vmatpush3.msra.mxu1 %v849_v35  ;;  %v915_v31 = vld [vmem:[%s11671_s1 + $0x1920] sm:$0xff]  ;;  %v930_v33 = vld [vmem:[%s11671_s1 + $0x1998] sm:$0xff] }
 0x196   :  { %5838 = vmatprep.subr.mxu0 %v832_v36  ;;  %5873 = vmatprep.subr.mxu1 %v864_v37  ;;  %v882_v34 = vld [vmem:[%s11671_s1 + $0x1818] sm:$0xff]  ;;  %v897_v36 = vld [vmem:[%s11671_s1 + $0x1890] sm:$0xff] }
 0x197   :  { %5839 = vmatpush3.msra.mxu0 %v816_v38  ;;  %5874 = vmatpush3.msra.mxu1 %v848_v39  ;;  %v914_v35 = vld [vmem:[%s11671_s1 + $0x1918] sm:$0xff]  ;;  %v929_v37 = vld [vmem:[%s11671_s1 + $0x1990] sm:$0xff] }
 0x198   :  { %5840 = vmatprep.subr.mxu0 %v831_v40  ;;  %5875 = vmatprep.subr.mxu1 %v863_v41  ;;  %v881_v38 = vld [vmem:[%s11671_s1 + $0x1810] sm:$0xff]  ;;  %v896_v40 = vld [vmem:[%s11671_s1 + $0x1888] sm:$0xff] }
 0x199   :  { %5841 = vmatpush3.msra.mxu0 %v815_v42  ;;  %3258 = vmatprep.mubr.f32.mxu0 %v60_v43  ;;  %v913_v39 = vld [vmem:[%s11671_s1 + $0x1910] sm:$0xff]  ;;  %v928_v41 = vld [vmem:[%s11671_s1 + $0x1988] sm:$0xff] }
 0x19a   :  { %5876 = vmatpush3.msra.mxu1 %v847_v44  ;;  %3259 = vmatmul.mubr.f32.vlgmr.msra.gmra.mxu0 %v59_v45  ;;  %v880_v42 = vld [vmem:[%s11671_s1 + $0x1808] sm:$0xff]  ;;  %v895_v44 = vld [vmem:[%s11671_s1 + $0x1880] sm:$0xff] }
 0x19b   :  { %3328 = vmatprep.mubr.f32.mxu1 %v62_v46  ;;  %5880 = vmatprep.subr.mxu0 %v910_v47  ;;  %v912_v43 = vld [vmem:[%s11671_s1 + $0x1908] sm:$0xff]  ;;  %v927_v45 = vld [vmem:[%s11671_s1 + $0x1980] sm:$0xff] }
 0x19c   :  { %5915 = vmatprep.subr.mxu1 %v942_v48  ;;  %3329 = vmatmul.mubr.f32.vlgmr.msra.gmra.mxu1 %v61_v49  ;;  %v879_v46 = vld [vmem:[%s11671_s1 + $0x1800] sm:$0xff]  ;;  %v64_v47 = vld [vmem:[%s11670_s0 + $0x188] sm:$0xff] }
 0x19d   :  { %5881 = vmatpush3.msra.mxu0 %v894_v50  ;;  %5916 = vmatpush3.msra.mxu1 %v926_v51  ;;  %v911_v48 = vld [vmem:[%s11671_s1 + $0x1900] sm:$0xff]  ;;  %v66_v50 = vld [vmem:[%s11670_s0 + $0x198] sm:$0xff] }
 0x19e   :  { %5882 = vmatprep.subr.mxu0 %v909_v52  ;;  %5917 = vmatprep.subr.mxu1 %v941_v53  ;;  %v63_v49 = vld [vmem:[%s11670_s0 + $0x180] sm:$0xff]  ;;  %v974_v51 = vld [vmem:[%s11671_s1 + $0x1af8] sm:$0xff]  ;;  %v65_v53 = vld [vmem:[%s11670_s0 + $0x190] sm:$0xff] }
 0x19f   :  { %5883 = vmatpush3.msra.mxu0 %v893_v54  ;;  %5918 = vmatpush3.msra.mxu1 %v925_v55  ;;  %v1006_v52 = vld [vmem:[%s11671_s1 + $0x1bf8] sm:$0xff] }
 0x1a0   :  { %5884 = vmatprep.subr.mxu0 %v908_v56  ;;  %5919 = vmatprep.subr.mxu1 %v940_v57  ;;  %v958_v54 = vld [vmem:[%s11671_s1 + $0x1a78] sm:$0xff]  ;;  %v973_v56 = vld [vmem:[%s11671_s1 + $0x1af0] sm:$0xff] }
 0x1a1   :  { %5885 = vmatpush3.msra.mxu0 %v892_v58  ;;  %5920 = vmatpush3.msra.mxu1 %v924_v59  ;;  %v990_v55 = vld [vmem:[%s11671_s1 + $0x1b78] sm:$0xff]  ;;  %v1005_v57 = vld [vmem:[%s11671_s1 + $0x1bf0] sm:$0xff] }
 0x1a2   :  { %5886 = vmatprep.subr.mxu0 %v907_v60  ;;  %5921 = vmatprep.subr.mxu1 %v939_v61  ;;  %v957_v58 = vld [vmem:[%s11671_s1 + $0x1a70] sm:$0xff]  ;;  %v972_v60 = vld [vmem:[%s11671_s1 + $0x1ae8] sm:$0xff] }
 0x1a3   :  { %5887 = vmatpush3.msra.mxu0 %v891_v62  ;;  %5922 = vmatpush3.msra.mxu1 %v923_v63  ;;  %v989_v59 = vld [vmem:[%s11671_s1 + $0x1b70] sm:$0xff]  ;;  %v1004_v61 = vld [vmem:[%s11671_s1 + $0x1be8] sm:$0xff] }
 0x1a4   :  { %5888 = vmatprep.subr.mxu0 %v906_v0  ;;  %5923 = vmatprep.subr.mxu1 %v938_v1  ;;  %v956_v62 = vld [vmem:[%s11671_s1 + $0x1a68] sm:$0xff]  ;;  %v971_v0 = vld [vmem:[%s11671_s1 + $0x1ae0] sm:$0xff] }
 0x1a5   :  { %5889 = vmatpush3.msra.mxu0 %v890_v2  ;;  %5924 = vmatpush3.msra.mxu1 %v922_v3  ;;  %v988_v63 = vld [vmem:[%s11671_s1 + $0x1b68] sm:$0xff]  ;;  %v1003_v1 = vld [vmem:[%s11671_s1 + $0x1be0] sm:$0xff] }
 0x1a6   :  { %5890 = vmatprep.subr.mxu0 %v905_v4  ;;  %5925 = vmatprep.subr.mxu1 %v937_v5  ;;  %v955_v2 = vld [vmem:[%s11671_s1 + $0x1a60] sm:$0xff]  ;;  %v970_v4 = vld [vmem:[%s11671_s1 + $0x1ad8] sm:$0xff] }
 0x1a7   :  { %5891 = vmatpush3.msra.mxu0 %v889_v6  ;;  %5926 = vmatpush3.msra.mxu1 %v921_v7  ;;  %v987_v3 = vld [vmem:[%s11671_s1 + $0x1b60] sm:$0xff]  ;;  %v1002_v5 = vld [vmem:[%s11671_s1 + $0x1bd8] sm:$0xff] }
 0x1a8   :  { %5892 = vmatprep.subr.mxu0 %v904_v8  ;;  %5927 = vmatprep.subr.mxu1 %v936_v9  ;;  %v954_v6 = vld [vmem:[%s11671_s1 + $0x1a58] sm:$0xff]  ;;  %v969_v8 = vld [vmem:[%s11671_s1 + $0x1ad0] sm:$0xff] }
 0x1a9   :  { %5893 = vmatpush3.msra.mxu0 %v888_v10  ;;  %5928 = vmatpush3.msra.mxu1 %v920_v11  ;;  %v986_v7 = vld [vmem:[%s11671_s1 + $0x1b58] sm:$0xff]  ;;  %v1001_v9 = vld [vmem:[%s11671_s1 + $0x1bd0] sm:$0xff] }
 0x1aa   :  { %5894 = vmatprep.subr.mxu0 %v903_v12  ;;  %5929 = vmatprep.subr.mxu1 %v935_v13  ;;  %v953_v10 = vld [vmem:[%s11671_s1 + $0x1a50] sm:$0xff]  ;;  %v968_v12 = vld [vmem:[%s11671_s1 + $0x1ac8] sm:$0xff] }
 0x1ab   :  { %5895 = vmatpush3.msra.mxu0 %v887_v14  ;;  %5930 = vmatpush3.msra.mxu1 %v919_v15  ;;  %v985_v11 = vld [vmem:[%s11671_s1 + $0x1b50] sm:$0xff]  ;;  %v1000_v13 = vld [vmem:[%s11671_s1 + $0x1bc8] sm:$0xff] }
 0x1ac   :  { %5896 = vmatprep.subr.mxu0 %v902_v16  ;;  %5931 = vmatprep.subr.mxu1 %v934_v17  ;;  %v952_v14 = vld [vmem:[%s11671_s1 + $0x1a48] sm:$0xff]  ;;  %v967_v16 = vld [vmem:[%s11671_s1 + $0x1ac0] sm:$0xff] }
 0x1ad   :  { %5897 = vmatpush3.msra.mxu0 %v886_v18  ;;  %5932 = vmatpush3.msra.mxu1 %v918_v19  ;;  %v984_v15 = vld [vmem:[%s11671_s1 + $0x1b48] sm:$0xff]  ;;  %v999_v17 = vld [vmem:[%s11671_s1 + $0x1bc0] sm:$0xff] }
 0x1ae   :  { %5898 = vmatprep.subr.mxu0 %v901_v20  ;;  %5933 = vmatprep.subr.mxu1 %v933_v21  ;;  %v951_v18 = vld [vmem:[%s11671_s1 + $0x1a40] sm:$0xff]  ;;  %v966_v20 = vld [vmem:[%s11671_s1 + $0x1ab8] sm:$0xff] }
 0x1af   :  { %5899 = vmatpush3.msra.mxu0 %v885_v22  ;;  %5934 = vmatpush3.msra.mxu1 %v917_v23  ;;  %v983_v19 = vld [vmem:[%s11671_s1 + $0x1b40] sm:$0xff]  ;;  %v998_v21 = vld [vmem:[%s11671_s1 + $0x1bb8] sm:$0xff] }
 0x1b0   :  { %5900 = vmatprep.subr.mxu0 %v900_v24  ;;  %5935 = vmatprep.subr.mxu1 %v932_v25  ;;  %v950_v22 = vld [vmem:[%s11671_s1 + $0x1a38] sm:$0xff]  ;;  %v965_v24 = vld [vmem:[%s11671_s1 + $0x1ab0] sm:$0xff] }
 0x1b1   :  { %5901 = vmatpush3.msra.mxu0 %v884_v26  ;;  %5936 = vmatpush3.msra.mxu1 %v916_v27  ;;  %v982_v23 = vld [vmem:[%s11671_s1 + $0x1b38] sm:$0xff]  ;;  %v997_v25 = vld [vmem:[%s11671_s1 + $0x1bb0] sm:$0xff] }
 0x1b2   :  { %5902 = vmatprep.subr.mxu0 %v899_v28  ;;  %5937 = vmatprep.subr.mxu1 %v931_v29  ;;  %v949_v26 = vld [vmem:[%s11671_s1 + $0x1a30] sm:$0xff]  ;;  %v964_v28 = vld [vmem:[%s11671_s1 + $0x1aa8] sm:$0xff] }
 0x1b3   :  { %5903 = vmatpush3.msra.mxu0 %v883_v30  ;;  %5938 = vmatpush3.msra.mxu1 %v915_v31  ;;  %v981_v27 = vld [vmem:[%s11671_s1 + $0x1b30] sm:$0xff]  ;;  %v996_v29 = vld [vmem:[%s11671_s1 + $0x1ba8] sm:$0xff] }
 0x1b4   :  { %5904 = vmatprep.subr.mxu0 %v898_v32  ;;  %5939 = vmatprep.subr.mxu1 %v930_v33  ;;  %v948_v30 = vld [vmem:[%s11671_s1 + $0x1a28] sm:$0xff]  ;;  %v963_v32 = vld [vmem:[%s11671_s1 + $0x1aa0] sm:$0xff] }
 0x1b5   :  { %5905 = vmatpush3.msra.mxu0 %v882_v34  ;;  %5940 = vmatpush3.msra.mxu1 %v914_v35  ;;  %v980_v31 = vld [vmem:[%s11671_s1 + $0x1b28] sm:$0xff]  ;;  %v995_v33 = vld [vmem:[%s11671_s1 + $0x1ba0] sm:$0xff] }
 0x1b6   :  { %5906 = vmatprep.subr.mxu0 %v897_v36  ;;  %5941 = vmatprep.subr.mxu1 %v929_v37  ;;  %v947_v34 = vld [vmem:[%s11671_s1 + $0x1a20] sm:$0xff]  ;;  %v962_v36 = vld [vmem:[%s11671_s1 + $0x1a98] sm:$0xff] }
 0x1b7   :  { %5907 = vmatpush3.msra.mxu0 %v881_v38  ;;  %5942 = vmatpush3.msra.mxu1 %v913_v39  ;;  %v979_v35 = vld [vmem:[%s11671_s1 + $0x1b20] sm:$0xff]  ;;  %v994_v37 = vld [vmem:[%s11671_s1 + $0x1b98] sm:$0xff] }
 0x1b8   :  { %5908 = vmatprep.subr.mxu0 %v896_v40  ;;  %5943 = vmatprep.subr.mxu1 %v928_v41  ;;  %v946_v38 = vld [vmem:[%s11671_s1 + $0x1a18] sm:$0xff]  ;;  %v961_v40 = vld [vmem:[%s11671_s1 + $0x1a90] sm:$0xff] }
 0x1b9   :  { %5909 = vmatpush3.msra.mxu0 %v880_v42  ;;  %5944 = vmatpush3.msra.mxu1 %v912_v43  ;;  %v978_v39 = vld [vmem:[%s11671_s1 + $0x1b18] sm:$0xff]  ;;  %v993_v41 = vld [vmem:[%s11671_s1 + $0x1b90] sm:$0xff] }
 0x1ba   :  { %5910 = vmatprep.subr.mxu0 %v895_v44  ;;  %5945 = vmatprep.subr.mxu1 %v927_v45  ;;  %v945_v42 = vld [vmem:[%s11671_s1 + $0x1a10] sm:$0xff]  ;;  %v960_v44 = vld [vmem:[%s11671_s1 + $0x1a88] sm:$0xff] }
 0x1bb   :  { %5911 = vmatpush3.msra.mxu0 %v879_v46  ;;  %3398 = vmatprep.mubr.f32.mxu0 %v64_v47  ;;  %v977_v43 = vld [vmem:[%s11671_s1 + $0x1b10] sm:$0xff]  ;;  %v992_v45 = vld [vmem:[%s11671_s1 + $0x1b88] sm:$0xff] }
 0x1bc   :  { %5946 = vmatpush3.msra.mxu1 %v911_v48  ;;  %3399 = vmatmul.mubr.f32.vlgmr.msra.gmra.mxu0 %v63_v49  ;;  %v944_v46 = vld [vmem:[%s11671_s1 + $0x1a08] sm:$0xff]  ;;  %v959_v48 = vld [vmem:[%s11671_s1 + $0x1a80] sm:$0xff] }
 0x1bd   :  { %3468 = vmatprep.mubr.f32.mxu1 %v66_v50  ;;  %5950 = vmatprep.subr.mxu0 %v974_v51  ;;  %v976_v47 = vld [vmem:[%s11671_s1 + $0x1b08] sm:$0xff]  ;;  %v991_v49 = vld [vmem:[%s11671_s1 + $0x1b80] sm:$0xff] }
 0x1be   :  { %5985 = vmatprep.subr.mxu1 %v1006_v52  ;;  %3469 = vmatmul.mubr.f32.vlgmr.msra.gmra.mxu1 %v65_v53  ;;  %v943_v50 = vld [vmem:[%s11671_s1 + $0x1a00] sm:$0xff]  ;;  %v68_v51 = vld [vmem:[%s11670_s0 + $0x1a8] sm:$0xff] }
 0x1bf   :  { %5951 = vmatpush3.msra.mxu0 %v958_v54  ;;  %5986 = vmatpush3.msra.mxu1 %v990_v55  ;;  %v975_v52 = vld [vmem:[%s11671_s1 + $0x1b00] sm:$0xff]  ;;  %v70_v54 = vld [vmem:[%s11670_s0 + $0x1b8] sm:$0xff] }
 0x1c0   :  { %5952 = vmatprep.subr.mxu0 %v973_v56  ;;  %5987 = vmatprep.subr.mxu1 %v1005_v57  ;;  %v67_v53 = vld [vmem:[%s11670_s0 + $0x1a0] sm:$0xff]  ;;  %v1038_v55 = vld [vmem:[%s11671_s1 + $0x1cf8] sm:$0xff]  ;;  %v69_v57 = vld [vmem:[%s11670_s0 + $0x1b0] sm:$0xff] }
 0x1c1   :  { %5953 = vmatpush3.msra.mxu0 %v957_v58  ;;  %5988 = vmatpush3.msra.mxu1 %v989_v59  ;;  %v1070_v56 = vld [vmem:[%s11671_s1 + $0x1df8] sm:$0xff] }
 0x1c2   :  { %5954 = vmatprep.subr.mxu0 %v972_v60  ;;  %5989 = vmatprep.subr.mxu1 %v1004_v61  ;;  %v1022_v58 = vld [vmem:[%s11671_s1 + $0x1c78] sm:$0xff]  ;;  %v1037_v60 = vld [vmem:[%s11671_s1 + $0x1cf0] sm:$0xff] }
 0x1c3   :  { %5955 = vmatpush3.msra.mxu0 %v956_v62  ;;  %5990 = vmatpush3.msra.mxu1 %v988_v63  ;;  %v1054_v59 = vld [vmem:[%s11671_s1 + $0x1d78] sm:$0xff]  ;;  %v1069_v61 = vld [vmem:[%s11671_s1 + $0x1df0] sm:$0xff] }
 0x1c4   :  { %5956 = vmatprep.subr.mxu0 %v971_v0  ;;  %5991 = vmatprep.subr.mxu1 %v1003_v1  ;;  %v1021_v62 = vld [vmem:[%s11671_s1 + $0x1c70] sm:$0xff]  ;;  %v1036_v0 = vld [vmem:[%s11671_s1 + $0x1ce8] sm:$0xff] }
 0x1c5   :  { %5957 = vmatpush3.msra.mxu0 %v955_v2  ;;  %5992 = vmatpush3.msra.mxu1 %v987_v3  ;;  %v1053_v63 = vld [vmem:[%s11671_s1 + $0x1d70] sm:$0xff]  ;;  %v1068_v1 = vld [vmem:[%s11671_s1 + $0x1de8] sm:$0xff] }
 0x1c6   :  { %5958 = vmatprep.subr.mxu0 %v970_v4  ;;  %5993 = vmatprep.subr.mxu1 %v1002_v5  ;;  %v1020_v2 = vld [vmem:[%s11671_s1 + $0x1c68] sm:$0xff]  ;;  %v1035_v4 = vld [vmem:[%s11671_s1 + $0x1ce0] sm:$0xff] }
 0x1c7   :  { %5959 = vmatpush3.msra.mxu0 %v954_v6  ;;  %5994 = vmatpush3.msra.mxu1 %v986_v7  ;;  %v1052_v3 = vld [vmem:[%s11671_s1 + $0x1d68] sm:$0xff]  ;;  %v1067_v5 = vld [vmem:[%s11671_s1 + $0x1de0] sm:$0xff] }
 0x1c8   :  { %5960 = vmatprep.subr.mxu0 %v969_v8  ;;  %5995 = vmatprep.subr.mxu1 %v1001_v9  ;;  %v1019_v6 = vld [vmem:[%s11671_s1 + $0x1c60] sm:$0xff]  ;;  %v1034_v8 = vld [vmem:[%s11671_s1 + $0x1cd8] sm:$0xff] }
 0x1c9   :  { %5961 = vmatpush3.msra.mxu0 %v953_v10  ;;  %5996 = vmatpush3.msra.mxu1 %v985_v11  ;;  %v1051_v7 = vld [vmem:[%s11671_s1 + $0x1d60] sm:$0xff]  ;;  %v1066_v9 = vld [vmem:[%s11671_s1 + $0x1dd8] sm:$0xff] }
 0x1ca   :  { %5962 = vmatprep.subr.mxu0 %v968_v12  ;;  %5997 = vmatprep.subr.mxu1 %v1000_v13  ;;  %v1018_v10 = vld [vmem:[%s11671_s1 + $0x1c58] sm:$0xff]  ;;  %v1033_v12 = vld [vmem:[%s11671_s1 + $0x1cd0] sm:$0xff] }
 0x1cb   :  { %5963 = vmatpush3.msra.mxu0 %v952_v14  ;;  %5998 = vmatpush3.msra.mxu1 %v984_v15  ;;  %v1050_v11 = vld [vmem:[%s11671_s1 + $0x1d58] sm:$0xff]  ;;  %v1065_v13 = vld [vmem:[%s11671_s1 + $0x1dd0] sm:$0xff] }
 0x1cc   :  { %5964 = vmatprep.subr.mxu0 %v967_v16  ;;  %5999 = vmatprep.subr.mxu1 %v999_v17  ;;  %v1017_v14 = vld [vmem:[%s11671_s1 + $0x1c50] sm:$0xff]  ;;  %v1032_v16 = vld [vmem:[%s11671_s1 + $0x1cc8] sm:$0xff] }
 0x1cd   :  { %5965 = vmatpush3.msra.mxu0 %v951_v18  ;;  %6000 = vmatpush3.msra.mxu1 %v983_v19  ;;  %v1049_v15 = vld [vmem:[%s11671_s1 + $0x1d50] sm:$0xff]  ;;  %v1064_v17 = vld [vmem:[%s11671_s1 + $0x1dc8] sm:$0xff] }
 0x1ce   :  { %5966 = vmatprep.subr.mxu0 %v966_v20  ;;  %6001 = vmatprep.subr.mxu1 %v998_v21  ;;  %v1016_v18 = vld [vmem:[%s11671_s1 + $0x1c48] sm:$0xff]  ;;  %v1031_v20 = vld [vmem:[%s11671_s1 + $0x1cc0] sm:$0xff] }
 0x1cf   :  { %5967 = vmatpush3.msra.mxu0 %v950_v22  ;;  %6002 = vmatpush3.msra.mxu1 %v982_v23  ;;  %v1048_v19 = vld [vmem:[%s11671_s1 + $0x1d48] sm:$0xff]  ;;  %v1063_v21 = vld [vmem:[%s11671_s1 + $0x1dc0] sm:$0xff] }
 0x1d0   :  { %5968 = vmatprep.subr.mxu0 %v965_v24  ;;  %6003 = vmatprep.subr.mxu1 %v997_v25  ;;  %v1015_v22 = vld [vmem:[%s11671_s1 + $0x1c40] sm:$0xff]  ;;  %v1030_v24 = vld [vmem:[%s11671_s1 + $0x1cb8] sm:$0xff] }
 0x1d1   :  { %5969 = vmatpush3.msra.mxu0 %v949_v26  ;;  %6004 = vmatpush3.msra.mxu1 %v981_v27  ;;  %v1047_v23 = vld [vmem:[%s11671_s1 + $0x1d40] sm:$0xff]  ;;  %v1062_v25 = vld [vmem:[%s11671_s1 + $0x1db8] sm:$0xff] }
 0x1d2   :  { %5970 = vmatprep.subr.mxu0 %v964_v28  ;;  %6005 = vmatprep.subr.mxu1 %v996_v29  ;;  %v1014_v26 = vld [vmem:[%s11671_s1 + $0x1c38] sm:$0xff]  ;;  %v1029_v28 = vld [vmem:[%s11671_s1 + $0x1cb0] sm:$0xff] }
 0x1d3   :  { %5971 = vmatpush3.msra.mxu0 %v948_v30  ;;  %6006 = vmatpush3.msra.mxu1 %v980_v31  ;;  %v1046_v27 = vld [vmem:[%s11671_s1 + $0x1d38] sm:$0xff]  ;;  %v1061_v29 = vld [vmem:[%s11671_s1 + $0x1db0] sm:$0xff] }
 0x1d4   :  { %5972 = vmatprep.subr.mxu0 %v963_v32  ;;  %6007 = vmatprep.subr.mxu1 %v995_v33  ;;  %v1013_v30 = vld [vmem:[%s11671_s1 + $0x1c30] sm:$0xff]  ;;  %v1028_v32 = vld [vmem:[%s11671_s1 + $0x1ca8] sm:$0xff] }
 0x1d5   :  { %5973 = vmatpush3.msra.mxu0 %v947_v34  ;;  %6008 = vmatpush3.msra.mxu1 %v979_v35  ;;  %v1045_v31 = vld [vmem:[%s11671_s1 + $0x1d30] sm:$0xff]  ;;  %v1060_v33 = vld [vmem:[%s11671_s1 + $0x1da8] sm:$0xff] }
 0x1d6   :  { %5974 = vmatprep.subr.mxu0 %v962_v36  ;;  %6009 = vmatprep.subr.mxu1 %v994_v37  ;;  %v1012_v34 = vld [vmem:[%s11671_s1 + $0x1c28] sm:$0xff]  ;;  %v1027_v36 = vld [vmem:[%s11671_s1 + $0x1ca0] sm:$0xff] }
 0x1d7   :  { %5975 = vmatpush3.msra.mxu0 %v946_v38  ;;  %6010 = vmatpush3.msra.mxu1 %v978_v39  ;;  %v1044_v35 = vld [vmem:[%s11671_s1 + $0x1d28] sm:$0xff]  ;;  %v1059_v37 = vld [vmem:[%s11671_s1 + $0x1da0] sm:$0xff] }
 0x1d8   :  { %5976 = vmatprep.subr.mxu0 %v961_v40  ;;  %6011 = vmatprep.subr.mxu1 %v993_v41  ;;  %v1011_v38 = vld [vmem:[%s11671_s1 + $0x1c20] sm:$0xff]  ;;  %v1026_v40 = vld [vmem:[%s11671_s1 + $0x1c98] sm:$0xff] }
 0x1d9   :  { %5977 = vmatpush3.msra.mxu0 %v945_v42  ;;  %6012 = vmatpush3.msra.mxu1 %v977_v43  ;;  %v1043_v39 = vld [vmem:[%s11671_s1 + $0x1d20] sm:$0xff]  ;;  %v1058_v41 = vld [vmem:[%s11671_s1 + $0x1d98] sm:$0xff] }
 0x1da   :  { %5978 = vmatprep.subr.mxu0 %v960_v44  ;;  %6013 = vmatprep.subr.mxu1 %v992_v45  ;;  %v1010_v42 = vld [vmem:[%s11671_s1 + $0x1c18] sm:$0xff]  ;;  %v1025_v44 = vld [vmem:[%s11671_s1 + $0x1c90] sm:$0xff] }
 0x1db   :  { %5979 = vmatpush3.msra.mxu0 %v944_v46  ;;  %6014 = vmatpush3.msra.mxu1 %v976_v47  ;;  %v1042_v43 = vld [vmem:[%s11671_s1 + $0x1d18] sm:$0xff]  ;;  %v1057_v45 = vld [vmem:[%s11671_s1 + $0x1d90] sm:$0xff] }
 0x1dc   :  { %5980 = vmatprep.subr.mxu0 %v959_v48  ;;  %6015 = vmatprep.subr.mxu1 %v991_v49  ;;  %v1009_v46 = vld [vmem:[%s11671_s1 + $0x1c10] sm:$0xff]  ;;  %v1024_v48 = vld [vmem:[%s11671_s1 + $0x1c88] sm:$0xff] }
 0x1dd   :  { %5981 = vmatpush3.msra.mxu0 %v943_v50  ;;  %3538 = vmatprep.mubr.f32.mxu0 %v68_v51  ;;  %v1041_v47 = vld [vmem:[%s11671_s1 + $0x1d10] sm:$0xff]  ;;  %v1056_v49 = vld [vmem:[%s11671_s1 + $0x1d88] sm:$0xff] }
 0x1de   :  { %6016 = vmatpush3.msra.mxu1 %v975_v52  ;;  %3539 = vmatmul.mubr.f32.vlgmr.msra.gmra.mxu0 %v67_v53  ;;  %v1008_v50 = vld [vmem:[%s11671_s1 + $0x1c08] sm:$0xff]  ;;  %v1023_v52 = vld [vmem:[%s11671_s1 + $0x1c80] sm:$0xff] }
 0x1df   :  { %3608 = vmatprep.mubr.f32.mxu1 %v70_v54  ;;  %6020 = vmatprep.subr.mxu0 %v1038_v55  ;;  %v1040_v51 = vld [vmem:[%s11671_s1 + $0x1d08] sm:$0xff]  ;;  %v1055_v53 = vld [vmem:[%s11671_s1 + $0x1d80] sm:$0xff] }
 0x1e0   :  { %6055 = vmatprep.subr.mxu1 %v1070_v56  ;;  %3609 = vmatmul.mubr.f32.vlgmr.msra.gmra.mxu1 %v69_v57  ;;  %v1007_v54 = vld [vmem:[%s11671_s1 + $0x1c00] sm:$0xff]  ;;  %v72_v55 = vld [vmem:[%s11670_s0 + $0x1c8] sm:$0xff] }
 0x1e1   :  { %6021 = vmatpush3.msra.mxu0 %v1022_v58  ;;  %6056 = vmatpush3.msra.mxu1 %v1054_v59  ;;  %v1039_v56 = vld [vmem:[%s11671_s1 + $0x1d00] sm:$0xff]  ;;  %v74_v58 = vld [vmem:[%s11670_s0 + $0x1d8] sm:$0xff] }
 0x1e2   :  { %6022 = vmatprep.subr.mxu0 %v1037_v60  ;;  %6057 = vmatprep.subr.mxu1 %v1069_v61  ;;  %v71_v57 = vld [vmem:[%s11670_s0 + $0x1c0] sm:$0xff]  ;;  %v1102_v59 = vld [vmem:[%s11671_s1 + $0x1ef8] sm:$0xff]  ;;  %v73_v61 = vld [vmem:[%s11670_s0 + $0x1d0] sm:$0xff] }
 0x1e3   :  { %6023 = vmatpush3.msra.mxu0 %v1021_v62  ;;  %6058 = vmatpush3.msra.mxu1 %v1053_v63  ;;  %v1134_v60 = vld [vmem:[%s11671_s1 + $0x1ff8] sm:$0xff] }
 0x1e4   :  { %6024 = vmatprep.subr.mxu0 %v1036_v0  ;;  %6059 = vmatprep.subr.mxu1 %v1068_v1  ;;  %v1086_v62 = vld [vmem:[%s11671_s1 + $0x1e78] sm:$0xff]  ;;  %v1101_v0 = vld [vmem:[%s11671_s1 + $0x1ef0] sm:$0xff] }
 0x1e5   :  { %6025 = vmatpush3.msra.mxu0 %v1020_v2  ;;  %6060 = vmatpush3.msra.mxu1 %v1052_v3  ;;  %v1118_v63 = vld [vmem:[%s11671_s1 + $0x1f78] sm:$0xff]  ;;  %v1133_v1 = vld [vmem:[%s11671_s1 + $0x1ff0] sm:$0xff] }
 0x1e6   :  { %6026 = vmatprep.subr.mxu0 %v1035_v4  ;;  %6061 = vmatprep.subr.mxu1 %v1067_v5  ;;  %v1085_v2 = vld [vmem:[%s11671_s1 + $0x1e70] sm:$0xff]  ;;  %v1100_v4 = vld [vmem:[%s11671_s1 + $0x1ee8] sm:$0xff] }
 0x1e7   :  { %6027 = vmatpush3.msra.mxu0 %v1019_v6  ;;  %6062 = vmatpush3.msra.mxu1 %v1051_v7  ;;  %v1117_v3 = vld [vmem:[%s11671_s1 + $0x1f70] sm:$0xff]  ;;  %v1132_v5 = vld [vmem:[%s11671_s1 + $0x1fe8] sm:$0xff] }
 0x1e8   :  { %6028 = vmatprep.subr.mxu0 %v1034_v8  ;;  %6063 = vmatprep.subr.mxu1 %v1066_v9  ;;  %v1084_v6 = vld [vmem:[%s11671_s1 + $0x1e68] sm:$0xff]  ;;  %v1099_v8 = vld [vmem:[%s11671_s1 + $0x1ee0] sm:$0xff] }
 0x1e9   :  { %6029 = vmatpush3.msra.mxu0 %v1018_v10  ;;  %6064 = vmatpush3.msra.mxu1 %v1050_v11  ;;  %v1116_v7 = vld [vmem:[%s11671_s1 + $0x1f68] sm:$0xff]  ;;  %v1131_v9 = vld [vmem:[%s11671_s1 + $0x1fe0] sm:$0xff] }
 0x1ea   :  { %6030 = vmatprep.subr.mxu0 %v1033_v12  ;;  %6065 = vmatprep.subr.mxu1 %v1065_v13  ;;  %v1083_v10 = vld [vmem:[%s11671_s1 + $0x1e60] sm:$0xff]  ;;  %v1098_v12 = vld [vmem:[%s11671_s1 + $0x1ed8] sm:$0xff] }
 0x1eb   :  { %6031 = vmatpush3.msra.mxu0 %v1017_v14  ;;  %6066 = vmatpush3.msra.mxu1 %v1049_v15  ;;  %v1115_v11 = vld [vmem:[%s11671_s1 + $0x1f60] sm:$0xff]  ;;  %v1130_v13 = vld [vmem:[%s11671_s1 + $0x1fd8] sm:$0xff] }
 0x1ec   :  { %6032 = vmatprep.subr.mxu0 %v1032_v16  ;;  %6067 = vmatprep.subr.mxu1 %v1064_v17  ;;  %v1082_v14 = vld [vmem:[%s11671_s1 + $0x1e58] sm:$0xff]  ;;  %v1097_v16 = vld [vmem:[%s11671_s1 + $0x1ed0] sm:$0xff] }
 0x1ed   :  { %6033 = vmatpush3.msra.mxu0 %v1016_v18  ;;  %6068 = vmatpush3.msra.mxu1 %v1048_v19  ;;  %v1114_v15 = vld [vmem:[%s11671_s1 + $0x1f58] sm:$0xff]  ;;  %v1129_v17 = vld [vmem:[%s11671_s1 + $0x1fd0] sm:$0xff] }
 0x1ee   :  { %6034 = vmatprep.subr.mxu0 %v1031_v20  ;;  %6069 = vmatprep.subr.mxu1 %v1063_v21  ;;  %v1081_v18 = vld [vmem:[%s11671_s1 + $0x1e50] sm:$0xff]  ;;  %v1096_v20 = vld [vmem:[%s11671_s1 + $0x1ec8] sm:$0xff] }
 0x1ef   :  { %6035 = vmatpush3.msra.mxu0 %v1015_v22  ;;  %6070 = vmatpush3.msra.mxu1 %v1047_v23  ;;  %v1113_v19 = vld [vmem:[%s11671_s1 + $0x1f50] sm:$0xff]  ;;  %v1128_v21 = vld [vmem:[%s11671_s1 + $0x1fc8] sm:$0xff] }
 0x1f0   :  { %6036 = vmatprep.subr.mxu0 %v1030_v24  ;;  %6071 = vmatprep.subr.mxu1 %v1062_v25  ;;  %v1080_v22 = vld [vmem:[%s11671_s1 + $0x1e48] sm:$0xff]  ;;  %v1095_v24 = vld [vmem:[%s11671_s1 + $0x1ec0] sm:$0xff] }
 0x1f1   :  { %6037 = vmatpush3.msra.mxu0 %v1014_v26  ;;  %6072 = vmatpush3.msra.mxu1 %v1046_v27  ;;  %v1112_v23 = vld [vmem:[%s11671_s1 + $0x1f48] sm:$0xff]  ;;  %v1127_v25 = vld [vmem:[%s11671_s1 + $0x1fc0] sm:$0xff] }
 0x1f2   :  { %6038 = vmatprep.subr.mxu0 %v1029_v28  ;;  %6073 = vmatprep.subr.mxu1 %v1061_v29  ;;  %v1079_v26 = vld [vmem:[%s11671_s1 + $0x1e40] sm:$0xff]  ;;  %v1094_v28 = vld [vmem:[%s11671_s1 + $0x1eb8] sm:$0xff] }
 0x1f3   :  { %6039 = vmatpush3.msra.mxu0 %v1013_v30  ;;  %6074 = vmatpush3.msra.mxu1 %v1045_v31  ;;  %v1111_v27 = vld [vmem:[%s11671_s1 + $0x1f40] sm:$0xff]  ;;  %v1126_v29 = vld [vmem:[%s11671_s1 + $0x1fb8] sm:$0xff] }
 0x1f4   :  { %6040 = vmatprep.subr.mxu0 %v1028_v32  ;;  %6075 = vmatprep.subr.mxu1 %v1060_v33  ;;  %v1078_v30 = vld [vmem:[%s11671_s1 + $0x1e38] sm:$0xff]  ;;  %v1093_v32 = vld [vmem:[%s11671_s1 + $0x1eb0] sm:$0xff] }
 0x1f5   :  { %6041 = vmatpush3.msra.mxu0 %v1012_v34  ;;  %6076 = vmatpush3.msra.mxu1 %v1044_v35  ;;  %v1110_v31 = vld [vmem:[%s11671_s1 + $0x1f38] sm:$0xff]  ;;  %v1125_v33 = vld [vmem:[%s11671_s1 + $0x1fb0] sm:$0xff] }
 0x1f6   :  { %6042 = vmatprep.subr.mxu0 %v1027_v36  ;;  %6077 = vmatprep.subr.mxu1 %v1059_v37  ;;  %v1077_v34 = vld [vmem:[%s11671_s1 + $0x1e30] sm:$0xff]  ;;  %v1092_v36 = vld [vmem:[%s11671_s1 + $0x1ea8] sm:$0xff] }
 0x1f7   :  { %6043 = vmatpush3.msra.mxu0 %v1011_v38  ;;  %6078 = vmatpush3.msra.mxu1 %v1043_v39  ;;  %v1109_v35 = vld [vmem:[%s11671_s1 + $0x1f30] sm:$0xff]  ;;  %v1124_v37 = vld [vmem:[%s11671_s1 + $0x1fa8] sm:$0xff] }
 0x1f8   :  { %6044 = vmatprep.subr.mxu0 %v1026_v40  ;;  %6079 = vmatprep.subr.mxu1 %v1058_v41  ;;  %v1076_v38 = vld [vmem:[%s11671_s1 + $0x1e28] sm:$0xff]  ;;  %v1091_v40 = vld [vmem:[%s11671_s1 + $0x1ea0] sm:$0xff] }
 0x1f9   :  { %6045 = vmatpush3.msra.mxu0 %v1010_v42  ;;  %6080 = vmatpush3.msra.mxu1 %v1042_v43  ;;  %v1108_v39 = vld [vmem:[%s11671_s1 + $0x1f28] sm:$0xff]  ;;  %v1123_v41 = vld [vmem:[%s11671_s1 + $0x1fa0] sm:$0xff] }
 0x1fa   :  { %6046 = vmatprep.subr.mxu0 %v1025_v44  ;;  %6081 = vmatprep.subr.mxu1 %v1057_v45  ;;  %v1075_v42 = vld [vmem:[%s11671_s1 + $0x1e20] sm:$0xff]  ;;  %v1090_v44 = vld [vmem:[%s11671_s1 + $0x1e98] sm:$0xff] }
 0x1fb   :  { %6047 = vmatpush3.msra.mxu0 %v1009_v46  ;;  %6082 = vmatpush3.msra.mxu1 %v1041_v47  ;;  %v1107_v43 = vld [vmem:[%s11671_s1 + $0x1f20] sm:$0xff]  ;;  %v1122_v45 = vld [vmem:[%s11671_s1 + $0x1f98] sm:$0xff] }
 0x1fc   :  { %6048 = vmatprep.subr.mxu0 %v1024_v48  ;;  %6083 = vmatprep.subr.mxu1 %v1056_v49  ;;  %v1074_v46 = vld [vmem:[%s11671_s1 + $0x1e18] sm:$0xff]  ;;  %v1089_v48 = vld [vmem:[%s11671_s1 + $0x1e90] sm:$0xff] }
 0x1fd   :  { %6049 = vmatpush3.msra.mxu0 %v1008_v50  ;;  %6084 = vmatpush3.msra.mxu1 %v1040_v51  ;;  %v1106_v47 = vld [vmem:[%s11671_s1 + $0x1f18] sm:$0xff]  ;;  %v1121_v49 = vld [vmem:[%s11671_s1 + $0x1f90] sm:$0xff] }
 0x1fe   :  { %6050 = vmatprep.subr.mxu0 %v1023_v52  ;;  %6085 = vmatprep.subr.mxu1 %v1055_v53  ;;  %v1073_v50 = vld [vmem:[%s11671_s1 + $0x1e10] sm:$0xff]  ;;  %v1088_v52 = vld [vmem:[%s11671_s1 + $0x1e88] sm:$0xff] }
 0x1ff   :  { %6051 = vmatpush3.msra.mxu0 %v1007_v54  ;;  %3678 = vmatprep.mubr.f32.mxu0 %v72_v55  ;;  %v1105_v51 = vld [vmem:[%s11671_s1 + $0x1f10] sm:$0xff]  ;;  %v1120_v53 = vld [vmem:[%s11671_s1 + $0x1f88] sm:$0xff] }
 0x200   :  { %6086 = vmatpush3.msra.mxu1 %v1039_v56  ;;  %3679 = vmatmul.mubr.f32.vlgmr.msra.gmra.mxu0 %v71_v57  ;;  %v1072_v54 = vld [vmem:[%s11671_s1 + $0x1e08] sm:$0xff]  ;;  %v1087_v56 = vld [vmem:[%s11671_s1 + $0x1e80] sm:$0xff] }
 0x201   :  { %3748 = vmatprep.mubr.f32.mxu1 %v74_v58  ;;  %6090 = vmatprep.subr.mxu0 %v1102_v59  ;;  %v1104_v55 = vld [vmem:[%s11671_s1 + $0x1f08] sm:$0xff]  ;;  %v1119_v57 = vld [vmem:[%s11671_s1 + $0x1f80] sm:$0xff] }
 0x202   :  { %6125 = vmatprep.subr.mxu1 %v1134_v60  ;;  %3749 = vmatmul.mubr.f32.vlgmr.msra.gmra.mxu1 %v73_v61  ;;  %v1071_v58 = vld [vmem:[%s11671_s1 + $0x1e00] sm:$0xff]  ;;  %v76_v59 = vld [vmem:[%s11670_s0 + $0x1e8] sm:$0xff] }
 0x203   :  { %6091 = vmatpush3.msra.mxu0 %v1086_v62  ;;  %6126 = vmatpush3.msra.mxu1 %v1118_v63  ;;  %v1103_v60 = vld [vmem:[%s11671_s1 + $0x1f00] sm:$0xff]  ;;  %v78_v62 = vld [vmem:[%s11670_s0 + $0x1f8] sm:$0xff] }
 0x204   :  { %6092 = vmatprep.subr.mxu0 %v1101_v0  ;;  %6127 = vmatprep.subr.mxu1 %v1133_v1  ;;  %v75_v61 = vld [vmem:[%s11670_s0 + $0x1e0] sm:$0xff]  ;;  %v1166_v63 = vld [vmem:[%s11671_s1 + $0x20f8] sm:$0xff]  ;;  %v77_v1 = vld [vmem:[%s11670_s0 + $0x1f0] sm:$0xff] }
 0x205   :  { %6093 = vmatpush3.msra.mxu0 %v1085_v2  ;;  %6128 = vmatpush3.msra.mxu1 %v1117_v3  ;;  %v1198_v0 = vld [vmem:[%s11671_s1 + $0x21f8] sm:$0xff] }
 0x206   :  { %6094 = vmatprep.subr.mxu0 %v1100_v4  ;;  %6129 = vmatprep.subr.mxu1 %v1132_v5  ;;  %v1150_v2 = vld [vmem:[%s11671_s1 + $0x2078] sm:$0xff]  ;;  %v1165_v4 = vld [vmem:[%s11671_s1 + $0x20f0] sm:$0xff] }
 0x207   :  { %6095 = vmatpush3.msra.mxu0 %v1084_v6  ;;  %6130 = vmatpush3.msra.mxu1 %v1116_v7  ;;  %v1182_v3 = vld [vmem:[%s11671_s1 + $0x2178] sm:$0xff]  ;;  %v1197_v5 = vld [vmem:[%s11671_s1 + $0x21f0] sm:$0xff] }
 0x208   :  { %6096 = vmatprep.subr.mxu0 %v1099_v8  ;;  %6131 = vmatprep.subr.mxu1 %v1131_v9  ;;  %v1149_v6 = vld [vmem:[%s11671_s1 + $0x2070] sm:$0xff]  ;;  %v1164_v8 = vld [vmem:[%s11671_s1 + $0x20e8] sm:$0xff] }
 0x209   :  { %6097 = vmatpush3.msra.mxu0 %v1083_v10  ;;  %6132 = vmatpush3.msra.mxu1 %v1115_v11  ;;  %v1181_v7 = vld [vmem:[%s11671_s1 + $0x2170] sm:$0xff]  ;;  %v1196_v9 = vld [vmem:[%s11671_s1 + $0x21e8] sm:$0xff] }
 0x20a   :  { %6098 = vmatprep.subr.mxu0 %v1098_v12  ;;  %6133 = vmatprep.subr.mxu1 %v1130_v13  ;;  %v1148_v10 = vld [vmem:[%s11671_s1 + $0x2068] sm:$0xff]  ;;  %v1163_v12 = vld [vmem:[%s11671_s1 + $0x20e0] sm:$0xff] }
 0x20b   :  { %6099 = vmatpush3.msra.mxu0 %v1082_v14  ;;  %6134 = vmatpush3.msra.mxu1 %v1114_v15  ;;  %v1180_v11 = vld [vmem:[%s11671_s1 + $0x2168] sm:$0xff]  ;;  %v1195_v13 = vld [vmem:[%s11671_s1 + $0x21e0] sm:$0xff] }
 0x20c   :  { %6100 = vmatprep.subr.mxu0 %v1097_v16  ;;  %6135 = vmatprep.subr.mxu1 %v1129_v17  ;;  %v1147_v14 = vld [vmem:[%s11671_s1 + $0x2060] sm:$0xff]  ;;  %v1162_v16 = vld [vmem:[%s11671_s1 + $0x20d8] sm:$0xff] }
 0x20d   :  { %6101 = vmatpush3.msra.mxu0 %v1081_v18  ;;  %6136 = vmatpush3.msra.mxu1 %v1113_v19  ;;  %v1179_v15 = vld [vmem:[%s11671_s1 + $0x2160] sm:$0xff]  ;;  %v1194_v17 = vld [vmem:[%s11671_s1 + $0x21d8] sm:$0xff] }
 0x20e   :  { %6102 = vmatprep.subr.mxu0 %v1096_v20  ;;  %6137 = vmatprep.subr.mxu1 %v1128_v21  ;;  %v1146_v18 = vld [vmem:[%s11671_s1 + $0x2058] sm:$0xff]  ;;  %v1161_v20 = vld [vmem:[%s11671_s1 + $0x20d0] sm:$0xff] }
 0x20f   :  { %6103 = vmatpush3.msra.mxu0 %v1080_v22  ;;  %6138 = vmatpush3.msra.mxu1 %v1112_v23  ;;  %v1178_v19 = vld [vmem:[%s11671_s1 + $0x2158] sm:$0xff]  ;;  %v1193_v21 = vld [vmem:[%s11671_s1 + $0x21d0] sm:$0xff] }
 0x210   :  { %6104 = vmatprep.subr.mxu0 %v1095_v24  ;;  %6139 = vmatprep.subr.mxu1 %v1127_v25  ;;  %v1145_v22 = vld [vmem:[%s11671_s1 + $0x2050] sm:$0xff]  ;;  %v1160_v24 = vld [vmem:[%s11671_s1 + $0x20c8] sm:$0xff] }
 0x211   :  { %6105 = vmatpush3.msra.mxu0 %v1079_v26  ;;  %6140 = vmatpush3.msra.mxu1 %v1111_v27  ;;  %v1177_v23 = vld [vmem:[%s11671_s1 + $0x2150] sm:$0xff]  ;;  %v1192_v25 = vld [vmem:[%s11671_s1 + $0x21c8] sm:$0xff] }
 0x212   :  { %6106 = vmatprep.subr.mxu0 %v1094_v28  ;;  %6141 = vmatprep.subr.mxu1 %v1126_v29  ;;  %v1144_v26 = vld [vmem:[%s11671_s1 + $0x2048] sm:$0xff]  ;;  %v1159_v28 = vld [vmem:[%s11671_s1 + $0x20c0] sm:$0xff] }
 0x213   :  { %6107 = vmatpush3.msra.mxu0 %v1078_v30  ;;  %6142 = vmatpush3.msra.mxu1 %v1110_v31  ;;  %v1176_v27 = vld [vmem:[%s11671_s1 + $0x2148] sm:$0xff]  ;;  %v1191_v29 = vld [vmem:[%s11671_s1 + $0x21c0] sm:$0xff] }
 0x214   :  { %6108 = vmatprep.subr.mxu0 %v1093_v32  ;;  %6143 = vmatprep.subr.mxu1 %v1125_v33  ;;  %v1143_v30 = vld [vmem:[%s11671_s1 + $0x2040] sm:$0xff]  ;;  %v1158_v32 = vld [vmem:[%s11671_s1 + $0x20b8] sm:$0xff] }
 0x215   :  { %6109 = vmatpush3.msra.mxu0 %v1077_v34  ;;  %6144 = vmatpush3.msra.mxu1 %v1109_v35  ;;  %v1175_v31 = vld [vmem:[%s11671_s1 + $0x2140] sm:$0xff]  ;;  %v1190_v33 = vld [vmem:[%s11671_s1 + $0x21b8] sm:$0xff] }
 0x216   :  { %6110 = vmatprep.subr.mxu0 %v1092_v36  ;;  %6145 = vmatprep.subr.mxu1 %v1124_v37  ;;  %v1142_v34 = vld [vmem:[%s11671_s1 + $0x2038] sm:$0xff]  ;;  %v1157_v36 = vld [vmem:[%s11671_s1 + $0x20b0] sm:$0xff] }
 0x217   :  { %6111 = vmatpush3.msra.mxu0 %v1076_v38  ;;  %6146 = vmatpush3.msra.mxu1 %v1108_v39  ;;  %v1174_v35 = vld [vmem:[%s11671_s1 + $0x2138] sm:$0xff]  ;;  %v1189_v37 = vld [vmem:[%s11671_s1 + $0x21b0] sm:$0xff] }
 0x218   :  { %6112 = vmatprep.subr.mxu0 %v1091_v40  ;;  %6147 = vmatprep.subr.mxu1 %v1123_v41  ;;  %v1141_v38 = vld [vmem:[%s11671_s1 + $0x2030] sm:$0xff]  ;;  %v1156_v40 = vld [vmem:[%s11671_s1 + $0x20a8] sm:$0xff] }
 0x219   :  { %6113 = vmatpush3.msra.mxu0 %v1075_v42  ;;  %6148 = vmatpush3.msra.mxu1 %v1107_v43  ;;  %v1173_v39 = vld [vmem:[%s11671_s1 + $0x2130] sm:$0xff]  ;;  %v1188_v41 = vld [vmem:[%s11671_s1 + $0x21a8] sm:$0xff] }
 0x21a   :  { %6114 = vmatprep.subr.mxu0 %v1090_v44  ;;  %6149 = vmatprep.subr.mxu1 %v1122_v45  ;;  %v1140_v42 = vld [vmem:[%s11671_s1 + $0x2028] sm:$0xff]  ;;  %v1155_v44 = vld [vmem:[%s11671_s1 + $0x20a0] sm:$0xff] }
 0x21b   :  { %6115 = vmatpush3.msra.mxu0 %v1074_v46  ;;  %6150 = vmatpush3.msra.mxu1 %v1106_v47  ;;  %v1172_v43 = vld [vmem:[%s11671_s1 + $0x2128] sm:$0xff]  ;;  %v1187_v45 = vld [vmem:[%s11671_s1 + $0x21a0] sm:$0xff] }
 0x21c   :  { %6116 = vmatprep.subr.mxu0 %v1089_v48  ;;  %6151 = vmatprep.subr.mxu1 %v1121_v49  ;;  %v1139_v46 = vld [vmem:[%s11671_s1 + $0x2020] sm:$0xff]  ;;  %v1154_v48 = vld [vmem:[%s11671_s1 + $0x2098] sm:$0xff] }
 0x21d   :  { %6117 = vmatpush3.msra.mxu0 %v1073_v50  ;;  %6152 = vmatpush3.msra.mxu1 %v1105_v51  ;;  %v1171_v47 = vld [vmem:[%s11671_s1 + $0x2120] sm:$0xff]  ;;  %v1186_v49 = vld [vmem:[%s11671_s1 + $0x2198] sm:$0xff] }
 0x21e   :  { %6118 = vmatprep.subr.mxu0 %v1088_v52  ;;  %6153 = vmatprep.subr.mxu1 %v1120_v53  ;;  %v1138_v50 = vld [vmem:[%s11671_s1 + $0x2018] sm:$0xff]  ;;  %v1153_v52 = vld [vmem:[%s11671_s1 + $0x2090] sm:$0xff] }
 0x21f   :  { %6119 = vmatpush3.msra.mxu0 %v1072_v54  ;;  %6154 = vmatpush3.msra.mxu1 %v1104_v55  ;;  %v1170_v51 = vld [vmem:[%s11671_s1 + $0x2118] sm:$0xff]  ;;  %v1185_v53 = vld [vmem:[%s11671_s1 + $0x2190] sm:$0xff] }
 0x220   :  { %6120 = vmatprep.subr.mxu0 %v1087_v56  ;;  %6155 = vmatprep.subr.mxu1 %v1119_v57  ;;  %v1137_v54 = vld [vmem:[%s11671_s1 + $0x2010] sm:$0xff]  ;;  %v1152_v56 = vld [vmem:[%s11671_s1 + $0x2088] sm:$0xff] }
 0x221   :  { %6121 = vmatpush3.msra.mxu0 %v1071_v58  ;;  %3818 = vmatprep.mubr.f32.mxu0 %v76_v59  ;;  %v1169_v55 = vld [vmem:[%s11671_s1 + $0x2110] sm:$0xff]  ;;  %v1184_v57 = vld [vmem:[%s11671_s1 + $0x2188] sm:$0xff] }
 0x222   :  { %6156 = vmatpush3.msra.mxu1 %v1103_v60  ;;  %3819 = vmatmul.mubr.f32.vlgmr.msra.gmra.mxu0 %v75_v61  ;;  %v1136_v58 = vld [vmem:[%s11671_s1 + $0x2008] sm:$0xff]  ;;  %v1151_v60 = vld [vmem:[%s11671_s1 + $0x2080] sm:$0xff] }
 0x223   :  { %3888 = vmatprep.mubr.f32.mxu1 %v78_v62  ;;  %6160 = vmatprep.subr.mxu0 %v1166_v63  ;;  %v1168_v59 = vld [vmem:[%s11671_s1 + $0x2108] sm:$0xff]  ;;  %v1183_v61 = vld [vmem:[%s11671_s1 + $0x2180] sm:$0xff] }
 0x224   :  { %6195 = vmatprep.subr.mxu1 %v1198_v0  ;;  %3889 = vmatmul.mubr.f32.vlgmr.msra.gmra.mxu1 %v77_v1  ;;  %v1135_v62 = vld [vmem:[%s11671_s1 + $0x2000] sm:$0xff]  ;;  %v80_v63 = vld [vmem:[%s11670_s0 + $0x208] sm:$0xff] }
 0x225   :  { %6161 = vmatpush3.msra.mxu0 %v1150_v2  ;;  %6196 = vmatpush3.msra.mxu1 %v1182_v3  ;;  %v1167_v0 = vld [vmem:[%s11671_s1 + $0x2100] sm:$0xff]  ;;  %v82_v2 = vld [vmem:[%s11670_s0 + $0x218] sm:$0xff] }
 0x226   :  { %6162 = vmatprep.subr.mxu0 %v1165_v4  ;;  %6197 = vmatprep.subr.mxu1 %v1197_v5  ;;  %v79_v1 = vld [vmem:[%s11670_s0 + $0x200] sm:$0xff]  ;;  %v1230_v3 = vld [vmem:[%s11671_s1 + $0x22f8] sm:$0xff]  ;;  %v81_v5 = vld [vmem:[%s11670_s0 + $0x210] sm:$0xff] }
 0x227   :  { %6163 = vmatpush3.msra.mxu0 %v1149_v6  ;;  %6198 = vmatpush3.msra.mxu1 %v1181_v7  ;;  %v1262_v4 = vld [vmem:[%s11671_s1 + $0x23f8] sm:$0xff] }
 0x228   :  { %6164 = vmatprep.subr.mxu0 %v1164_v8  ;;  %6199 = vmatprep.subr.mxu1 %v1196_v9  ;;  %v1214_v6 = vld [vmem:[%s11671_s1 + $0x2278] sm:$0xff]  ;;  %v1229_v8 = vld [vmem:[%s11671_s1 + $0x22f0] sm:$0xff] }
 0x229   :  { %6165 = vmatpush3.msra.mxu0 %v1148_v10  ;;  %6200 = vmatpush3.msra.mxu1 %v1180_v11  ;;  %v1246_v7 = vld [vmem:[%s11671_s1 + $0x2378] sm:$0xff]  ;;  %v1261_v9 = vld [vmem:[%s11671_s1 + $0x23f0] sm:$0xff] }
 0x22a   :  { %6166 = vmatprep.subr.mxu0 %v1163_v12  ;;  %6201 = vmatprep.subr.mxu1 %v1195_v13  ;;  %v1213_v10 = vld [vmem:[%s11671_s1 + $0x2270] sm:$0xff]  ;;  %v1228_v12 = vld [vmem:[%s11671_s1 + $0x22e8] sm:$0xff] }
 0x22b   :  { %6167 = vmatpush3.msra.mxu0 %v1147_v14  ;;  %6202 = vmatpush3.msra.mxu1 %v1179_v15  ;;  %v1245_v11 = vld [vmem:[%s11671_s1 + $0x2370] sm:$0xff]  ;;  %v1260_v13 = vld [vmem:[%s11671_s1 + $0x23e8] sm:$0xff] }
 0x22c   :  { %6168 = vmatprep.subr.mxu0 %v1162_v16  ;;  %6203 = vmatprep.subr.mxu1 %v1194_v17  ;;  %v1212_v14 = vld [vmem:[%s11671_s1 + $0x2268] sm:$0xff]  ;;  %v1227_v16 = vld [vmem:[%s11671_s1 + $0x22e0] sm:$0xff] }
 0x22d   :  { %6169 = vmatpush3.msra.mxu0 %v1146_v18  ;;  %6204 = vmatpush3.msra.mxu1 %v1178_v19  ;;  %v1244_v15 = vld [vmem:[%s11671_s1 + $0x2368] sm:$0xff]  ;;  %v1259_v17 = vld [vmem:[%s11671_s1 + $0x23e0] sm:$0xff] }
 0x22e   :  { %6170 = vmatprep.subr.mxu0 %v1161_v20  ;;  %6205 = vmatprep.subr.mxu1 %v1193_v21  ;;  %v1211_v18 = vld [vmem:[%s11671_s1 + $0x2260] sm:$0xff]  ;;  %v1226_v20 = vld [vmem:[%s11671_s1 + $0x22d8] sm:$0xff] }
 0x22f   :  { %6171 = vmatpush3.msra.mxu0 %v1145_v22  ;;  %6206 = vmatpush3.msra.mxu1 %v1177_v23  ;;  %v1243_v19 = vld [vmem:[%s11671_s1 + $0x2360] sm:$0xff]  ;;  %v1258_v21 = vld [vmem:[%s11671_s1 + $0x23d8] sm:$0xff] }
 0x230   :  { %6172 = vmatprep.subr.mxu0 %v1160_v24  ;;  %6207 = vmatprep.subr.mxu1 %v1192_v25  ;;  %v1210_v22 = vld [vmem:[%s11671_s1 + $0x2258] sm:$0xff]  ;;  %v1225_v24 = vld [vmem:[%s11671_s1 + $0x22d0] sm:$0xff] }
 0x231   :  { %6173 = vmatpush3.msra.mxu0 %v1144_v26  ;;  %6208 = vmatpush3.msra.mxu1 %v1176_v27  ;;  %v1242_v23 = vld [vmem:[%s11671_s1 + $0x2358] sm:$0xff]  ;;  %v1257_v25 = vld [vmem:[%s11671_s1 + $0x23d0] sm:$0xff] }
 0x232   :  { %6174 = vmatprep.subr.mxu0 %v1159_v28  ;;  %6209 = vmatprep.subr.mxu1 %v1191_v29  ;;  %v1209_v26 = vld [vmem:[%s11671_s1 + $0x2250] sm:$0xff]  ;;  %v1224_v28 = vld [vmem:[%s11671_s1 + $0x22c8] sm:$0xff] }
 0x233   :  { %6175 = vmatpush3.msra.mxu0 %v1143_v30  ;;  %6210 = vmatpush3.msra.mxu1 %v1175_v31  ;;  %v1241_v27 = vld [vmem:[%s11671_s1 + $0x2350] sm:$0xff]  ;;  %v1256_v29 = vld [vmem:[%s11671_s1 + $0x23c8] sm:$0xff] }
 0x234   :  { %6176 = vmatprep.subr.mxu0 %v1158_v32  ;;  %6211 = vmatprep.subr.mxu1 %v1190_v33  ;;  %v1208_v30 = vld [vmem:[%s11671_s1 + $0x2248] sm:$0xff]  ;;  %v1223_v32 = vld [vmem:[%s11671_s1 + $0x22c0] sm:$0xff] }
 0x235   :  { %6177 = vmatpush3.msra.mxu0 %v1142_v34  ;;  %6212 = vmatpush3.msra.mxu1 %v1174_v35  ;;  %v1240_v31 = vld [vmem:[%s11671_s1 + $0x2348] sm:$0xff]  ;;  %v1255_v33 = vld [vmem:[%s11671_s1 + $0x23c0] sm:$0xff] }
 0x236   :  { %6178 = vmatprep.subr.mxu0 %v1157_v36  ;;  %6213 = vmatprep.subr.mxu1 %v1189_v37  ;;  %v1207_v34 = vld [vmem:[%s11671_s1 + $0x2240] sm:$0xff]  ;;  %v1222_v36 = vld [vmem:[%s11671_s1 + $0x22b8] sm:$0xff] }
 0x237   :  { %6179 = vmatpush3.msra.mxu0 %v1141_v38  ;;  %6214 = vmatpush3.msra.mxu1 %v1173_v39  ;;  %v1239_v35 = vld [vmem:[%s11671_s1 + $0x2340] sm:$0xff]  ;;  %v1254_v37 = vld [vmem:[%s11671_s1 + $0x23b8] sm:$0xff] }
 0x238   :  { %6180 = vmatprep.subr.mxu0 %v1156_v40  ;;  %6215 = vmatprep.subr.mxu1 %v1188_v41  ;;  %v1206_v38 = vld [vmem:[%s11671_s1 + $0x2238] sm:$0xff]  ;;  %v1221_v40 = vld [vmem:[%s11671_s1 + $0x22b0] sm:$0xff] }
 0x239   :  { %6181 = vmatpush3.msra.mxu0 %v1140_v42  ;;  %6216 = vmatpush3.msra.mxu1 %v1172_v43  ;;  %v1238_v39 = vld [vmem:[%s11671_s1 + $0x2338] sm:$0xff]  ;;  %v1253_v41 = vld [vmem:[%s11671_s1 + $0x23b0] sm:$0xff] }
 0x23a   :  { %6182 = vmatprep.subr.mxu0 %v1155_v44  ;;  %6217 = vmatprep.subr.mxu1 %v1187_v45  ;;  %v1205_v42 = vld [vmem:[%s11671_s1 + $0x2230] sm:$0xff]  ;;  %v1220_v44 = vld [vmem:[%s11671_s1 + $0x22a8] sm:$0xff] }
 0x23b   :  { %6183 = vmatpush3.msra.mxu0 %v1139_v46  ;;  %6218 = vmatpush3.msra.mxu1 %v1171_v47  ;;  %v1237_v43 = vld [vmem:[%s11671_s1 + $0x2330] sm:$0xff]  ;;  %v1252_v45 = vld [vmem:[%s11671_s1 + $0x23a8] sm:$0xff] }
 0x23c   :  { %6184 = vmatprep.subr.mxu0 %v1154_v48  ;;  %6219 = vmatprep.subr.mxu1 %v1186_v49  ;;  %v1204_v46 = vld [vmem:[%s11671_s1 + $0x2228] sm:$0xff]  ;;  %v1219_v48 = vld [vmem:[%s11671_s1 + $0x22a0] sm:$0xff] }
 0x23d   :  { %6185 = vmatpush3.msra.mxu0 %v1138_v50  ;;  %6220 = vmatpush3.msra.mxu1 %v1170_v51  ;;  %v1236_v47 = vld [vmem:[%s11671_s1 + $0x2328] sm:$0xff]  ;;  %v1251_v49 = vld [vmem:[%s11671_s1 + $0x23a0] sm:$0xff] }
 0x23e   :  { %6186 = vmatprep.subr.mxu0 %v1153_v52  ;;  %6221 = vmatprep.subr.mxu1 %v1185_v53  ;;  %v1203_v50 = vld [vmem:[%s11671_s1 + $0x2220] sm:$0xff]  ;;  %v1218_v52 = vld [vmem:[%s11671_s1 + $0x2298] sm:$0xff] }
 0x23f   :  { %6187 = vmatpush3.msra.mxu0 %v1137_v54  ;;  %6222 = vmatpush3.msra.mxu1 %v1169_v55  ;;  %v1235_v51 = vld [vmem:[%s11671_s1 + $0x2320] sm:$0xff]  ;;  %v1250_v53 = vld [vmem:[%s11671_s1 + $0x2398] sm:$0xff] }
 0x240   :  { %6188 = vmatprep.subr.mxu0 %v1152_v56  ;;  %6223 = vmatprep.subr.mxu1 %v1184_v57  ;;  %v1202_v54 = vld [vmem:[%s11671_s1 + $0x2218] sm:$0xff]  ;;  %v1217_v56 = vld [vmem:[%s11671_s1 + $0x2290] sm:$0xff] }
 0x241   :  { %6189 = vmatpush3.msra.mxu0 %v1136_v58  ;;  %6224 = vmatpush3.msra.mxu1 %v1168_v59  ;;  %v1234_v55 = vld [vmem:[%s11671_s1 + $0x2318] sm:$0xff]  ;;  %v1249_v57 = vld [vmem:[%s11671_s1 + $0x2390] sm:$0xff] }
 0x242   :  { %6190 = vmatprep.subr.mxu0 %v1151_v60  ;;  %6225 = vmatprep.subr.mxu1 %v1183_v61  ;;  %v1201_v58 = vld [vmem:[%s11671_s1 + $0x2210] sm:$0xff]  ;;  %v1216_v60 = vld [vmem:[%s11671_s1 + $0x2288] sm:$0xff] }
 0x243   :  { %6191 = vmatpush3.msra.mxu0 %v1135_v62  ;;  %3958 = vmatprep.mubr.f32.mxu0 %v80_v63  ;;  %v1233_v59 = vld [vmem:[%s11671_s1 + $0x2310] sm:$0xff]  ;;  %v1248_v61 = vld [vmem:[%s11671_s1 + $0x2388] sm:$0xff] }
 0x244   :  { %6226 = vmatpush3.msra.mxu1 %v1167_v0  ;;  %3959 = vmatmul.mubr.f32.vlgmr.msra.gmra.mxu0 %v79_v1  ;;  %v1200_v62 = vld [vmem:[%s11671_s1 + $0x2208] sm:$0xff]  ;;  %v1215_v0 = vld [vmem:[%s11671_s1 + $0x2280] sm:$0xff] }
 0x245   :  { %4028 = vmatprep.mubr.f32.mxu1 %v82_v2  ;;  %6230 = vmatprep.subr.mxu0 %v1230_v3  ;;  %v1232_v63 = vld [vmem:[%s11671_s1 + $0x2308] sm:$0xff]  ;;  %v1247_v1 = vld [vmem:[%s11671_s1 + $0x2380] sm:$0xff] }
 0x246   :  { %6265 = vmatprep.subr.mxu1 %v1262_v4  ;;  %4029 = vmatmul.mubr.f32.vlgmr.msra.gmra.mxu1 %v81_v5  ;;  %v1199_v2 = vld [vmem:[%s11671_s1 + $0x2200] sm:$0xff]  ;;  %v84_v3 = vld [vmem:[%s11670_s0 + $0x228] sm:$0xff] }
 0x247   :  { %6231 = vmatpush3.msra.mxu0 %v1214_v6  ;;  %6266 = vmatpush3.msra.mxu1 %v1246_v7  ;;  %v1231_v4 = vld [vmem:[%s11671_s1 + $0x2300] sm:$0xff]  ;;  %v86_v6 = vld [vmem:[%s11670_s0 + $0x238] sm:$0xff] }
 0x248   :  { %6232 = vmatprep.subr.mxu0 %v1229_v8  ;;  %6267 = vmatprep.subr.mxu1 %v1261_v9  ;;  %v83_v5 = vld [vmem:[%s11670_s0 + $0x220] sm:$0xff]  ;;  %v1294_v7 = vld [vmem:[%s11671_s1 + $0x24f8] sm:$0xff]  ;;  %v85_v9 = vld [vmem:[%s11670_s0 + $0x230] sm:$0xff] }
 0x249   :  { %6233 = vmatpush3.msra.mxu0 %v1213_v10  ;;  %6268 = vmatpush3.msra.mxu1 %v1245_v11  ;;  %v1326_v8 = vld [vmem:[%s11671_s1 + $0x25f8] sm:$0xff] }
 0x24a   :  { %6234 = vmatprep.subr.mxu0 %v1228_v12  ;;  %6269 = vmatprep.subr.mxu1 %v1260_v13  ;;  %v1278_v10 = vld [vmem:[%s11671_s1 + $0x2478] sm:$0xff]  ;;  %v1293_v12 = vld [vmem:[%s11671_s1 + $0x24f0] sm:$0xff] }
 0x24b   :  { %6235 = vmatpush3.msra.mxu0 %v1212_v14  ;;  %6270 = vmatpush3.msra.mxu1 %v1244_v15  ;;  %v1310_v11 = vld [vmem:[%s11671_s1 + $0x2578] sm:$0xff]  ;;  %v1325_v13 = vld [vmem:[%s11671_s1 + $0x25f0] sm:$0xff] }
 0x24c   :  { %6236 = vmatprep.subr.mxu0 %v1227_v16  ;;  %6271 = vmatprep.subr.mxu1 %v1259_v17  ;;  %v1277_v14 = vld [vmem:[%s11671_s1 + $0x2470] sm:$0xff]  ;;  %v1292_v16 = vld [vmem:[%s11671_s1 + $0x24e8] sm:$0xff] }
 0x24d   :  { %6237 = vmatpush3.msra.mxu0 %v1211_v18  ;;  %6272 = vmatpush3.msra.mxu1 %v1243_v19  ;;  %v1309_v15 = vld [vmem:[%s11671_s1 + $0x2570] sm:$0xff]  ;;  %v1324_v17 = vld [vmem:[%s11671_s1 + $0x25e8] sm:$0xff] }
 0x24e   :  { %6238 = vmatprep.subr.mxu0 %v1226_v20  ;;  %6273 = vmatprep.subr.mxu1 %v1258_v21  ;;  %v1276_v18 = vld [vmem:[%s11671_s1 + $0x2468] sm:$0xff]  ;;  %v1291_v20 = vld [vmem:[%s11671_s1 + $0x24e0] sm:$0xff] }
 0x24f   :  { %6239 = vmatpush3.msra.mxu0 %v1210_v22  ;;  %6274 = vmatpush3.msra.mxu1 %v1242_v23  ;;  %v1308_v19 = vld [vmem:[%s11671_s1 + $0x2568] sm:$0xff]  ;;  %v1323_v21 = vld [vmem:[%s11671_s1 + $0x25e0] sm:$0xff] }
 0x250   :  { %6240 = vmatprep.subr.mxu0 %v1225_v24  ;;  %6275 = vmatprep.subr.mxu1 %v1257_v25  ;;  %v1275_v22 = vld [vmem:[%s11671_s1 + $0x2460] sm:$0xff]  ;;  %v1290_v24 = vld [vmem:[%s11671_s1 + $0x24d8] sm:$0xff] }
 0x251   :  { %6241 = vmatpush3.msra.mxu0 %v1209_v26  ;;  %6276 = vmatpush3.msra.mxu1 %v1241_v27  ;;  %v1307_v23 = vld [vmem:[%s11671_s1 + $0x2560] sm:$0xff]  ;;  %v1322_v25 = vld [vmem:[%s11671_s1 + $0x25d8] sm:$0xff] }
 0x252   :  { %6242 = vmatprep.subr.mxu0 %v1224_v28  ;;  %6277 = vmatprep.subr.mxu1 %v1256_v29  ;;  %v1274_v26 = vld [vmem:[%s11671_s1 + $0x2458] sm:$0xff]  ;;  %v1289_v28 = vld [vmem:[%s11671_s1 + $0x24d0] sm:$0xff] }
 0x253   :  { %6243 = vmatpush3.msra.mxu0 %v1208_v30  ;;  %6278 = vmatpush3.msra.mxu1 %v1240_v31  ;;  %v1306_v27 = vld [vmem:[%s11671_s1 + $0x2558] sm:$0xff]  ;;  %v1321_v29 = vld [vmem:[%s11671_s1 + $0x25d0] sm:$0xff] }
 0x254   :  { %6244 = vmatprep.subr.mxu0 %v1223_v32  ;;  %6279 = vmatprep.subr.mxu1 %v1255_v33  ;;  %v1273_v30 = vld [vmem:[%s11671_s1 + $0x2450] sm:$0xff]  ;;  %v1288_v32 = vld [vmem:[%s11671_s1 + $0x24c8] sm:$0xff] }
 0x255   :  { %6245 = vmatpush3.msra.mxu0 %v1207_v34  ;;  %6280 = vmatpush3.msra.mxu1 %v1239_v35  ;;  %v1305_v31 = vld [vmem:[%s11671_s1 + $0x2550] sm:$0xff]  ;;  %v1320_v33 = vld [vmem:[%s11671_s1 + $0x25c8] sm:$0xff] }
 0x256   :  { %6246 = vmatprep.subr.mxu0 %v1222_v36  ;;  %6281 = vmatprep.subr.mxu1 %v1254_v37  ;;  %v1272_v34 = vld [vmem:[%s11671_s1 + $0x2448] sm:$0xff]  ;;  %v1287_v36 = vld [vmem:[%s11671_s1 + $0x24c0] sm:$0xff] }
 0x257   :  { %6247 = vmatpush3.msra.mxu0 %v1206_v38  ;;  %6282 = vmatpush3.msra.mxu1 %v1238_v39  ;;  %v1304_v35 = vld [vmem:[%s11671_s1 + $0x2548] sm:$0xff]  ;;  %v1319_v37 = vld [vmem:[%s11671_s1 + $0x25c0] sm:$0xff] }
 0x258   :  { %6248 = vmatprep.subr.mxu0 %v1221_v40  ;;  %6283 = vmatprep.subr.mxu1 %v1253_v41  ;;  %v1271_v38 = vld [vmem:[%s11671_s1 + $0x2440] sm:$0xff]  ;;  %v1286_v40 = vld [vmem:[%s11671_s1 + $0x24b8] sm:$0xff] }
 0x259   :  { %6249 = vmatpush3.msra.mxu0 %v1205_v42  ;;  %6284 = vmatpush3.msra.mxu1 %v1237_v43  ;;  %v1303_v39 = vld [vmem:[%s11671_s1 + $0x2540] sm:$0xff]  ;;  %v1318_v41 = vld [vmem:[%s11671_s1 + $0x25b8] sm:$0xff] }
 0x25a   :  { %6250 = vmatprep.subr.mxu0 %v1220_v44  ;;  %6285 = vmatprep.subr.mxu1 %v1252_v45  ;;  %v1270_v42 = vld [vmem:[%s11671_s1 + $0x2438] sm:$0xff]  ;;  %v1285_v44 = vld [vmem:[%s11671_s1 + $0x24b0] sm:$0xff] }
 0x25b   :  { %6251 = vmatpush3.msra.mxu0 %v1204_v46  ;;  %6286 = vmatpush3.msra.mxu1 %v1236_v47  ;;  %v1302_v43 = vld [vmem:[%s11671_s1 + $0x2538] sm:$0xff]  ;;  %v1317_v45 = vld [vmem:[%s11671_s1 + $0x25b0] sm:$0xff] }
 0x25c   :  { %6252 = vmatprep.subr.mxu0 %v1219_v48  ;;  %6287 = vmatprep.subr.mxu1 %v1251_v49  ;;  %v1269_v46 = vld [vmem:[%s11671_s1 + $0x2430] sm:$0xff]  ;;  %v1284_v48 = vld [vmem:[%s11671_s1 + $0x24a8] sm:$0xff] }
 0x25d   :  { %6253 = vmatpush3.msra.mxu0 %v1203_v50  ;;  %6288 = vmatpush3.msra.mxu1 %v1235_v51  ;;  %v1301_v47 = vld [vmem:[%s11671_s1 + $0x2530] sm:$0xff]  ;;  %v1316_v49 = vld [vmem:[%s11671_s1 + $0x25a8] sm:$0xff] }
 0x25e   :  { %6254 = vmatprep.subr.mxu0 %v1218_v52  ;;  %6289 = vmatprep.subr.mxu1 %v1250_v53  ;;  %v1268_v50 = vld [vmem:[%s11671_s1 + $0x2428] sm:$0xff]  ;;  %v1283_v52 = vld [vmem:[%s11671_s1 + $0x24a0] sm:$0xff] }
 0x25f   :  { %6255 = vmatpush3.msra.mxu0 %v1202_v54  ;;  %6290 = vmatpush3.msra.mxu1 %v1234_v55  ;;  %v1300_v51 = vld [vmem:[%s11671_s1 + $0x2528] sm:$0xff]  ;;  %v1315_v53 = vld [vmem:[%s11671_s1 + $0x25a0] sm:$0xff] }
 0x260   :  { %6256 = vmatprep.subr.mxu0 %v1217_v56  ;;  %6291 = vmatprep.subr.mxu1 %v1249_v57  ;;  %v1267_v54 = vld [vmem:[%s11671_s1 + $0x2420] sm:$0xff]  ;;  %v1282_v56 = vld [vmem:[%s11671_s1 + $0x2498] sm:$0xff] }
 0x261   :  { %6257 = vmatpush3.msra.mxu0 %v1201_v58  ;;  %6292 = vmatpush3.msra.mxu1 %v1233_v59  ;;  %v1299_v55 = vld [vmem:[%s11671_s1 + $0x2520] sm:$0xff]  ;;  %v1314_v57 = vld [vmem:[%s11671_s1 + $0x2598] sm:$0xff] }
 0x262   :  { %6258 = vmatprep.subr.mxu0 %v1216_v60  ;;  %6293 = vmatprep.subr.mxu1 %v1248_v61  ;;  %v1266_v58 = vld [vmem:[%s11671_s1 + $0x2418] sm:$0xff]  ;;  %v1281_v60 = vld [vmem:[%s11671_s1 + $0x2490] sm:$0xff] }
 0x263   :  { %6259 = vmatpush3.msra.mxu0 %v1200_v62  ;;  %6294 = vmatpush3.msra.mxu1 %v1232_v63  ;;  %v1298_v59 = vld [vmem:[%s11671_s1 + $0x2518] sm:$0xff]  ;;  %v1313_v61 = vld [vmem:[%s11671_s1 + $0x2590] sm:$0xff] }
 0x264   :  { %6260 = vmatprep.subr.mxu0 %v1215_v0  ;;  %6295 = vmatprep.subr.mxu1 %v1247_v1  ;;  %v1265_v62 = vld [vmem:[%s11671_s1 + $0x2410] sm:$0xff]  ;;  %v1280_v0 = vld [vmem:[%s11671_s1 + $0x2488] sm:$0xff] }
 0x265   :  { %6261 = vmatpush3.msra.mxu0 %v1199_v2  ;;  %4098 = vmatprep.mubr.f32.mxu0 %v84_v3  ;;  %v1297_v63 = vld [vmem:[%s11671_s1 + $0x2510] sm:$0xff]  ;;  %v1312_v1 = vld [vmem:[%s11671_s1 + $0x2588] sm:$0xff] }
 0x266   :  { %6296 = vmatpush3.msra.mxu1 %v1231_v4  ;;  %4099 = vmatmul.mubr.f32.vlgmr.msra.gmra.mxu0 %v83_v5  ;;  %v1264_v2 = vld [vmem:[%s11671_s1 + $0x2408] sm:$0xff]  ;;  %v1279_v4 = vld [vmem:[%s11671_s1 + $0x2480] sm:$0xff] }
 0x267   :  { %4168 = vmatprep.mubr.f32.mxu1 %v86_v6  ;;  %6300 = vmatprep.subr.mxu0 %v1294_v7  ;;  %v1296_v3 = vld [vmem:[%s11671_s1 + $0x2508] sm:$0xff]  ;;  %v1311_v5 = vld [vmem:[%s11671_s1 + $0x2580] sm:$0xff] }
 0x268   :  { %6335 = vmatprep.subr.mxu1 %v1326_v8  ;;  %4169 = vmatmul.mubr.f32.vlgmr.msra.gmra.mxu1 %v85_v9  ;;  %v1263_v6 = vld [vmem:[%s11671_s1 + $0x2400] sm:$0xff]  ;;  %v88_v7 = vld [vmem:[%s11670_s0 + $0x248] sm:$0xff] }
 0x269   :  { %6301 = vmatpush3.msra.mxu0 %v1278_v10  ;;  %6336 = vmatpush3.msra.mxu1 %v1310_v11  ;;  %v1295_v8 = vld [vmem:[%s11671_s1 + $0x2500] sm:$0xff]  ;;  %v90_v10 = vld [vmem:[%s11670_s0 + $0x258] sm:$0xff] }
 0x26a   :  { %6302 = vmatprep.subr.mxu0 %v1293_v12  ;;  %6337 = vmatprep.subr.mxu1 %v1325_v13  ;;  %v87_v9 = vld [vmem:[%s11670_s0 + $0x240] sm:$0xff]  ;;  %v1358_v11 = vld [vmem:[%s11671_s1 + $0x26f8] sm:$0xff]  ;;  %v89_v13 = vld [vmem:[%s11670_s0 + $0x250] sm:$0xff] }
 0x26b   :  { %6303 = vmatpush3.msra.mxu0 %v1277_v14  ;;  %6338 = vmatpush3.msra.mxu1 %v1309_v15  ;;  %v1390_v12 = vld [vmem:[%s11671_s1 + $0x27f8] sm:$0xff] }
 0x26c   :  { %6304 = vmatprep.subr.mxu0 %v1292_v16  ;;  %6339 = vmatprep.subr.mxu1 %v1324_v17  ;;  %v1342_v14 = vld [vmem:[%s11671_s1 + $0x2678] sm:$0xff]  ;;  %v1357_v16 = vld [vmem:[%s11671_s1 + $0x26f0] sm:$0xff] }
 0x26d   :  { %6305 = vmatpush3.msra.mxu0 %v1276_v18  ;;  %6340 = vmatpush3.msra.mxu1 %v1308_v19  ;;  %v1374_v15 = vld [vmem:[%s11671_s1 + $0x2778] sm:$0xff]  ;;  %v1389_v17 = vld [vmem:[%s11671_s1 + $0x27f0] sm:$0xff] }
 0x26e   :  { %6306 = vmatprep.subr.mxu0 %v1291_v20  ;;  %6341 = vmatprep.subr.mxu1 %v1323_v21  ;;  %v1341_v18 = vld [vmem:[%s11671_s1 + $0x2670] sm:$0xff]  ;;  %v1356_v20 = vld [vmem:[%s11671_s1 + $0x26e8] sm:$0xff] }
 0x26f   :  { %6307 = vmatpush3.msra.mxu0 %v1275_v22  ;;  %6342 = vmatpush3.msra.mxu1 %v1307_v23  ;;  %v1373_v19 = vld [vmem:[%s11671_s1 + $0x2770] sm:$0xff]  ;;  %v1388_v21 = vld [vmem:[%s11671_s1 + $0x27e8] sm:$0xff] }
 0x270   :  { %6308 = vmatprep.subr.mxu0 %v1290_v24  ;;  %6343 = vmatprep.subr.mxu1 %v1322_v25  ;;  %v1340_v22 = vld [vmem:[%s11671_s1 + $0x2668] sm:$0xff]  ;;  %v1355_v24 = vld [vmem:[%s11671_s1 + $0x26e0] sm:$0xff] }
 0x271   :  { %6309 = vmatpush3.msra.mxu0 %v1274_v26  ;;  %6344 = vmatpush3.msra.mxu1 %v1306_v27  ;;  %v1372_v23 = vld [vmem:[%s11671_s1 + $0x2768] sm:$0xff]  ;;  %v1387_v25 = vld [vmem:[%s11671_s1 + $0x27e0] sm:$0xff] }
 0x272   :  { %6310 = vmatprep.subr.mxu0 %v1289_v28  ;;  %6345 = vmatprep.subr.mxu1 %v1321_v29  ;;  %v1339_v26 = vld [vmem:[%s11671_s1 + $0x2660] sm:$0xff]  ;;  %v1354_v28 = vld [vmem:[%s11671_s1 + $0x26d8] sm:$0xff] }
 0x273   :  { %6311 = vmatpush3.msra.mxu0 %v1273_v30  ;;  %6346 = vmatpush3.msra.mxu1 %v1305_v31  ;;  %v1371_v27 = vld [vmem:[%s11671_s1 + $0x2760] sm:$0xff]  ;;  %v1386_v29 = vld [vmem:[%s11671_s1 + $0x27d8] sm:$0xff] }
 0x274   :  { %6312 = vmatprep.subr.mxu0 %v1288_v32  ;;  %6347 = vmatprep.subr.mxu1 %v1320_v33  ;;  %v1338_v30 = vld [vmem:[%s11671_s1 + $0x2658] sm:$0xff]  ;;  %v1353_v32 = vld [vmem:[%s11671_s1 + $0x26d0] sm:$0xff] }
 0x275   :  { %6313 = vmatpush3.msra.mxu0 %v1272_v34  ;;  %6348 = vmatpush3.msra.mxu1 %v1304_v35  ;;  %v1370_v31 = vld [vmem:[%s11671_s1 + $0x2758] sm:$0xff]  ;;  %v1385_v33 = vld [vmem:[%s11671_s1 + $0x27d0] sm:$0xff] }
 0x276   :  { %6314 = vmatprep.subr.mxu0 %v1287_v36  ;;  %6349 = vmatprep.subr.mxu1 %v1319_v37  ;;  %v1337_v34 = vld [vmem:[%s11671_s1 + $0x2650] sm:$0xff]  ;;  %v1352_v36 = vld [vmem:[%s11671_s1 + $0x26c8] sm:$0xff] }
 0x277   :  { %6315 = vmatpush3.msra.mxu0 %v1271_v38  ;;  %6350 = vmatpush3.msra.mxu1 %v1303_v39  ;;  %v1369_v35 = vld [vmem:[%s11671_s1 + $0x2750] sm:$0xff]  ;;  %v1384_v37 = vld [vmem:[%s11671_s1 + $0x27c8] sm:$0xff] }
 0x278   :  { %6316 = vmatprep.subr.mxu0 %v1286_v40  ;;  %6351 = vmatprep.subr.mxu1 %v1318_v41  ;;  %v1336_v38 = vld [vmem:[%s11671_s1 + $0x2648] sm:$0xff]  ;;  %v1351_v40 = vld [vmem:[%s11671_s1 + $0x26c0] sm:$0xff] }
 0x279   :  { %6317 = vmatpush3.msra.mxu0 %v1270_v42  ;;  %6352 = vmatpush3.msra.mxu1 %v1302_v43  ;;  %v1368_v39 = vld [vmem:[%s11671_s1 + $0x2748] sm:$0xff]  ;;  %v1383_v41 = vld [vmem:[%s11671_s1 + $0x27c0] sm:$0xff] }
 0x27a   :  { %6318 = vmatprep.subr.mxu0 %v1285_v44  ;;  %6353 = vmatprep.subr.mxu1 %v1317_v45  ;;  %v1335_v42 = vld [vmem:[%s11671_s1 + $0x2640] sm:$0xff]  ;;  %v1350_v44 = vld [vmem:[%s11671_s1 + $0x26b8] sm:$0xff] }
 0x27b   :  { %6319 = vmatpush3.msra.mxu0 %v1269_v46  ;;  %6354 = vmatpush3.msra.mxu1 %v1301_v47  ;;  %v1367_v43 = vld [vmem:[%s11671_s1 + $0x2740] sm:$0xff]  ;;  %v1382_v45 = vld [vmem:[%s11671_s1 + $0x27b8] sm:$0xff] }
 0x27c   :  { %6320 = vmatprep.subr.mxu0 %v1284_v48  ;;  %6355 = vmatprep.subr.mxu1 %v1316_v49  ;;  %v1334_v46 = vld [vmem:[%s11671_s1 + $0x2638] sm:$0xff]  ;;  %v1349_v48 = vld [vmem:[%s11671_s1 + $0x26b0] sm:$0xff] }
 0x27d   :  { %6321 = vmatpush3.msra.mxu0 %v1268_v50  ;;  %6356 = vmatpush3.msra.mxu1 %v1300_v51  ;;  %v1366_v47 = vld [vmem:[%s11671_s1 + $0x2738] sm:$0xff]  ;;  %v1381_v49 = vld [vmem:[%s11671_s1 + $0x27b0] sm:$0xff] }
 0x27e   :  { %6322 = vmatprep.subr.mxu0 %v1283_v52  ;;  %6357 = vmatprep.subr.mxu1 %v1315_v53  ;;  %v1333_v50 = vld [vmem:[%s11671_s1 + $0x2630] sm:$0xff]  ;;  %v1348_v52 = vld [vmem:[%s11671_s1 + $0x26a8] sm:$0xff] }
 0x27f   :  { %6323 = vmatpush3.msra.mxu0 %v1267_v54  ;;  %6358 = vmatpush3.msra.mxu1 %v1299_v55  ;;  %v1365_v51 = vld [vmem:[%s11671_s1 + $0x2730] sm:$0xff]  ;;  %v1380_v53 = vld [vmem:[%s11671_s1 + $0x27a8] sm:$0xff] }
 0x280   :  { %6324 = vmatprep.subr.mxu0 %v1282_v56  ;;  %6359 = vmatprep.subr.mxu1 %v1314_v57  ;;  %v1332_v54 = vld [vmem:[%s11671_s1 + $0x2628] sm:$0xff]  ;;  %v1347_v56 = vld [vmem:[%s11671_s1 + $0x26a0] sm:$0xff] }
 0x281   :  { %6325 = vmatpush3.msra.mxu0 %v1266_v58  ;;  %6360 = vmatpush3.msra.mxu1 %v1298_v59  ;;  %v1364_v55 = vld [vmem:[%s11671_s1 + $0x2728] sm:$0xff]  ;;  %v1379_v57 = vld [vmem:[%s11671_s1 + $0x27a0] sm:$0xff] }
 0x282   :  { %6326 = vmatprep.subr.mxu0 %v1281_v60  ;;  %6361 = vmatprep.subr.mxu1 %v1313_v61  ;;  %v1331_v58 = vld [vmem:[%s11671_s1 + $0x2620] sm:$0xff]  ;;  %v1346_v60 = vld [vmem:[%s11671_s1 + $0x2698] sm:$0xff] }
 0x283   :  { %6327 = vmatpush3.msra.mxu0 %v1265_v62  ;;  %6362 = vmatpush3.msra.mxu1 %v1297_v63  ;;  %v1363_v59 = vld [vmem:[%s11671_s1 + $0x2720] sm:$0xff]  ;;  %v1378_v61 = vld [vmem:[%s11671_s1 + $0x2798] sm:$0xff] }
 0x284   :  { %6328 = vmatprep.subr.mxu0 %v1280_v0  ;;  %6363 = vmatprep.subr.mxu1 %v1312_v1  ;;  %v1330_v62 = vld [vmem:[%s11671_s1 + $0x2618] sm:$0xff]  ;;  %v1345_v0 = vld [vmem:[%s11671_s1 + $0x2690] sm:$0xff] }
 0x285   :  { %6329 = vmatpush3.msra.mxu0 %v1264_v2  ;;  %6364 = vmatpush3.msra.mxu1 %v1296_v3  ;;  %v1362_v63 = vld [vmem:[%s11671_s1 + $0x2718] sm:$0xff]  ;;  %v1377_v1 = vld [vmem:[%s11671_s1 + $0x2790] sm:$0xff] }
 0x286   :  { %6330 = vmatprep.subr.mxu0 %v1279_v4  ;;  %6365 = vmatprep.subr.mxu1 %v1311_v5  ;;  %v1329_v2 = vld [vmem:[%s11671_s1 + $0x2610] sm:$0xff]  ;;  %v1344_v4 = vld [vmem:[%s11671_s1 + $0x2688] sm:$0xff] }
 0x287   :  { %6331 = vmatpush3.msra.mxu0 %v1263_v6  ;;  %4238 = vmatprep.mubr.f32.mxu0 %v88_v7  ;;  %v1361_v3 = vld [vmem:[%s11671_s1 + $0x2710] sm:$0xff]  ;;  %v1376_v5 = vld [vmem:[%s11671_s1 + $0x2788] sm:$0xff] }
 0x288   :  { %6366 = vmatpush3.msra.mxu1 %v1295_v8  ;;  %4239 = vmatmul.mubr.f32.vlgmr.msra.gmra.mxu0 %v87_v9  ;;  %v1328_v6 = vld [vmem:[%s11671_s1 + $0x2608] sm:$0xff]  ;;  %v1343_v8 = vld [vmem:[%s11671_s1 + $0x2680] sm:$0xff] }
 0x289   :  { %4308 = vmatprep.mubr.f32.mxu1 %v90_v10  ;;  %6370 = vmatprep.subr.mxu0 %v1358_v11  ;;  %v1360_v7 = vld [vmem:[%s11671_s1 + $0x2708] sm:$0xff]  ;;  %v1375_v9 = vld [vmem:[%s11671_s1 + $0x2780] sm:$0xff] }
 0x28a   :  { %6405 = vmatprep.subr.mxu1 %v1390_v12  ;;  %4309 = vmatmul.mubr.f32.vlgmr.msra.gmra.mxu1 %v89_v13  ;;  %v1327_v10 = vld [vmem:[%s11671_s1 + $0x2600] sm:$0xff]  ;;  %v92_v11 = vld [vmem:[%s11670_s0 + $0x268] sm:$0xff] }
 0x28b   :  { %6371 = vmatpush3.msra.mxu0 %v1342_v14  ;;  %6406 = vmatpush3.msra.mxu1 %v1374_v15  ;;  %v1359_v12 = vld [vmem:[%s11671_s1 + $0x2700] sm:$0xff]  ;;  %v94_v14 = vld [vmem:[%s11670_s0 + $0x278] sm:$0xff] }
 0x28c   :  { %6372 = vmatprep.subr.mxu0 %v1357_v16  ;;  %6407 = vmatprep.subr.mxu1 %v1389_v17  ;;  %v91_v13 = vld [vmem:[%s11670_s0 + $0x260] sm:$0xff]  ;;  %v1422_v15 = vld [vmem:[%s11671_s1 + $0x28f8] sm:$0xff]  ;;  %v93_v17 = vld [vmem:[%s11670_s0 + $0x270] sm:$0xff] }
 0x28d   :  { %6373 = vmatpush3.msra.mxu0 %v1341_v18  ;;  %6408 = vmatpush3.msra.mxu1 %v1373_v19  ;;  %v1454_v16 = vld [vmem:[%s11671_s1 + $0x29f8] sm:$0xff] }
 0x28e   :  { %6374 = vmatprep.subr.mxu0 %v1356_v20  ;;  %6409 = vmatprep.subr.mxu1 %v1388_v21  ;;  %v1406_v18 = vld [vmem:[%s11671_s1 + $0x2878] sm:$0xff]  ;;  %v1421_v20 = vld [vmem:[%s11671_s1 + $0x28f0] sm:$0xff] }
 0x28f   :  { %6375 = vmatpush3.msra.mxu0 %v1340_v22  ;;  %6410 = vmatpush3.msra.mxu1 %v1372_v23  ;;  %v1438_v19 = vld [vmem:[%s11671_s1 + $0x2978] sm:$0xff]  ;;  %v1453_v21 = vld [vmem:[%s11671_s1 + $0x29f0] sm:$0xff] }
 0x290   :  { %6376 = vmatprep.subr.mxu0 %v1355_v24  ;;  %6411 = vmatprep.subr.mxu1 %v1387_v25  ;;  %v1405_v22 = vld [vmem:[%s11671_s1 + $0x2870] sm:$0xff]  ;;  %v1420_v24 = vld [vmem:[%s11671_s1 + $0x28e8] sm:$0xff] }
 0x291   :  { %6377 = vmatpush3.msra.mxu0 %v1339_v26  ;;  %6412 = vmatpush3.msra.mxu1 %v1371_v27  ;;  %v1437_v23 = vld [vmem:[%s11671_s1 + $0x2970] sm:$0xff]  ;;  %v1452_v25 = vld [vmem:[%s11671_s1 + $0x29e8] sm:$0xff] }
 0x292   :  { %6378 = vmatprep.subr.mxu0 %v1354_v28  ;;  %6413 = vmatprep.subr.mxu1 %v1386_v29  ;;  %v1404_v26 = vld [vmem:[%s11671_s1 + $0x2868] sm:$0xff]  ;;  %v1419_v28 = vld [vmem:[%s11671_s1 + $0x28e0] sm:$0xff] }
 0x293   :  { %6379 = vmatpush3.msra.mxu0 %v1338_v30  ;;  %6414 = vmatpush3.msra.mxu1 %v1370_v31  ;;  %v1436_v27 = vld [vmem:[%s11671_s1 + $0x2968] sm:$0xff]  ;;  %v1451_v29 = vld [vmem:[%s11671_s1 + $0x29e0] sm:$0xff] }
 0x294   :  { %6380 = vmatprep.subr.mxu0 %v1353_v32  ;;  %6415 = vmatprep.subr.mxu1 %v1385_v33  ;;  %v1403_v30 = vld [vmem:[%s11671_s1 + $0x2860] sm:$0xff]  ;;  %v1418_v32 = vld [vmem:[%s11671_s1 + $0x28d8] sm:$0xff] }
 0x295   :  { %6381 = vmatpush3.msra.mxu0 %v1337_v34  ;;  %6416 = vmatpush3.msra.mxu1 %v1369_v35  ;;  %v1435_v31 = vld [vmem:[%s11671_s1 + $0x2960] sm:$0xff]  ;;  %v1450_v33 = vld [vmem:[%s11671_s1 + $0x29d8] sm:$0xff] }
 0x296   :  { %6382 = vmatprep.subr.mxu0 %v1352_v36  ;;  %6417 = vmatprep.subr.mxu1 %v1384_v37  ;;  %v1402_v34 = vld [vmem:[%s11671_s1 + $0x2858] sm:$0xff]  ;;  %v1417_v36 = vld [vmem:[%s11671_s1 + $0x28d0] sm:$0xff] }
 0x297   :  { %6383 = vmatpush3.msra.mxu0 %v1336_v38  ;;  %6418 = vmatpush3.msra.mxu1 %v1368_v39  ;;  %v1434_v35 = vld [vmem:[%s11671_s1 + $0x2958] sm:$0xff]  ;;  %v1449_v37 = vld [vmem:[%s11671_s1 + $0x29d0] sm:$0xff] }
 0x298   :  { %6384 = vmatprep.subr.mxu0 %v1351_v40  ;;  %6419 = vmatprep.subr.mxu1 %v1383_v41  ;;  %v1401_v38 = vld [vmem:[%s11671_s1 + $0x2850] sm:$0xff]  ;;  %v1416_v40 = vld [vmem:[%s11671_s1 + $0x28c8] sm:$0xff] }
 0x299   :  { %6385 = vmatpush3.msra.mxu0 %v1335_v42  ;;  %6420 = vmatpush3.msra.mxu1 %v1367_v43  ;;  %v1433_v39 = vld [vmem:[%s11671_s1 + $0x2950] sm:$0xff]  ;;  %v1448_v41 = vld [vmem:[%s11671_s1 + $0x29c8] sm:$0xff] }
 0x29a   :  { %6386 = vmatprep.subr.mxu0 %v1350_v44  ;;  %6421 = vmatprep.subr.mxu1 %v1382_v45  ;;  %v1400_v42 = vld [vmem:[%s11671_s1 + $0x2848] sm:$0xff]  ;;  %v1415_v44 = vld [vmem:[%s11671_s1 + $0x28c0] sm:$0xff] }
 0x29b   :  { %6387 = vmatpush3.msra.mxu0 %v1334_v46  ;;  %6422 = vmatpush3.msra.mxu1 %v1366_v47  ;;  %v1432_v43 = vld [vmem:[%s11671_s1 + $0x2948] sm:$0xff]  ;;  %v1447_v45 = vld [vmem:[%s11671_s1 + $0x29c0] sm:$0xff] }
 0x29c   :  { %6388 = vmatprep.subr.mxu0 %v1349_v48  ;;  %6423 = vmatprep.subr.mxu1 %v1381_v49  ;;  %v1399_v46 = vld [vmem:[%s11671_s1 + $0x2840] sm:$0xff]  ;;  %v1414_v48 = vld [vmem:[%s11671_s1 + $0x28b8] sm:$0xff] }
 0x29d   :  { %6389 = vmatpush3.msra.mxu0 %v1333_v50  ;;  %6424 = vmatpush3.msra.mxu1 %v1365_v51  ;;  %v1431_v47 = vld [vmem:[%s11671_s1 + $0x2940] sm:$0xff]  ;;  %v1446_v49 = vld [vmem:[%s11671_s1 + $0x29b8] sm:$0xff] }
 0x29e   :  { %6390 = vmatprep.subr.mxu0 %v1348_v52  ;;  %6425 = vmatprep.subr.mxu1 %v1380_v53  ;;  %v1398_v50 = vld [vmem:[%s11671_s1 + $0x2838] sm:$0xff]  ;;  %v1413_v52 = vld [vmem:[%s11671_s1 + $0x28b0] sm:$0xff] }
 0x29f   :  { %6391 = vmatpush3.msra.mxu0 %v1332_v54  ;;  %6426 = vmatpush3.msra.mxu1 %v1364_v55  ;;  %v1430_v51 = vld [vmem:[%s11671_s1 + $0x2938] sm:$0xff]  ;;  %v1445_v53 = vld [vmem:[%s11671_s1 + $0x29b0] sm:$0xff] }
 0x2a0   :  { %6392 = vmatprep.subr.mxu0 %v1347_v56  ;;  %6427 = vmatprep.subr.mxu1 %v1379_v57  ;;  %v1397_v54 = vld [vmem:[%s11671_s1 + $0x2830] sm:$0xff]  ;;  %v1412_v56 = vld [vmem:[%s11671_s1 + $0x28a8] sm:$0xff] }
 0x2a1   :  { %6393 = vmatpush3.msra.mxu0 %v1331_v58  ;;  %6428 = vmatpush3.msra.mxu1 %v1363_v59  ;;  %v1429_v55 = vld [vmem:[%s11671_s1 + $0x2930] sm:$0xff]  ;;  %v1444_v57 = vld [vmem:[%s11671_s1 + $0x29a8] sm:$0xff] }
 0x2a2   :  { %6394 = vmatprep.subr.mxu0 %v1346_v60  ;;  %6429 = vmatprep.subr.mxu1 %v1378_v61  ;;  %v1396_v58 = vld [vmem:[%s11671_s1 + $0x2828] sm:$0xff]  ;;  %v1411_v60 = vld [vmem:[%s11671_s1 + $0x28a0] sm:$0xff] }
 0x2a3   :  { %6395 = vmatpush3.msra.mxu0 %v1330_v62  ;;  %6430 = vmatpush3.msra.mxu1 %v1362_v63  ;;  %v1428_v59 = vld [vmem:[%s11671_s1 + $0x2928] sm:$0xff]  ;;  %v1443_v61 = vld [vmem:[%s11671_s1 + $0x29a0] sm:$0xff] }
 0x2a4   :  { %6396 = vmatprep.subr.mxu0 %v1345_v0  ;;  %6431 = vmatprep.subr.mxu1 %v1377_v1  ;;  %v1395_v62 = vld [vmem:[%s11671_s1 + $0x2820] sm:$0xff]  ;;  %v1410_v0 = vld [vmem:[%s11671_s1 + $0x2898] sm:$0xff] }
 0x2a5   :  { %6397 = vmatpush3.msra.mxu0 %v1329_v2  ;;  %6432 = vmatpush3.msra.mxu1 %v1361_v3  ;;  %v1427_v63 = vld [vmem:[%s11671_s1 + $0x2920] sm:$0xff]  ;;  %v1442_v1 = vld [vmem:[%s11671_s1 + $0x2998] sm:$0xff] }
 0x2a6   :  { %6398 = vmatprep.subr.mxu0 %v1344_v4  ;;  %6433 = vmatprep.subr.mxu1 %v1376_v5  ;;  %v1394_v2 = vld [vmem:[%s11671_s1 + $0x2818] sm:$0xff]  ;;  %v1409_v4 = vld [vmem:[%s11671_s1 + $0x2890] sm:$0xff] }
 0x2a7   :  { %6399 = vmatpush3.msra.mxu0 %v1328_v6  ;;  %6434 = vmatpush3.msra.mxu1 %v1360_v7  ;;  %v1426_v3 = vld [vmem:[%s11671_s1 + $0x2918] sm:$0xff]  ;;  %v1441_v5 = vld [vmem:[%s11671_s1 + $0x2990] sm:$0xff] }
 0x2a8   :  { %6400 = vmatprep.subr.mxu0 %v1343_v8  ;;  %6435 = vmatprep.subr.mxu1 %v1375_v9  ;;  %v1393_v6 = vld [vmem:[%s11671_s1 + $0x2810] sm:$0xff]  ;;  %v1408_v8 = vld [vmem:[%s11671_s1 + $0x2888] sm:$0xff] }
 0x2a9   :  { %6401 = vmatpush3.msra.mxu0 %v1327_v10  ;;  %4378 = vmatprep.mubr.f32.mxu0 %v92_v11  ;;  %v1425_v7 = vld [vmem:[%s11671_s1 + $0x2910] sm:$0xff]  ;;  %v1440_v9 = vld [vmem:[%s11671_s1 + $0x2988] sm:$0xff] }
 0x2aa   :  { %6436 = vmatpush3.msra.mxu1 %v1359_v12  ;;  %4379 = vmatmul.mubr.f32.vlgmr.msra.gmra.mxu0 %v91_v13  ;;  %v1392_v10 = vld [vmem:[%s11671_s1 + $0x2808] sm:$0xff]  ;;  %v1407_v12 = vld [vmem:[%s11671_s1 + $0x2880] sm:$0xff] }
 0x2ab   :  { %4448 = vmatprep.mubr.f32.mxu1 %v94_v14  ;;  %6440 = vmatprep.subr.mxu0 %v1422_v15  ;;  %v1424_v11 = vld [vmem:[%s11671_s1 + $0x2908] sm:$0xff]  ;;  %v1439_v13 = vld [vmem:[%s11671_s1 + $0x2980] sm:$0xff] }
 0x2ac   :  { %6475 = vmatprep.subr.mxu1 %v1454_v16  ;;  %4449 = vmatmul.mubr.f32.vlgmr.msra.gmra.mxu1 %v93_v17  ;;  %v1391_v14 = vld [vmem:[%s11671_s1 + $0x2800] sm:$0xff]  ;;  %v96_v15 = vld [vmem:[%s11670_s0 + $0x288] sm:$0xff] }
 0x2ad   :  { %6441 = vmatpush3.msra.mxu0 %v1406_v18  ;;  %6476 = vmatpush3.msra.mxu1 %v1438_v19  ;;  %v1423_v16 = vld [vmem:[%s11671_s1 + $0x2900] sm:$0xff]  ;;  %v98_v18 = vld [vmem:[%s11670_s0 + $0x298] sm:$0xff] }
 0x2ae   :  { %6442 = vmatprep.subr.mxu0 %v1421_v20  ;;  %6477 = vmatprep.subr.mxu1 %v1453_v21  ;;  %v95_v17 = vld [vmem:[%s11670_s0 + $0x280] sm:$0xff]  ;;  %v1486_v19 = vld [vmem:[%s11671_s1 + $0x2af8] sm:$0xff]  ;;  %v97_v21 = vld [vmem:[%s11670_s0 + $0x290] sm:$0xff] }
 0x2af   :  { %6443 = vmatpush3.msra.mxu0 %v1405_v22  ;;  %6478 = vmatpush3.msra.mxu1 %v1437_v23  ;;  %v1518_v20 = vld [vmem:[%s11671_s1 + $0x2bf8] sm:$0xff] }
 0x2b0   :  { %6444 = vmatprep.subr.mxu0 %v1420_v24  ;;  %6479 = vmatprep.subr.mxu1 %v1452_v25  ;;  %v1470_v22 = vld [vmem:[%s11671_s1 + $0x2a78] sm:$0xff]  ;;  %v1485_v24 = vld [vmem:[%s11671_s1 + $0x2af0] sm:$0xff] }
 0x2b1   :  { %6445 = vmatpush3.msra.mxu0 %v1404_v26  ;;  %6480 = vmatpush3.msra.mxu1 %v1436_v27  ;;  %v1502_v23 = vld [vmem:[%s11671_s1 + $0x2b78] sm:$0xff]  ;;  %v1517_v25 = vld [vmem:[%s11671_s1 + $0x2bf0] sm:$0xff] }
 0x2b2   :  { %6446 = vmatprep.subr.mxu0 %v1419_v28  ;;  %6481 = vmatprep.subr.mxu1 %v1451_v29  ;;  %v1469_v26 = vld [vmem:[%s11671_s1 + $0x2a70] sm:$0xff]  ;;  %v1484_v28 = vld [vmem:[%s11671_s1 + $0x2ae8] sm:$0xff] }
 0x2b3   :  { %6447 = vmatpush3.msra.mxu0 %v1403_v30  ;;  %6482 = vmatpush3.msra.mxu1 %v1435_v31  ;;  %v1501_v27 = vld [vmem:[%s11671_s1 + $0x2b70] sm:$0xff]  ;;  %v1516_v29 = vld [vmem:[%s11671_s1 + $0x2be8] sm:$0xff] }
 0x2b4   :  { %6448 = vmatprep.subr.mxu0 %v1418_v32  ;;  %6483 = vmatprep.subr.mxu1 %v1450_v33  ;;  %v1468_v30 = vld [vmem:[%s11671_s1 + $0x2a68] sm:$0xff]  ;;  %v1483_v32 = vld [vmem:[%s11671_s1 + $0x2ae0] sm:$0xff] }
 0x2b5   :  { %6449 = vmatpush3.msra.mxu0 %v1402_v34  ;;  %6484 = vmatpush3.msra.mxu1 %v1434_v35  ;;  %v1500_v31 = vld [vmem:[%s11671_s1 + $0x2b68] sm:$0xff]  ;;  %v1515_v33 = vld [vmem:[%s11671_s1 + $0x2be0] sm:$0xff] }
 0x2b6   :  { %6450 = vmatprep.subr.mxu0 %v1417_v36  ;;  %6485 = vmatprep.subr.mxu1 %v1449_v37  ;;  %v1467_v34 = vld [vmem:[%s11671_s1 + $0x2a60] sm:$0xff]  ;;  %v1482_v36 = vld [vmem:[%s11671_s1 + $0x2ad8] sm:$0xff] }
 0x2b7   :  { %6451 = vmatpush3.msra.mxu0 %v1401_v38  ;;  %6486 = vmatpush3.msra.mxu1 %v1433_v39  ;;  %v1499_v35 = vld [vmem:[%s11671_s1 + $0x2b60] sm:$0xff]  ;;  %v1514_v37 = vld [vmem:[%s11671_s1 + $0x2bd8] sm:$0xff] }
 0x2b8   :  { %6452 = vmatprep.subr.mxu0 %v1416_v40  ;;  %6487 = vmatprep.subr.mxu1 %v1448_v41  ;;  %v1466_v38 = vld [vmem:[%s11671_s1 + $0x2a58] sm:$0xff]  ;;  %v1481_v40 = vld [vmem:[%s11671_s1 + $0x2ad0] sm:$0xff] }
 0x2b9   :  { %6453 = vmatpush3.msra.mxu0 %v1400_v42  ;;  %6488 = vmatpush3.msra.mxu1 %v1432_v43  ;;  %v1498_v39 = vld [vmem:[%s11671_s1 + $0x2b58] sm:$0xff]  ;;  %v1513_v41 = vld [vmem:[%s11671_s1 + $0x2bd0] sm:$0xff] }
 0x2ba   :  { %6454 = vmatprep.subr.mxu0 %v1415_v44  ;;  %6489 = vmatprep.subr.mxu1 %v1447_v45  ;;  %v1465_v42 = vld [vmem:[%s11671_s1 + $0x2a50] sm:$0xff]  ;;  %v1480_v44 = vld [vmem:[%s11671_s1 + $0x2ac8] sm:$0xff] }
 0x2bb   :  { %6455 = vmatpush3.msra.mxu0 %v1399_v46  ;;  %6490 = vmatpush3.msra.mxu1 %v1431_v47  ;;  %v1497_v43 = vld [vmem:[%s11671_s1 + $0x2b50] sm:$0xff]  ;;  %v1512_v45 = vld [vmem:[%s11671_s1 + $0x2bc8] sm:$0xff] }
 0x2bc   :  { %6456 = vmatprep.subr.mxu0 %v1414_v48  ;;  %6491 = vmatprep.subr.mxu1 %v1446_v49  ;;  %v1464_v46 = vld [vmem:[%s11671_s1 + $0x2a48] sm:$0xff]  ;;  %v1479_v48 = vld [vmem:[%s11671_s1 + $0x2ac0] sm:$0xff] }
 0x2bd   :  { %6457 = vmatpush3.msra.mxu0 %v1398_v50  ;;  %6492 = vmatpush3.msra.mxu1 %v1430_v51  ;;  %v1496_v47 = vld [vmem:[%s11671_s1 + $0x2b48] sm:$0xff]  ;;  %v1511_v49 = vld [vmem:[%s11671_s1 + $0x2bc0] sm:$0xff] }
 0x2be   :  { %6458 = vmatprep.subr.mxu0 %v1413_v52  ;;  %6493 = vmatprep.subr.mxu1 %v1445_v53  ;;  %v1463_v50 = vld [vmem:[%s11671_s1 + $0x2a40] sm:$0xff]  ;;  %v1478_v52 = vld [vmem:[%s11671_s1 + $0x2ab8] sm:$0xff] }
 0x2bf   :  { %6459 = vmatpush3.msra.mxu0 %v1397_v54  ;;  %6494 = vmatpush3.msra.mxu1 %v1429_v55  ;;  %v1495_v51 = vld [vmem:[%s11671_s1 + $0x2b40] sm:$0xff]  ;;  %v1510_v53 = vld [vmem:[%s11671_s1 + $0x2bb8] sm:$0xff] }
 0x2c0   :  { %6460 = vmatprep.subr.mxu0 %v1412_v56  ;;  %6495 = vmatprep.subr.mxu1 %v1444_v57  ;;  %v1462_v54 = vld [vmem:[%s11671_s1 + $0x2a38] sm:$0xff]  ;;  %v1477_v56 = vld [vmem:[%s11671_s1 + $0x2ab0] sm:$0xff] }
 0x2c1   :  { %6461 = vmatpush3.msra.mxu0 %v1396_v58  ;;  %6496 = vmatpush3.msra.mxu1 %v1428_v59  ;;  %v1494_v55 = vld [vmem:[%s11671_s1 + $0x2b38] sm:$0xff]  ;;  %v1509_v57 = vld [vmem:[%s11671_s1 + $0x2bb0] sm:$0xff] }
 0x2c2   :  { %6462 = vmatprep.subr.mxu0 %v1411_v60  ;;  %6497 = vmatprep.subr.mxu1 %v1443_v61  ;;  %v1461_v58 = vld [vmem:[%s11671_s1 + $0x2a30] sm:$0xff]  ;;  %v1476_v60 = vld [vmem:[%s11671_s1 + $0x2aa8] sm:$0xff] }
 0x2c3   :  { %6463 = vmatpush3.msra.mxu0 %v1395_v62  ;;  %6498 = vmatpush3.msra.mxu1 %v1427_v63  ;;  %v1493_v59 = vld [vmem:[%s11671_s1 + $0x2b30] sm:$0xff]  ;;  %v1508_v61 = vld [vmem:[%s11671_s1 + $0x2ba8] sm:$0xff] }
 0x2c4   :  { %6464 = vmatprep.subr.mxu0 %v1410_v0  ;;  %6499 = vmatprep.subr.mxu1 %v1442_v1  ;;  %v1460_v62 = vld [vmem:[%s11671_s1 + $0x2a28] sm:$0xff]  ;;  %v1475_v0 = vld [vmem:[%s11671_s1 + $0x2aa0] sm:$0xff] }
 0x2c5   :  { %6465 = vmatpush3.msra.mxu0 %v1394_v2  ;;  %6500 = vmatpush3.msra.mxu1 %v1426_v3  ;;  %v1492_v63 = vld [vmem:[%s11671_s1 + $0x2b28] sm:$0xff]  ;;  %v1507_v1 = vld [vmem:[%s11671_s1 + $0x2ba0] sm:$0xff] }
 0x2c6   :  { %6466 = vmatprep.subr.mxu0 %v1409_v4  ;;  %6501 = vmatprep.subr.mxu1 %v1441_v5  ;;  %v1459_v2 = vld [vmem:[%s11671_s1 + $0x2a20] sm:$0xff]  ;;  %v1474_v4 = vld [vmem:[%s11671_s1 + $0x2a98] sm:$0xff] }
 0x2c7   :  { %6467 = vmatpush3.msra.mxu0 %v1393_v6  ;;  %6502 = vmatpush3.msra.mxu1 %v1425_v7  ;;  %v1491_v3 = vld [vmem:[%s11671_s1 + $0x2b20] sm:$0xff]  ;;  %v1506_v5 = vld [vmem:[%s11671_s1 + $0x2b98] sm:$0xff] }
 0x2c8   :  { %6468 = vmatprep.subr.mxu0 %v1408_v8  ;;  %6503 = vmatprep.subr.mxu1 %v1440_v9  ;;  %v1458_v6 = vld [vmem:[%s11671_s1 + $0x2a18] sm:$0xff]  ;;  %v1473_v8 = vld [vmem:[%s11671_s1 + $0x2a90] sm:$0xff] }
 0x2c9   :  { %6469 = vmatpush3.msra.mxu0 %v1392_v10  ;;  %6504 = vmatpush3.msra.mxu1 %v1424_v11  ;;  %v1490_v7 = vld [vmem:[%s11671_s1 + $0x2b18] sm:$0xff]  ;;  %v1505_v9 = vld [vmem:[%s11671_s1 + $0x2b90] sm:$0xff] }
 0x2ca   :  { %6470 = vmatprep.subr.mxu0 %v1407_v12  ;;  %6505 = vmatprep.subr.mxu1 %v1439_v13  ;;  %v1457_v10 = vld [vmem:[%s11671_s1 + $0x2a10] sm:$0xff]  ;;  %v1472_v12 = vld [vmem:[%s11671_s1 + $0x2a88] sm:$0xff] }
 0x2cb   :  { %6471 = vmatpush3.msra.mxu0 %v1391_v14  ;;  %4518 = vmatprep.mubr.f32.mxu0 %v96_v15  ;;  %v1489_v11 = vld [vmem:[%s11671_s1 + $0x2b10] sm:$0xff]  ;;  %v1504_v13 = vld [vmem:[%s11671_s1 + $0x2b88] sm:$0xff] }
 0x2cc   :  { %6506 = vmatpush3.msra.mxu1 %v1423_v16  ;;  %4519 = vmatmul.mubr.f32.vlgmr.msra.gmra.mxu0 %v95_v17  ;;  %v1456_v14 = vld [vmem:[%s11671_s1 + $0x2a08] sm:$0xff]  ;;  %v1471_v16 = vld [vmem:[%s11671_s1 + $0x2a80] sm:$0xff] }
 0x2cd   :  { %4588 = vmatprep.mubr.f32.mxu1 %v98_v18  ;;  %6510 = vmatprep.subr.mxu0 %v1486_v19  ;;  %v1488_v15 = vld [vmem:[%s11671_s1 + $0x2b08] sm:$0xff]  ;;  %v1503_v17 = vld [vmem:[%s11671_s1 + $0x2b80] sm:$0xff] }
 0x2ce   :  { %6545 = vmatprep.subr.mxu1 %v1518_v20  ;;  %4589 = vmatmul.mubr.f32.vlgmr.msra.gmra.mxu1 %v97_v21  ;;  %v1455_v18 = vld [vmem:[%s11671_s1 + $0x2a00] sm:$0xff]  ;;  %v100_v19 = vld [vmem:[%s11670_s0 + $0x2a8] sm:$0xff] }
 0x2cf   :  { %6511 = vmatpush3.msra.mxu0 %v1470_v22  ;;  %6546 = vmatpush3.msra.mxu1 %v1502_v23  ;;  %v1487_v20 = vld [vmem:[%s11671_s1 + $0x2b00] sm:$0xff]  ;;  %v102_v22 = vld [vmem:[%s11670_s0 + $0x2b8] sm:$0xff] }
 0x2d0   :  { %6512 = vmatprep.subr.mxu0 %v1485_v24  ;;  %6547 = vmatprep.subr.mxu1 %v1517_v25  ;;  %v99_v21 = vld [vmem:[%s11670_s0 + $0x2a0] sm:$0xff]  ;;  %v1550_v23 = vld [vmem:[%s11671_s1 + $0x2cf8] sm:$0xff]  ;;  %v101_v25 = vld [vmem:[%s11670_s0 + $0x2b0] sm:$0xff] }
 0x2d1   :  { %6513 = vmatpush3.msra.mxu0 %v1469_v26  ;;  %6548 = vmatpush3.msra.mxu1 %v1501_v27  ;;  %v1582_v24 = vld [vmem:[%s11671_s1 + $0x2df8] sm:$0xff] }
 0x2d2   :  { %6514 = vmatprep.subr.mxu0 %v1484_v28  ;;  %6549 = vmatprep.subr.mxu1 %v1516_v29  ;;  %v1534_v26 = vld [vmem:[%s11671_s1 + $0x2c78] sm:$0xff]  ;;  %v1549_v28 = vld [vmem:[%s11671_s1 + $0x2cf0] sm:$0xff] }
 0x2d3   :  { %6515 = vmatpush3.msra.mxu0 %v1468_v30  ;;  %6550 = vmatpush3.msra.mxu1 %v1500_v31  ;;  %v1566_v27 = vld [vmem:[%s11671_s1 + $0x2d78] sm:$0xff]  ;;  %v1581_v29 = vld [vmem:[%s11671_s1 + $0x2df0] sm:$0xff] }
 0x2d4   :  { %6516 = vmatprep.subr.mxu0 %v1483_v32  ;;  %6551 = vmatprep.subr.mxu1 %v1515_v33  ;;  %v1533_v30 = vld [vmem:[%s11671_s1 + $0x2c70] sm:$0xff]  ;;  %v1548_v32 = vld [vmem:[%s11671_s1 + $0x2ce8] sm:$0xff] }
 0x2d5   :  { %6517 = vmatpush3.msra.mxu0 %v1467_v34  ;;  %6552 = vmatpush3.msra.mxu1 %v1499_v35  ;;  %v1565_v31 = vld [vmem:[%s11671_s1 + $0x2d70] sm:$0xff]  ;;  %v1580_v33 = vld [vmem:[%s11671_s1 + $0x2de8] sm:$0xff] }
 0x2d6   :  { %6518 = vmatprep.subr.mxu0 %v1482_v36  ;;  %6553 = vmatprep.subr.mxu1 %v1514_v37  ;;  %v1532_v34 = vld [vmem:[%s11671_s1 + $0x2c68] sm:$0xff]  ;;  %v1547_v36 = vld [vmem:[%s11671_s1 + $0x2ce0] sm:$0xff] }
 0x2d7   :  { %6519 = vmatpush3.msra.mxu0 %v1466_v38  ;;  %6554 = vmatpush3.msra.mxu1 %v1498_v39  ;;  %v1564_v35 = vld [vmem:[%s11671_s1 + $0x2d68] sm:$0xff]  ;;  %v1579_v37 = vld [vmem:[%s11671_s1 + $0x2de0] sm:$0xff] }
 0x2d8   :  { %6520 = vmatprep.subr.mxu0 %v1481_v40  ;;  %6555 = vmatprep.subr.mxu1 %v1513_v41  ;;  %v1531_v38 = vld [vmem:[%s11671_s1 + $0x2c60] sm:$0xff]  ;;  %v1546_v40 = vld [vmem:[%s11671_s1 + $0x2cd8] sm:$0xff] }
 0x2d9   :  { %6521 = vmatpush3.msra.mxu0 %v1465_v42  ;;  %6556 = vmatpush3.msra.mxu1 %v1497_v43  ;;  %v1563_v39 = vld [vmem:[%s11671_s1 + $0x2d60] sm:$0xff]  ;;  %v1578_v41 = vld [vmem:[%s11671_s1 + $0x2dd8] sm:$0xff] }
 0x2da   :  { %6522 = vmatprep.subr.mxu0 %v1480_v44  ;;  %6557 = vmatprep.subr.mxu1 %v1512_v45  ;;  %v1530_v42 = vld [vmem:[%s11671_s1 + $0x2c58] sm:$0xff]  ;;  %v1545_v44 = vld [vmem:[%s11671_s1 + $0x2cd0] sm:$0xff] }
 0x2db   :  { %6523 = vmatpush3.msra.mxu0 %v1464_v46  ;;  %6558 = vmatpush3.msra.mxu1 %v1496_v47  ;;  %v1562_v43 = vld [vmem:[%s11671_s1 + $0x2d58] sm:$0xff]  ;;  %v1577_v45 = vld [vmem:[%s11671_s1 + $0x2dd0] sm:$0xff] }
 0x2dc   :  { %6524 = vmatprep.subr.mxu0 %v1479_v48  ;;  %6559 = vmatprep.subr.mxu1 %v1511_v49  ;;  %v1529_v46 = vld [vmem:[%s11671_s1 + $0x2c50] sm:$0xff]  ;;  %v1544_v48 = vld [vmem:[%s11671_s1 + $0x2cc8] sm:$0xff] }
 0x2dd   :  { %6525 = vmatpush3.msra.mxu0 %v1463_v50  ;;  %6560 = vmatpush3.msra.mxu1 %v1495_v51  ;;  %v1561_v47 = vld [vmem:[%s11671_s1 + $0x2d50] sm:$0xff]  ;;  %v1576_v49 = vld [vmem:[%s11671_s1 + $0x2dc8] sm:$0xff] }
 0x2de   :  { %6526 = vmatprep.subr.mxu0 %v1478_v52  ;;  %6561 = vmatprep.subr.mxu1 %v1510_v53  ;;  %v1528_v50 = vld [vmem:[%s11671_s1 + $0x2c48] sm:$0xff]  ;;  %v1543_v52 = vld [vmem:[%s11671_s1 + $0x2cc0] sm:$0xff] }
 0x2df   :  { %6527 = vmatpush3.msra.mxu0 %v1462_v54  ;;  %6562 = vmatpush3.msra.mxu1 %v1494_v55  ;;  %v1560_v51 = vld [vmem:[%s11671_s1 + $0x2d48] sm:$0xff]  ;;  %v1575_v53 = vld [vmem:[%s11671_s1 + $0x2dc0] sm:$0xff] }
 0x2e0   :  { %6528 = vmatprep.subr.mxu0 %v1477_v56  ;;  %6563 = vmatprep.subr.mxu1 %v1509_v57  ;;  %v1527_v54 = vld [vmem:[%s11671_s1 + $0x2c40] sm:$0xff]  ;;  %v1542_v56 = vld [vmem:[%s11671_s1 + $0x2cb8] sm:$0xff] }
 0x2e1   :  { %6529 = vmatpush3.msra.mxu0 %v1461_v58  ;;  %6564 = vmatpush3.msra.mxu1 %v1493_v59  ;;  %v1559_v55 = vld [vmem:[%s11671_s1 + $0x2d40] sm:$0xff]  ;;  %v1574_v57 = vld [vmem:[%s11671_s1 + $0x2db8] sm:$0xff] }
 0x2e2   :  { %6530 = vmatprep.subr.mxu0 %v1476_v60  ;;  %6565 = vmatprep.subr.mxu1 %v1508_v61  ;;  %v1526_v58 = vld [vmem:[%s11671_s1 + $0x2c38] sm:$0xff]  ;;  %v1541_v60 = vld [vmem:[%s11671_s1 + $0x2cb0] sm:$0xff] }
 0x2e3   :  { %6531 = vmatpush3.msra.mxu0 %v1460_v62  ;;  %6566 = vmatpush3.msra.mxu1 %v1492_v63  ;;  %v1558_v59 = vld [vmem:[%s11671_s1 + $0x2d38] sm:$0xff]  ;;  %v1573_v61 = vld [vmem:[%s11671_s1 + $0x2db0] sm:$0xff] }
 0x2e4   :  { %6532 = vmatprep.subr.mxu0 %v1475_v0  ;;  %6567 = vmatprep.subr.mxu1 %v1507_v1  ;;  %v1525_v62 = vld [vmem:[%s11671_s1 + $0x2c30] sm:$0xff]  ;;  %v1540_v0 = vld [vmem:[%s11671_s1 + $0x2ca8] sm:$0xff] }
 0x2e5   :  { %6533 = vmatpush3.msra.mxu0 %v1459_v2  ;;  %6568 = vmatpush3.msra.mxu1 %v1491_v3  ;;  %v1557_v63 = vld [vmem:[%s11671_s1 + $0x2d30] sm:$0xff]  ;;  %v1572_v1 = vld [vmem:[%s11671_s1 + $0x2da8] sm:$0xff] }
 0x2e6   :  { %6534 = vmatprep.subr.mxu0 %v1474_v4  ;;  %6569 = vmatprep.subr.mxu1 %v1506_v5  ;;  %v1524_v2 = vld [vmem:[%s11671_s1 + $0x2c28] sm:$0xff]  ;;  %v1539_v4 = vld [vmem:[%s11671_s1 + $0x2ca0] sm:$0xff] }
 0x2e7   :  { %6535 = vmatpush3.msra.mxu0 %v1458_v6  ;;  %6570 = vmatpush3.msra.mxu1 %v1490_v7  ;;  %v1556_v3 = vld [vmem:[%s11671_s1 + $0x2d28] sm:$0xff]  ;;  %v1571_v5 = vld [vmem:[%s11671_s1 + $0x2da0] sm:$0xff] }
 0x2e8   :  { %6536 = vmatprep.subr.mxu0 %v1473_v8  ;;  %6571 = vmatprep.subr.mxu1 %v1505_v9  ;;  %v1523_v6 = vld [vmem:[%s11671_s1 + $0x2c20] sm:$0xff]  ;;  %v1538_v8 = vld [vmem:[%s11671_s1 + $0x2c98] sm:$0xff] }
 0x2e9   :  { %6537 = vmatpush3.msra.mxu0 %v1457_v10  ;;  %6572 = vmatpush3.msra.mxu1 %v1489_v11  ;;  %v1555_v7 = vld [vmem:[%s11671_s1 + $0x2d20] sm:$0xff]  ;;  %v1570_v9 = vld [vmem:[%s11671_s1 + $0x2d98] sm:$0xff] }
 0x2ea   :  { %6538 = vmatprep.subr.mxu0 %v1472_v12  ;;  %6573 = vmatprep.subr.mxu1 %v1504_v13  ;;  %v1522_v10 = vld [vmem:[%s11671_s1 + $0x2c18] sm:$0xff]  ;;  %v1537_v12 = vld [vmem:[%s11671_s1 + $0x2c90] sm:$0xff] }
 0x2eb   :  { %6539 = vmatpush3.msra.mxu0 %v1456_v14  ;;  %6574 = vmatpush3.msra.mxu1 %v1488_v15  ;;  %v1554_v11 = vld [vmem:[%s11671_s1 + $0x2d18] sm:$0xff]  ;;  %v1569_v13 = vld [vmem:[%s11671_s1 + $0x2d90] sm:$0xff] }
 0x2ec   :  { %6540 = vmatprep.subr.mxu0 %v1471_v16  ;;  %6575 = vmatprep.subr.mxu1 %v1503_v17  ;;  %v1521_v14 = vld [vmem:[%s11671_s1 + $0x2c10] sm:$0xff]  ;;  %v1536_v16 = vld [vmem:[%s11671_s1 + $0x2c88] sm:$0xff] }
 0x2ed   :  { %6541 = vmatpush3.msra.mxu0 %v1455_v18  ;;  %4658 = vmatprep.mubr.f32.mxu0 %v100_v19  ;;  %v1553_v15 = vld [vmem:[%s11671_s1 + $0x2d10] sm:$0xff]  ;;  %v1568_v17 = vld [vmem:[%s11671_s1 + $0x2d88] sm:$0xff] }
 0x2ee   :  { %6576 = vmatpush3.msra.mxu1 %v1487_v20  ;;  %4659 = vmatmul.mubr.f32.vlgmr.msra.gmra.mxu0 %v99_v21  ;;  %v1520_v18 = vld [vmem:[%s11671_s1 + $0x2c08] sm:$0xff]  ;;  %v1535_v20 = vld [vmem:[%s11671_s1 + $0x2c80] sm:$0xff] }
 0x2ef   :  { %4728 = vmatprep.mubr.f32.mxu1 %v102_v22  ;;  %6580 = vmatprep.subr.mxu0 %v1550_v23  ;;  %v1552_v19 = vld [vmem:[%s11671_s1 + $0x2d08] sm:$0xff]  ;;  %v1567_v21 = vld [vmem:[%s11671_s1 + $0x2d80] sm:$0xff] }
 0x2f0   :  { %6615 = vmatprep.subr.mxu1 %v1582_v24  ;;  %4729 = vmatmul.mubr.f32.vlgmr.msra.gmra.mxu1 %v101_v25  ;;  %v1519_v22 = vld [vmem:[%s11671_s1 + $0x2c00] sm:$0xff]  ;;  %v104_v23 = vld [vmem:[%s11670_s0 + $0x2c8] sm:$0xff] }
 0x2f1   :  { %6581 = vmatpush3.msra.mxu0 %v1534_v26  ;;  %6616 = vmatpush3.msra.mxu1 %v1566_v27  ;;  %v1551_v24 = vld [vmem:[%s11671_s1 + $0x2d00] sm:$0xff]  ;;  %v106_v26 = vld [vmem:[%s11670_s0 + $0x2d8] sm:$0xff] }
 0x2f2   :  { %6582 = vmatprep.subr.mxu0 %v1549_v28  ;;  %6617 = vmatprep.subr.mxu1 %v1581_v29  ;;  %v103_v25 = vld [vmem:[%s11670_s0 + $0x2c0] sm:$0xff]  ;;  %v1614_v27 = vld [vmem:[%s11671_s1 + $0x2ef8] sm:$0xff]  ;;  %v105_v29 = vld [vmem:[%s11670_s0 + $0x2d0] sm:$0xff] }
 0x2f3   :  { %6583 = vmatpush3.msra.mxu0 %v1533_v30  ;;  %6618 = vmatpush3.msra.mxu1 %v1565_v31  ;;  %v1646_v28 = vld [vmem:[%s11671_s1 + $0x2ff8] sm:$0xff] }
 0x2f4   :  { %6584 = vmatprep.subr.mxu0 %v1548_v32  ;;  %6619 = vmatprep.subr.mxu1 %v1580_v33  ;;  %v1598_v30 = vld [vmem:[%s11671_s1 + $0x2e78] sm:$0xff]  ;;  %v1613_v32 = vld [vmem:[%s11671_s1 + $0x2ef0] sm:$0xff] }
 0x2f5   :  { %6585 = vmatpush3.msra.mxu0 %v1532_v34  ;;  %6620 = vmatpush3.msra.mxu1 %v1564_v35  ;;  %v1630_v31 = vld [vmem:[%s11671_s1 + $0x2f78] sm:$0xff]  ;;  %v1645_v33 = vld [vmem:[%s11671_s1 + $0x2ff0] sm:$0xff] }
 0x2f6   :  { %6586 = vmatprep.subr.mxu0 %v1547_v36  ;;  %6621 = vmatprep.subr.mxu1 %v1579_v37  ;;  %v1597_v34 = vld [vmem:[%s11671_s1 + $0x2e70] sm:$0xff]  ;;  %v1612_v36 = vld [vmem:[%s11671_s1 + $0x2ee8] sm:$0xff] }
 0x2f7   :  { %6587 = vmatpush3.msra.mxu0 %v1531_v38  ;;  %6622 = vmatpush3.msra.mxu1 %v1563_v39  ;;  %v1629_v35 = vld [vmem:[%s11671_s1 + $0x2f70] sm:$0xff]  ;;  %v1644_v37 = vld [vmem:[%s11671_s1 + $0x2fe8] sm:$0xff] }
 0x2f8   :  { %6588 = vmatprep.subr.mxu0 %v1546_v40  ;;  %6623 = vmatprep.subr.mxu1 %v1578_v41  ;;  %v1596_v38 = vld [vmem:[%s11671_s1 + $0x2e68] sm:$0xff]  ;;  %v1611_v40 = vld [vmem:[%s11671_s1 + $0x2ee0] sm:$0xff] }
 0x2f9   :  { %6589 = vmatpush3.msra.mxu0 %v1530_v42  ;;  %6624 = vmatpush3.msra.mxu1 %v1562_v43  ;;  %v1628_v39 = vld [vmem:[%s11671_s1 + $0x2f68] sm:$0xff]  ;;  %v1643_v41 = vld [vmem:[%s11671_s1 + $0x2fe0] sm:$0xff] }
 0x2fa   :  { %6590 = vmatprep.subr.mxu0 %v1545_v44  ;;  %6625 = vmatprep.subr.mxu1 %v1577_v45  ;;  %v1595_v42 = vld [vmem:[%s11671_s1 + $0x2e60] sm:$0xff]  ;;  %v1610_v44 = vld [vmem:[%s11671_s1 + $0x2ed8] sm:$0xff] }
 0x2fb   :  { %6591 = vmatpush3.msra.mxu0 %v1529_v46  ;;  %6626 = vmatpush3.msra.mxu1 %v1561_v47  ;;  %v1627_v43 = vld [vmem:[%s11671_s1 + $0x2f60] sm:$0xff]  ;;  %v1642_v45 = vld [vmem:[%s11671_s1 + $0x2fd8] sm:$0xff] }
 0x2fc   :  { %6592 = vmatprep.subr.mxu0 %v1544_v48  ;;  %6627 = vmatprep.subr.mxu1 %v1576_v49  ;;  %v1594_v46 = vld [vmem:[%s11671_s1 + $0x2e58] sm:$0xff]  ;;  %v1609_v48 = vld [vmem:[%s11671_s1 + $0x2ed0] sm:$0xff] }
 0x2fd   :  { %6593 = vmatpush3.msra.mxu0 %v1528_v50  ;;  %6628 = vmatpush3.msra.mxu1 %v1560_v51  ;;  %v1626_v47 = vld [vmem:[%s11671_s1 + $0x2f58] sm:$0xff]  ;;  %v1641_v49 = vld [vmem:[%s11671_s1 + $0x2fd0] sm:$0xff] }
 0x2fe   :  { %6594 = vmatprep.subr.mxu0 %v1543_v52  ;;  %6629 = vmatprep.subr.mxu1 %v1575_v53  ;;  %v1593_v50 = vld [vmem:[%s11671_s1 + $0x2e50] sm:$0xff]  ;;  %v1608_v52 = vld [vmem:[%s11671_s1 + $0x2ec8] sm:$0xff] }
 0x2ff   :  { %6595 = vmatpush3.msra.mxu0 %v1527_v54  ;;  %6630 = vmatpush3.msra.mxu1 %v1559_v55  ;;  %v1625_v51 = vld [vmem:[%s11671_s1 + $0x2f50] sm:$0xff]  ;;  %v1640_v53 = vld [vmem:[%s11671_s1 + $0x2fc8] sm:$0xff] }
 0x300   :  { %6596 = vmatprep.subr.mxu0 %v1542_v56  ;;  %6631 = vmatprep.subr.mxu1 %v1574_v57  ;;  %v1592_v54 = vld [vmem:[%s11671_s1 + $0x2e48] sm:$0xff]  ;;  %v1607_v56 = vld [vmem:[%s11671_s1 + $0x2ec0] sm:$0xff] }
 0x301   :  { %6597 = vmatpush3.msra.mxu0 %v1526_v58  ;;  %6632 = vmatpush3.msra.mxu1 %v1558_v59  ;;  %v1624_v55 = vld [vmem:[%s11671_s1 + $0x2f48] sm:$0xff]  ;;  %v1639_v57 = vld [vmem:[%s11671_s1 + $0x2fc0] sm:$0xff] }
 0x302   :  { %6598 = vmatprep.subr.mxu0 %v1541_v60  ;;  %6633 = vmatprep.subr.mxu1 %v1573_v61  ;;  %v1591_v58 = vld [vmem:[%s11671_s1 + $0x2e40] sm:$0xff]  ;;  %v1606_v60 = vld [vmem:[%s11671_s1 + $0x2eb8] sm:$0xff] }
 0x303   :  { %6599 = vmatpush3.msra.mxu0 %v1525_v62  ;;  %6634 = vmatpush3.msra.mxu1 %v1557_v63  ;;  %v1623_v59 = vld [vmem:[%s11671_s1 + $0x2f40] sm:$0xff]  ;;  %v1638_v61 = vld [vmem:[%s11671_s1 + $0x2fb8] sm:$0xff] }
 0x304   :  { %6600 = vmatprep.subr.mxu0 %v1540_v0  ;;  %6635 = vmatprep.subr.mxu1 %v1572_v1  ;;  %v1590_v62 = vld [vmem:[%s11671_s1 + $0x2e38] sm:$0xff]  ;;  %v1605_v0 = vld [vmem:[%s11671_s1 + $0x2eb0] sm:$0xff] }
 0x305   :  { %6601 = vmatpush3.msra.mxu0 %v1524_v2  ;;  %6636 = vmatpush3.msra.mxu1 %v1556_v3  ;;  %v1622_v63 = vld [vmem:[%s11671_s1 + $0x2f38] sm:$0xff]  ;;  %v1637_v1 = vld [vmem:[%s11671_s1 + $0x2fb0] sm:$0xff] }
 0x306   :  { %6602 = vmatprep.subr.mxu0 %v1539_v4  ;;  %6637 = vmatprep.subr.mxu1 %v1571_v5  ;;  %v1589_v2 = vld [vmem:[%s11671_s1 + $0x2e30] sm:$0xff]  ;;  %v1604_v4 = vld [vmem:[%s11671_s1 + $0x2ea8] sm:$0xff] }
 0x307   :  { %6603 = vmatpush3.msra.mxu0 %v1523_v6  ;;  %6638 = vmatpush3.msra.mxu1 %v1555_v7  ;;  %v1621_v3 = vld [vmem:[%s11671_s1 + $0x2f30] sm:$0xff]  ;;  %v1636_v5 = vld [vmem:[%s11671_s1 + $0x2fa8] sm:$0xff] }
 0x308   :  { %6604 = vmatprep.subr.mxu0 %v1538_v8  ;;  %6639 = vmatprep.subr.mxu1 %v1570_v9  ;;  %v1588_v6 = vld [vmem:[%s11671_s1 + $0x2e28] sm:$0xff]  ;;  %v1603_v8 = vld [vmem:[%s11671_s1 + $0x2ea0] sm:$0xff] }
 0x309   :  { %6605 = vmatpush3.msra.mxu0 %v1522_v10  ;;  %6640 = vmatpush3.msra.mxu1 %v1554_v11  ;;  %v1620_v7 = vld [vmem:[%s11671_s1 + $0x2f28] sm:$0xff]  ;;  %v1635_v9 = vld [vmem:[%s11671_s1 + $0x2fa0] sm:$0xff] }
 0x30a   :  { %6606 = vmatprep.subr.mxu0 %v1537_v12  ;;  %6641 = vmatprep.subr.mxu1 %v1569_v13  ;;  %v1587_v10 = vld [vmem:[%s11671_s1 + $0x2e20] sm:$0xff]  ;;  %v1602_v12 = vld [vmem:[%s11671_s1 + $0x2e98] sm:$0xff] }
 0x30b   :  { %6607 = vmatpush3.msra.mxu0 %v1521_v14  ;;  %6642 = vmatpush3.msra.mxu1 %v1553_v15  ;;  %v1619_v11 = vld [vmem:[%s11671_s1 + $0x2f20] sm:$0xff]  ;;  %v1634_v13 = vld [vmem:[%s11671_s1 + $0x2f98] sm:$0xff] }
 0x30c   :  { %6608 = vmatprep.subr.mxu0 %v1536_v16  ;;  %6643 = vmatprep.subr.mxu1 %v1568_v17  ;;  %v1586_v14 = vld [vmem:[%s11671_s1 + $0x2e18] sm:$0xff]  ;;  %v1601_v16 = vld [vmem:[%s11671_s1 + $0x2e90] sm:$0xff] }
 0x30d   :  { %6609 = vmatpush3.msra.mxu0 %v1520_v18  ;;  %6644 = vmatpush3.msra.mxu1 %v1552_v19  ;;  %v1618_v15 = vld [vmem:[%s11671_s1 + $0x2f18] sm:$0xff]  ;;  %v1633_v17 = vld [vmem:[%s11671_s1 + $0x2f90] sm:$0xff] }
 0x30e   :  { %6610 = vmatprep.subr.mxu0 %v1535_v20  ;;  %6645 = vmatprep.subr.mxu1 %v1567_v21  ;;  %v1585_v18 = vld [vmem:[%s11671_s1 + $0x2e10] sm:$0xff]  ;;  %v1600_v20 = vld [vmem:[%s11671_s1 + $0x2e88] sm:$0xff] }
 0x30f   :  { %6611 = vmatpush3.msra.mxu0 %v1519_v22  ;;  %4798 = vmatprep.mubr.f32.mxu0 %v104_v23  ;;  %v1617_v19 = vld [vmem:[%s11671_s1 + $0x2f10] sm:$0xff]  ;;  %v1632_v21 = vld [vmem:[%s11671_s1 + $0x2f88] sm:$0xff] }
 0x310   :  { %6646 = vmatpush3.msra.mxu1 %v1551_v24  ;;  %4799 = vmatmul.mubr.f32.vlgmr.msra.gmra.mxu0 %v103_v25  ;;  %v1584_v22 = vld [vmem:[%s11671_s1 + $0x2e08] sm:$0xff]  ;;  %v1599_v24 = vld [vmem:[%s11671_s1 + $0x2e80] sm:$0xff] }
 0x311   :  { %4868 = vmatprep.mubr.f32.mxu1 %v106_v26  ;;  %6650 = vmatprep.subr.mxu0 %v1614_v27  ;;  %v1616_v23 = vld [vmem:[%s11671_s1 + $0x2f08] sm:$0xff]  ;;  %v1631_v25 = vld [vmem:[%s11671_s1 + $0x2f80] sm:$0xff] }
 0x312   :  { %6685 = vmatprep.subr.mxu1 %v1646_v28  ;;  %4869 = vmatmul.mubr.f32.vlgmr.msra.gmra.mxu1 %v105_v29  ;;  %v1583_v26 = vld [vmem:[%s11671_s1 + $0x2e00] sm:$0xff]  ;;  %v108_v27 = vld [vmem:[%s11670_s0 + $0x2e8] sm:$0xff]  ;;  %v110_v29 = vld [vmem:[%s11670_s0 + $0x2f8] sm:$0xff] }
 0x313   :  { %6651 = vmatpush3.msra.mxu0 %v1598_v30  ;;  %6686 = vmatpush3.msra.mxu1 %v1630_v31  ;;  %v1615_v28 = vld [vmem:[%s11671_s1 + $0x2f00] sm:$0xff]  ;;  %v109_v31 = vld [vmem:[%s11670_s0 + $0x2f0] sm:$0xff] }
 0x314   :  { %6652 = vmatprep.subr.mxu0 %v1613_v32  ;;  %6687 = vmatprep.subr.mxu1 %v1645_v33  ;;  %v107_v30 = vld [vmem:[%s11670_s0 + $0x2e0] sm:$0xff]  ;;  %v5072_v32 = vpop.f32.mrf.mxu0  ;;  %v5107_v33 = vpop.f32.mrf.mxu1  ;;  %s6747_s0 = smov [#allocation2]  }
 0x315   :  { %6653 = vmatpush3.msra.mxu0 %v1597_v34  ;;  %6688 = vmatpush3.msra.mxu1 %v1629_v35 }
 0x316   :  { %6654 = vmatprep.subr.mxu0 %v1612_v36  ;;  %6689 = vmatprep.subr.mxu1 %v1644_v37  ;;  %v5073_v34 = vpop.f32.mrf.mxu0  ;;  %v5039_v37 = vld [vmem:[%s11672_s2] ss:$0 sm:$0xff]  ;;  %s5031_s2 = sshll.u32 %s6747_s0, 4  ;;  %s5032_s2 = int_to_ptr.vmem [resolvable:$true] %s5031_s2 }
 0x317   :  { %6655 = vmatpush3.msra.mxu0 %v1596_v38  ;;  %6690 = vmatpush3.msra.mxu1 %v1628_v39  ;;  %v5074_v36 = vadd.f32 %v5073_v34, %v5072_v32  ;;  %v5108_v38 = vpop.f32.mrf.mxu1  ;;  %s6725_s10 = scalar_lea.vmem %s5032_s2, 128  ;;  %p6730_p1 = scmp.lt.s32.totalorder %s5032_s2, %s5032_s2 }
 0x318   :  { %6656 = vmatprep.subr.mxu0 %v1611_v40  ;;  %6691 = vmatprep.subr.mxu1 %v1643_v41  ;;  %v5142_v35 = vpop.f32.mrf.mxu0  ;;  %p6726_p0 = scmp.ne.s32.totalorder %s5032_s2, %s6725_s10  ;;  %p6731_p2 = scmp.lt.s32.totalorder %s6725_s10, %s6725_s10 }
 0x319   :  { %6657 = vmatpush3.msra.mxu0 %v1595_v42  ;;  %6692 = vmatpush3.msra.mxu1 %v1627_v43  ;;  %v5177_v39 = vpop.f32.mrf.mxu1  ;;  %v1721_v41 = vadd.f32 %v5074_v36, %v5039_v37  ;;  %v5109_v42 = vadd.f32 %v5108_v38, %v5107_v33 }
 0x31a   :  { %6658 = vmatprep.subr.mxu0 %v1610_v44  ;;  %6693 = vmatprep.subr.mxu1 %v1642_v45  ;;  %v5143_v40 = vpop.f32.mrf.mxu0  ;;  %p6732_p3 = por %p6731_p2, %p6730_p1 }
 0x31b   :  { %6659 = vmatpush3.msra.mxu0 %v1594_v46  ;;  %6694 = vmatpush3.msra.mxu1 %v1626_v47  ;;  %v5144_v44 = vadd.f32 %v5143_v40, %v5142_v35  ;;  %v5178_v45 = vpop.f32.mrf.mxu1  ;;  %v1791_v46 = vadd.f32 %v5109_v42, %v1721_v41 }
 0x31c   :  { %6660 = vmatprep.subr.mxu0 %v1609_v48  ;;  %6695 = vmatprep.subr.mxu1 %v1641_v49  ;;  %v5212_v43 = vpop.f32.mrf.mxu0  ;;  %p6733_p4 = pnand %p6732_p3, %p6726_p0 }
 0x31d   :  { %6661 = vmatpush3.msra.mxu0 %v1593_v50  ;;  %6696 = vmatpush3.msra.mxu1 %v1625_v51  ;;  %v5247_v47 = vpop.f32.mrf.mxu1  ;;  %v1861_v49 = vadd.f32 %v5144_v44, %v1791_v46  ;;  %v5179_v50 = vadd.f32 %v5178_v45, %v5177_v39 }
 0x31e   :  { %6662 = vmatprep.subr.mxu0 %v1608_v52  ;;  %6697 = vmatprep.subr.mxu1 %v1640_v53  ;;  %v5213_v48 = vpop.f32.mrf.mxu0 }
 0x31f   :  { %6663 = vmatpush3.msra.mxu0 %v1592_v54  ;;  %6698 = vmatpush3.msra.mxu1 %v1624_v55  ;;  %v5214_v52 = vadd.f32 %v5213_v48, %v5212_v43  ;;  %v5248_v53 = vpop.f32.mrf.mxu1  ;;  %v1931_v54 = vadd.f32 %v5179_v50, %v1861_v49 }
 0x320   :  { %6664 = vmatprep.subr.mxu0 %v1607_v56  ;;  %6699 = vmatprep.subr.mxu1 %v1639_v57  ;;  %v5282_v51 = vpop.f32.mrf.mxu0 }
 0x321   :  { %6665 = vmatpush3.msra.mxu0 %v1591_v58  ;;  %6700 = vmatpush3.msra.mxu1 %v1623_v59  ;;  %v5317_v55 = vpop.f32.mrf.mxu1  ;;  %v2001_v57 = vadd.f32 %v5214_v52, %v1931_v54  ;;  %v5249_v58 = vadd.f32 %v5248_v53, %v5247_v47 }
 0x322   :  { %6666 = vmatprep.subr.mxu0 %v1606_v60  ;;  %6701 = vmatprep.subr.mxu1 %v1638_v61  ;;  %v5283_v56 = vpop.f32.mrf.mxu0 }
 0x323   :  { %6667 = vmatpush3.msra.mxu0 %v1590_v62  ;;  %6702 = vmatpush3.msra.mxu1 %v1622_v63  ;;  %v5284_v60 = vadd.f32 %v5283_v56, %v5282_v51  ;;  %v5318_v61 = vpop.f32.mrf.mxu1  ;;  %v2071_v62 = vadd.f32 %v5249_v58, %v2001_v57 }
 0x324   :  { %6668 = vmatprep.subr.mxu0 %v1605_v0  ;;  %6703 = vmatprep.subr.mxu1 %v1637_v1  ;;  %v5352_v59 = vpop.f32.mrf.mxu0 }
 0x325   :  { %6669 = vmatpush3.msra.mxu0 %v1589_v2  ;;  %6704 = vmatpush3.msra.mxu1 %v1621_v3  ;;  %v5387_v63 = vpop.f32.mrf.mxu1  ;;  %v2141_v1 = vadd.f32 %v5284_v60, %v2071_v62  ;;  %v5319_v2 = vadd.f32 %v5318_v61, %v5317_v55 }
 0x326   :  { %6670 = vmatprep.subr.mxu0 %v1604_v4  ;;  %6705 = vmatprep.subr.mxu1 %v1636_v5  ;;  %v5353_v0 = vpop.f32.mrf.mxu0 }
 0x327   :  { %6671 = vmatpush3.msra.mxu0 %v1588_v6  ;;  %6706 = vmatpush3.msra.mxu1 %v1620_v7  ;;  %v5354_v4 = vadd.f32 %v5353_v0, %v5352_v59  ;;  %v5388_v5 = vpop.f32.mrf.mxu1  ;;  %v2211_v6 = vadd.f32 %v5319_v2, %v2141_v1 }
 0x328   :  { %6672 = vmatprep.subr.mxu0 %v1603_v8  ;;  %6707 = vmatprep.subr.mxu1 %v1635_v9  ;;  %v5422_v3 = vpop.f32.mrf.mxu0 }
 0x329   :  { %6673 = vmatpush3.msra.mxu0 %v1587_v10  ;;  %6708 = vmatpush3.msra.mxu1 %v1619_v11  ;;  %v5457_v7 = vpop.f32.mrf.mxu1  ;;  %v2281_v9 = vadd.f32 %v5354_v4, %v2211_v6  ;;  %v5389_v10 = vadd.f32 %v5388_v5, %v5387_v63 }
 0x32a   :  { %6674 = vmatprep.subr.mxu0 %v1602_v12  ;;  %6709 = vmatprep.subr.mxu1 %v1634_v13  ;;  %v5423_v8 = vpop.f32.mrf.mxu0 }
 0x32b   :  { %6675 = vmatpush3.msra.mxu0 %v1586_v14  ;;  %6710 = vmatpush3.msra.mxu1 %v1618_v15  ;;  %v5424_v12 = vadd.f32 %v5423_v8, %v5422_v3  ;;  %v5458_v13 = vpop.f32.mrf.mxu1  ;;  %v2351_v14 = vadd.f32 %v5389_v10, %v2281_v9 }
 0x32c   :  { %6676 = vmatprep.subr.mxu0 %v1601_v16  ;;  %6711 = vmatprep.subr.mxu1 %v1633_v17  ;;  %v5492_v11 = vpop.f32.mrf.mxu0 }
 0x32d   :  { %6677 = vmatpush3.msra.mxu0 %v1585_v18  ;;  %6712 = vmatpush3.msra.mxu1 %v1617_v19  ;;  %v5527_v15 = vpop.f32.mrf.mxu1  ;;  %v2421_v17 = vadd.f32 %v5424_v12, %v2351_v14  ;;  %v5459_v18 = vadd.f32 %v5458_v13, %v5457_v7 }
 0x32e   :  { %6678 = vmatprep.subr.mxu0 %v1600_v20  ;;  %6713 = vmatprep.subr.mxu1 %v1632_v21  ;;  %v5493_v16 = vpop.f32.mrf.mxu0 }
 0x32f   :  { %6679 = vmatpush3.msra.mxu0 %v1584_v22  ;;  %6714 = vmatpush3.msra.mxu1 %v1616_v23  ;;  %v5494_v20 = vadd.f32 %v5493_v16, %v5492_v11  ;;  %v5528_v21 = vpop.f32.mrf.mxu1  ;;  %v2491_v22 = vadd.f32 %v5459_v18, %v2421_v17 }
 0x330   :  { %6680 = vmatprep.subr.mxu0 %v1599_v24  ;;  %6715 = vmatprep.subr.mxu1 %v1631_v25  ;;  %v5562_v19 = vpop.f32.mrf.mxu0 }
 0x331   :  { %6681 = vmatpush3.msra.mxu0 %v1583_v26  ;;  %4938 = vmatprep.mubr.f32.mxu0 %v108_v27  ;;  %v5597_v23 = vpop.f32.mrf.mxu1  ;;  %v2561_v25 = vadd.f32 %v5494_v20, %v2491_v22  ;;  %v5529_v26 = vadd.f32 %v5528_v21, %v5527_v15 }
 0x332   :  { %6716 = vmatpush3.msra.mxu1 %v1615_v28  ;;  %5008 = vmatprep.mubr.f32.mxu1 %v110_v29  ;;  %v5563_v24 = vpop.f32.mrf.mxu0 }
 0x333   :  { %4939 = vmatmul.mubr.f32.vlgmr.msra.gmra.mxu0 %v107_v30  ;;  %5009 = vmatmul.mubr.f32.vlgmr.msra.gmra.mxu1 %v109_v31  ;;  %v5564_v28 = vadd.f32 %v5563_v24, %v5562_v19  ;;  %v5598_v29 = vpop.f32.mrf.mxu1  ;;  %v2631_v30 = vadd.f32 %v5529_v26, %v2561_v25 }
 0x334   :  { %v5632_v27 = vpop.f32.mrf.mxu0  ;;  %v5599_v34 = vadd.f32 %v5598_v29, %v5597_v23 }
 0x335   :  { %v5667_v31 = vpop.f32.mrf.mxu1  ;;  %v2701_v33 = vadd.f32 %v5564_v28, %v2631_v30 }
 0x336   :  { %v5633_v32 = vpop.f32.mrf.mxu0 }
 0x337   :  { %v5634_v36 = vadd.f32 %v5633_v32, %v5632_v27  ;;  %v5668_v37 = vpop.f32.mrf.mxu1  ;;  %v2771_v38 = vadd.f32 %v5599_v34, %v2701_v33 }
 0x338   :  { %v5702_v35 = vpop.f32.mrf.mxu0  ;;  %v5669_v42 = vadd.f32 %v5668_v37, %v5667_v31 }
 0x339   :  { %v5737_v39 = vpop.f32.mrf.mxu1  ;;  %v2841_v41 = vadd.f32 %v5634_v36, %v2771_v38 }
 0x33a   :  { %v5703_v40 = vpop.f32.mrf.mxu0 }
 0x33b   :  { %v5704_v44 = vadd.f32 %v5703_v40, %v5702_v35  ;;  %v5738_v45 = vpop.f32.mrf.mxu1  ;;  %v2911_v46 = vadd.f32 %v5669_v42, %v2841_v41 }
 0x33c   :  { %v5772_v43 = vpop.f32.mrf.mxu0  ;;  %v5739_v50 = vadd.f32 %v5738_v45, %v5737_v39 }
 0x33d   :  { %v5807_v47 = vpop.f32.mrf.mxu1  ;;  %v2981_v49 = vadd.f32 %v5704_v44, %v2911_v46 }
 0x33e   :  { %v5773_v48 = vpop.f32.mrf.mxu0 }
 0x33f   :  { %v5774_v52 = vadd.f32 %v5773_v48, %v5772_v43  ;;  %v5808_v53 = vpop.f32.mrf.mxu1  ;;  %v3051_v54 = vadd.f32 %v5739_v50, %v2981_v49 }
 0x340   :  { %v5842_v51 = vpop.f32.mrf.mxu0  ;;  %v5809_v58 = vadd.f32 %v5808_v53, %v5807_v47 }
 0x341   :  { %v5877_v55 = vpop.f32.mrf.mxu1  ;;  %v3121_v57 = vadd.f32 %v5774_v52, %v3051_v54 }
 0x342   :  { %v5843_v56 = vpop.f32.mrf.mxu0 }
 0x343   :  { %v5844_v60 = vadd.f32 %v5843_v56, %v5842_v51  ;;  %v5878_v61 = vpop.f32.mrf.mxu1  ;;  %v3191_v62 = vadd.f32 %v5809_v58, %v3121_v57 }
 0x344   :  { %v5912_v59 = vpop.f32.mrf.mxu0  ;;  %v5879_v2 = vadd.f32 %v5878_v61, %v5877_v55 }
 0x345   :  { %v5947_v63 = vpop.f32.mrf.mxu1  ;;  %v3261_v1 = vadd.f32 %v5844_v60, %v3191_v62 }
 0x346   :  { %v5913_v0 = vpop.f32.mrf.mxu0 }
 0x347   :  { %v5914_v4 = vadd.f32 %v5913_v0, %v5912_v59  ;;  %v5948_v5 = vpop.f32.mrf.mxu1  ;;  %v3331_v6 = vadd.f32 %v5879_v2, %v3261_v1 }
 0x348   :  { %v5982_v3 = vpop.f32.mrf.mxu0  ;;  %v5949_v10 = vadd.f32 %v5948_v5, %v5947_v63 }
 0x349   :  { %v6017_v7 = vpop.f32.mrf.mxu1  ;;  %v3401_v9 = vadd.f32 %v5914_v4, %v3331_v6 }
 0x34a   :  { %v5983_v8 = vpop.f32.mrf.mxu0 }
 0x34b   :  { %v5984_v12 = vadd.f32 %v5983_v8, %v5982_v3  ;;  %v6018_v13 = vpop.f32.mrf.mxu1  ;;  %v3471_v14 = vadd.f32 %v5949_v10, %v3401_v9 }
 0x34c   :  { %v6052_v11 = vpop.f32.mrf.mxu0  ;;  %v6019_v18 = vadd.f32 %v6018_v13, %v6017_v7 }
 0x34d   :  { %v6087_v15 = vpop.f32.mrf.mxu1  ;;  %v3541_v17 = vadd.f32 %v5984_v12, %v3471_v14 }
 0x34e   :  { %v6053_v16 = vpop.f32.mrf.mxu0 }
 0x34f   :  { %v6054_v20 = vadd.f32 %v6053_v16, %v6052_v11  ;;  %v6088_v21 = vpop.f32.mrf.mxu1  ;;  %v3611_v22 = vadd.f32 %v6019_v18, %v3541_v17 }
 0x350   :  { %v6122_v19 = vpop.f32.mrf.mxu0  ;;  %v6089_v26 = vadd.f32 %v6088_v21, %v6087_v15 }
 0x351   :  { %v6157_v23 = vpop.f32.mrf.mxu1  ;;  %v3681_v25 = vadd.f32 %v6054_v20, %v3611_v22 }
 0x352   :  { %v6123_v24 = vpop.f32.mrf.mxu0 }
 0x353   :  { %v6124_v28 = vadd.f32 %v6123_v24, %v6122_v19  ;;  %v6158_v29 = vpop.f32.mrf.mxu1  ;;  %v3751_v30 = vadd.f32 %v6089_v26, %v3681_v25 }
 0x354   :  { %v6192_v27 = vpop.f32.mrf.mxu0  ;;  %v6159_v34 = vadd.f32 %v6158_v29, %v6157_v23 }
 0x355   :  { %v6227_v31 = vpop.f32.mrf.mxu1  ;;  %v3821_v33 = vadd.f32 %v6124_v28, %v3751_v30 }
 0x356   :  { %v6193_v32 = vpop.f32.mrf.mxu0 }
 0x357   :  { %v6194_v36 = vadd.f32 %v6193_v32, %v6192_v27  ;;  %v6228_v37 = vpop.f32.mrf.mxu1  ;;  %v3891_v38 = vadd.f32 %v6159_v34, %v3821_v33 }
 0x358   :  { %v6262_v35 = vpop.f32.mrf.mxu0  ;;  %v6229_v42 = vadd.f32 %v6228_v37, %v6227_v31 }
 0x359   :  { %v6297_v39 = vpop.f32.mrf.mxu1  ;;  %v3961_v41 = vadd.f32 %v6194_v36, %v3891_v38 }
 0x35a   :  { %v6263_v40 = vpop.f32.mrf.mxu0 }
 0x35b   :  { %v6264_v44 = vadd.f32 %v6263_v40, %v6262_v35  ;;  %v6298_v45 = vpop.f32.mrf.mxu1  ;;  %v4031_v46 = vadd.f32 %v6229_v42, %v3961_v41 }
 0x35c   :  { %v6332_v43 = vpop.f32.mrf.mxu0  ;;  %v6299_v50 = vadd.f32 %v6298_v45, %v6297_v39 }
 0x35d   :  { %v6367_v47 = vpop.f32.mrf.mxu1  ;;  %v4101_v49 = vadd.f32 %v6264_v44, %v4031_v46 }
 0x35e   :  { %v6333_v48 = vpop.f32.mrf.mxu0 }
 0x35f   :  { %v6334_v52 = vadd.f32 %v6333_v48, %v6332_v43  ;;  %v6368_v53 = vpop.f32.mrf.mxu1  ;;  %v4171_v54 = vadd.f32 %v6299_v50, %v4101_v49 }
 0x360   :  { %v6369_v58 = vadd.f32 %v6368_v53, %v6367_v47 }
 0x361   :  { %v4241_v57 = vadd.f32 %v6334_v52, %v4171_v54 }
 0x363   :  { %v4311_v62 = vadd.f32 %v6369_v58, %v4241_v57 }
 0x36a   :  { %v6402_v51 = vpop.f32.mrf.mxu0 }
 0x36c   :  { %v6437_v55 = vpop.f32.mrf.mxu1  ;;  %v6403_v56 = vpop.f32.mrf.mxu0 }
 0x36d   :  { %v6404_v60 = vadd.f32 %v6403_v56, %v6402_v51 }
 0x36e   :  { %v6438_v61 = vpop.f32.mrf.mxu1 }
 0x36f   :  { %v4381_v1 = vadd.f32 %v6404_v60, %v4311_v62  ;;  %v6439_v2 = vadd.f32 %v6438_v61, %v6437_v55 }
 0x371   :  { %v4451_v6 = vadd.f32 %v6439_v2, %v4381_v1 }
 0x38c   :  { %v6472_v59 = vpop.f32.mrf.mxu0 }
 0x38e   :  { %v6507_v63 = vpop.f32.mrf.mxu1  ;;  %v6473_v0 = vpop.f32.mrf.mxu0 }
 0x38f   :  { %v6474_v4 = vadd.f32 %v6473_v0, %v6472_v59 }
 0x390   :  { %v6508_v5 = vpop.f32.mrf.mxu1 }
 0x391   :  { %v4521_v9 = vadd.f32 %v6474_v4, %v4451_v6  ;;  %v6509_v10 = vadd.f32 %v6508_v5, %v6507_v63 }
 0x393   :  { %v4591_v14 = vadd.f32 %v6509_v10, %v4521_v9 }
 0x3ae   :  { %v6542_v3 = vpop.f32.mrf.mxu0 }
 0x3b0   :  { %v6577_v7 = vpop.f32.mrf.mxu1  ;;  %v6543_v8 = vpop.f32.mrf.mxu0 }
 0x3b1   :  { %v6544_v12 = vadd.f32 %v6543_v8, %v6542_v3 }
 0x3b2   :  { %v6578_v13 = vpop.f32.mrf.mxu1 }
 0x3b3   :  { %v4661_v17 = vadd.f32 %v6544_v12, %v4591_v14  ;;  %v6579_v18 = vadd.f32 %v6578_v13, %v6577_v7 }
 0x3b5   :  { %v4731_v21 = vadd.f32 %v6579_v18, %v4661_v17 }
 0x3d0   :  { %v6612_v11 = vpop.f32.mrf.mxu0 }
 0x3d2   :  { %v6647_v15 = vpop.f32.mrf.mxu1  ;;  %v6613_v16 = vpop.f32.mrf.mxu0 }
 0x3d3   :  { %v6614_v19 = vadd.f32 %v6613_v16, %v6612_v11 }
 0x3d4   :  { %v6648_v20 = vpop.f32.mrf.mxu1 }
 0x3d5   :  { %v4801_v22 = vadd.f32 %v6614_v19, %v4731_v21  ;;  %v6649_v23 = vadd.f32 %v6648_v20, %v6647_v15 }
 0x3d7   :  { %v4871_v28 = vadd.f32 %v6649_v23, %v4801_v22 }
 0x3f3   :  { %v6682_v24 = vpop.f32.mrf.mxu0  ;;  %v6717_v25 = vpop.f32.mrf.mxu1 }
 0x3f5   :  { %v6683_v26 = vpop.f32.mrf.mxu0  ;;  %v6718_v27 = vpop.f32.mrf.mxu1 }
 0x3f6   :  { %v6684_v29 = vadd.f32 %v6683_v26, %v6682_v24  ;;  %v6719_v31 = vadd.f32 %v6718_v27, %v6717_v25 }
 0x3f8   :  { %v4941_v30 = vadd.f32 %v6684_v29, %v4871_v28 }
 0x3fa   :  { %v5011_v32 = vadd.f32 %v6719_v31, %v4941_v30 }
 0x3fc   :  { %5014 = vmax.xlane.f32.xlu0 %v5011_v32 }
 0x485   :  { %v5015_v33 = vpop.xlane.xlu0 %5014 }
 0x486   :  { %v5016_v34 = vsub.f32 %v5011_v32, %v5015_v33 }
 0x488   :  { %v5017_v35 = vmul.f32 1.442695, %v5016_v34 }
 0x48a   :  { %6721 = vpow2.f32 %v5017_v35 }
 0x497   :  { %v6722_v36 = vpop.eup %6721 }
 0x498   :  { %5019 = vadd.xlane.f32.xlu0 %v6722_v36 }
 0x521   :  { %v5020_v37 = vpop.xlane.xlu0 %5019 }
 0x522   :  { %6723 = vlog2.f32 %v5020_v37 }
 0x52f   :  { %v6724_v38 = vpop.eup %6723 }
 0x530   :  { %v5022_v39 = vmul.f32 0.6931472, %v6724_v38 }
 0x532   :  { %v5023_v40 = vsub.f32 %v5016_v34, %v5022_v39 }
 0x534   :  { %5024 = vst [vmem:[#allocation2] sm:$0xff] %v5023_v40 }
 0x535   :  { %6736 = shalt.err (!%p6733_p4)
}
 0x536   :  { %5034 = dma.vmem_to_hbm [thread:$0]  %s5032_s2, 128, %s11673_s3, [#allocation3]  }
 0x537   :  { %6745 = dma.done.wait [#allocation3], 128  }
 0x538   :  { %6746 = vsyncadd [#allocation3], 4294967168 }
 0x539   :  { %5038 = vsyncpa [#allocation3], 1 }

</bundles_post_ra>
